<compile_context>
chip_gen: v7x
topology: tpu7x:2x2x1
jax: 0.10.0
libtpu: 0.0.40
codegen_flags: <defaults>
</compile_context>

<pallas_src>
import math

import numpy as np
import jax
import jax.numpy as jnp
from jax.experimental import pallas as pl
from jax.experimental.pallas import tpu as pltpu  # noqa: F401  (TPU backend)

# ---------------- configuration (mirrors the PyTorch `args`) ----------------
DIM_X, DIM_Y = 2, 1
DIM_H_LAT, NUM_H_LAT = 32, 2
DIM_LAT = 8
NUM_PARTICLES = 8
DIM_H, NUM_H = 32, 2
NLL_W = (1.0, 1.0, 1.0)          # args.nll_weight_vec
WHETHER_BASELINE = True
PRIOR_AS_PROPOSAL = False
AMORT_Y = True                   # asserted True in the PyTorch code
LOG_2PI = math.log(2.0 * math.pi)

DIN_ENC = DIM_X + DIM_Y          # context-encoder input width
DIN_DEC = DIM_X + DIM_LAT        # decoder input width


def _relu(x):
    return jnp.maximum(x, 0.0)


def _softplus(x):
    # numerically stable softplus == torch.nn.functional.softplus
    return jnp.maximum(x, 0.0) + jnp.log(1.0 + jnp.exp(-jnp.abs(x)))


# =========================  Fused NP_VEM kernel  =============================
# Single program, no grid: everything is resident in VMEM.
def _np_vem_kernel(
    # data (already flattened row-wise in the wrapper)
    xy_t_ref, xy_c_ref, xp_ref, yp_ref, eps_ref,
    # constant pooling / repeat / scatter matrices
    pool_t, pool_c, rep_bp, rep_xtp, rep_ztp,
    part_bp, seg_b_bp, part_btp, seg_b_btp,
    # proposal encoder params
    qw0, qb0, qw1, qb1, qw2, qb2, qwm, qbm, qwv, qbv,
    # prior encoder params
    pw0, pb0, pw1, pb1, pw2, pb2, pwm, pbm, pwv, pbv,
    # decoder params (first layer split into x-block and z-block)
    dwx, dwz, db0, dw1, db1, dw2, db2, dw3, db3,
    # outputs
    nll_ref, prop_nll_ref, nll_ev_ref,
):
    f32 = jnp.float32
    B = pool_t.shape[0]
    P = part_bp.shape[1]
    T = rep_xtp.shape[1] // B
    dim_y = yp_ref.shape[-1]
    dim_lat = eps_ref.shape[-1]

    def dot(a, b):
        return jnp.dot(a, b, preferred_element_type=f32)

    def encode(xy, pool, w0, b0, w1, b1, w2, b2, wm, bm, wv, bv):
        h = _relu(dot(xy, w0[...]) + b0[...])
        h = _relu(dot(h, w1[...]) + b1[...])
        h = _relu(dot(h, w2[...]) + b2[...])
        pooled = dot(pool, h)                                # per-task mean-pool via matmul
        return dot(pooled, wm[...]) + bm[...], dot(pooled, wv[...]) + bv[...]

    # ---- encoders: proposal on targets, prior on contexts (prior_as_proposal=False) ----
    q_mu, q_lv = encode(xy_t_ref[...], pool_t[...],
                        qw0, qb0, qw1, qb1, qw2, qb2, qwm, qbm, qwv, qbv)
    p_mu, p_lv = encode(xy_c_ref[...], pool_c[...],
                        pw0, pb0, pw1, pb1, pw2, pb2, pwm, pbm, pwv, pbv)
    q_std = jnp.exp(0.5 * q_lv)                              # (B, L)
    p_std = jnp.exp(0.5 * p_lv) + 1e-6                       # epsilon added to the STD (matches torch)

    # ---- reparameterized particles, row r = b*P + p ----
    eps = eps_ref[...]                                       # (B*P, L)
    rep = rep_bp[...]                                        # (B*P, B)
    z = dot(rep, q_mu) + eps * dot(rep, q_std)               # (B*P, L)

    # ---- prior / proposal log N(z; mu, diag(std^2)) per (b, p), in (B, P) lane layout ----
    dpr = (z - dot(rep, p_mu)) / dot(rep, p_std)
    sq_prior_col = jnp.sum(dpr * dpr, axis=-1, keepdims=True)    # (B*P, 1)
    sq_prop_col = jnp.sum(eps * eps, axis=-1, keepdims=True)     # (z - q_mu)/q_std == eps exactly

    # column (B*P,1) -> (B,P): elementwise scatter over lanes + segment-sum matmul
    sq_prior = dot(seg_b_bp[...], sq_prior_col * part_bp[...])   # (B, P)
    sq_prop = dot(seg_b_bp[...], sq_prop_col * part_bp[...])     # (B, P)
    log_prior = (-0.5 * sq_prior
                 - jnp.sum(jnp.log(p_std), axis=-1, keepdims=True)
                 - 0.5 * dim_lat * LOG_2PI)
    log_prop = (-0.5 * sq_prop
                - jnp.sum(jnp.log(q_std), axis=-1, keepdims=True)
                - 0.5 * dim_lat * LOG_2PI)

    # ---- decoder over all (b, t, p) rows, row r = b*T*P + t*P + p (B*T*P = 128 rows) ----
    hx = dot(xp_ref[...], dwx[...]) + db0[...]               # (B*T, H)   x_pred @ Wx
    hz = dot(z, dwz[...])                                    # (B*P, H)   z      @ Wz
    h = _relu(dot(rep_xtp[...], hx) + dot(rep_ztp[...], hz)) # (B*T*P, H) implicit concat
    h = _relu(dot(h, dw1[...]) + db1[...])
    h = _relu(dot(h, dw2[...]) + db2[...])
    out = dot(h, dw3[...]) + db3[...]                        # (B*T*P, 2*dim_y)

    mu_y = out[:, :dim_y]
    sig_y = 0.1 + 0.9 * _softplus(out[:, dim_y:])
    y_exp = dot(rep_xtp[...], yp_ref[...])                   # (B*T*P, dim_y)
    dy = (y_exp - mu_y) * pl.reciprocal(sig_y, approx=True)
    logp_col = (-0.5 * jnp.sum(dy * dy, axis=-1, keepdims=True)
                - jnp.sum(jnp.log(sig_y), axis=-1, keepdims=True)
                - 0.5 * dim_y * LOG_2PI)                     # (B*T*P, 1) -- stays in VMEM

    # sum over target points -> (B, P) lane layout (never stored to HBM)
    log_cond_ev = dot(seg_b_btp[...], logp_col * part_btp[...])  # (B, P)
    mean_log_y = log_cond_ev * (1.0 / T)

    # ---- importance weights + the three VEM losses ----
    def lse(x):
        m = jnp.max(x, axis=-1, keepdims=True)
        return m + jnp.log(jnp.sum(jnp.exp(x - m), axis=-1, keepdims=True))

    log_iw = log_cond_ev + log_prior - log_prop
    # TODO(synk): if gradients are ever taken through this kernel, norm_iw /
    # iw_baseline must be treated as detached (custom VJP), as in the reference.
    norm_iw = jnp.exp(log_iw - lse(log_iw))                  # (B, P)
    ratio = log_prior - log_prop
    iw_baseline = jnp.exp(ratio - lse(ratio))                # (B, P)

    w0c, w1c, w2c = NLL_W
    if WHETHER_BASELINE:
        iw_logprob = (w0c * norm_iw * log_cond_ev
                      + w1c * (norm_iw - iw_baseline) * log_prior)
    else:
        iw_logprob = w0c * norm_iw * log_cond_ev + w1c * norm_iw * log_prior

    inv_b = 1.0 / B
    nll_ref[...] = -jnp.sum(iw_logprob, keepdims=True) * inv_b               # (1,1)
    nll_ev_ref[...] = -jnp.sum(norm_iw * mean_log_y, keepdims=True) * inv_b  # (1,1)
    prop_nll_ref[...] = -w2c * jnp.sum((norm_iw - 1.0 / P) * log_prop,
                                       keepdims=True) * inv_b                # (1,1)


# ------------- constant pooling / repeat / scatter matrices (host-side) -----
def _selection_constants(B, N_T, N_C, T, P):
    def mat(nr, nc, fn, val=1.0):
        m = np.zeros((nr, nc), np.float32)
        for r in range(nr):
            for c in range(nc):
                if fn(r, c):
                    m[r, c] = val
        return jnp.asarray(m)

    TP = T * P
    pool_t = mat(B, B * N_T, lambda r, c: c // N_T == r, 1.0 / N_T)   # per-task mean over target pts
    pool_c = mat(B, B * N_C, lambda r, c: c // N_C == r, 1.0 / N_C)   # per-task mean over context pts
    rep_bp = mat(B * P, B, lambda r, c: r // P == c)                  # repeat task row per particle
    rep_xtp = mat(B * TP, B * T, lambda r, c: r // P == c)            # repeat (b,t) row per particle
    rep_ztp = mat(B * TP, B * P, lambda r, c: (r // TP) * P + (r % P) == c)  # tile (b,p) row per target
    part_bp = mat(B * P, P, lambda r, c: r % P == c)                  # scatter column -> particle lane
    seg_b_bp = mat(B, B * P, lambda r, c: c // P == r)                # segment-sum over particles
    part_btp = mat(B * TP, P, lambda r, c: r % P == c)
    seg_b_btp = mat(B, B * TP, lambda r, c: c // TP == r)             # segment-sum over (t,p) per task
    return (pool_t, pool_c, rep_bp, rep_xtp, rep_ztp,
            part_bp, seg_b_bp, part_btp, seg_b_btp)


# ===========================  Parameter init  ================================
def _init_linear(key, fan_in, fan_out):
    kw, kb = jax.random.split(key)
    bound = 1.0 / math.sqrt(fan_in)
    w = jax.random.uniform(kw, (fan_in, fan_out), jnp.float32, -bound, bound)
    b = jax.random.uniform(kb, (1, fan_out), jnp.float32, -bound, bound)
    return w, b


def init_params(key):
    ks = jax.random.split(key, 16)

    def enc(koff):
        p = []
        for i, (fi, fo) in enumerate([(DIN_ENC, DIM_H_LAT),
                                      (DIM_H_LAT, DIM_H_LAT),
                                      (DIM_H_LAT, DIM_H_LAT),
                                      (DIM_H_LAT, DIM_LAT),    # mu head
                                      (DIM_H_LAT, DIM_LAT)]):  # logvar head
            w, b = _init_linear(ks[koff + i], fi, fo)
            p += [w, b]
        return p

    prior = enc(0)
    proposal = enc(5)
    dec = []
    for i, (fi, fo) in enumerate([(DIN_DEC, DIM_H), (DIM_H, DIM_H),
                                  (DIM_H, DIM_H), (DIM_H, 2 * DIM_Y)]):
        w, b = _init_linear(ks[10 + i], fi, fo)
        dec += [w, b]
    return {"prior": prior, "proposal": proposal, "dec": dec}


# ===========================  NP_VEM.forward  ================================
def np_vem_forward(params, x_c, y_c, x_t, y_t, x_pred, y_pred, sample_key):
    B, N_C, _ = x_c.shape
    N_T = x_t.shape[1]
    T = x_pred.shape[1]
    P = NUM_PARTICLES

    # flatten points into matmul rows (the only wrapper-side data movement)
    xy_t = jnp.concatenate([x_t, y_t], -1).reshape(B * N_T, DIN_ENC)
    xy_c = jnp.concatenate([x_c, y_c], -1).reshape(B * N_C, DIN_ENC)
    xp = x_pred.reshape(B * T, DIM_X)
    yp = y_pred.reshape(B * T, DIM_Y)
    # glue: eps ~ N(0,1) for the reparameterization trick (torch rsample).
    # TODO(synk): could move in-kernel via pltpu.prng_seed/stateful_normal.
    eps = jax.random.normal(sample_key, (B * P, DIM_LAT), jnp.float32)

    consts = _selection_constants(B, N_T, N_C, T, P)

    # split the decoder's first weight into the x-block and z-block so the
    # (B, T*P, dim_x+dim_lat) concat tensor is never materialized
    dec = params["dec"]
    dwx, dwz = dec[0][:DIM_X, :], dec[0][DIM_X:, :]
    dec_args = (dwx, dwz, dec[1]) + tuple(dec[2:])

    out_shape = tuple(jax.ShapeDtypeStruct((1, 1), jnp.float32) for _ in range(3))
    nll, prop_nll, nll_ev = pl.pallas_call(
        _np_vem_kernel,
        out_shape=out_shape,          # all inputs/outputs are single full-array VMEM blocks
    )(xy_t, xy_c, xp, yp, eps, *consts,
      *params["proposal"], *params["prior"], *dec_args)
    return nll[0, 0], prop_nll[0, 0], nll_ev[0, 0]


# ================================  main  =====================================
if __name__ == "__main__":
    root = jax.random.PRNGKey(0)
    k_data, k_param, k_sample = jax.random.split(root, 3)
    kd = jax.random.split(k_data, 6)

    B, N_C, N_T, N_PRED = 2, 8, 8, 8
    x_c = jax.random.normal(kd[0], (B, N_C, DIM_X), jnp.float32)
    y_c = jax.random.normal(kd[1], (B, N_C, DIM_Y), jnp.float32)
    x_t = jax.random.normal(kd[2], (B, N_T, DIM_X), jnp.float32)
    y_t = jax.random.normal(kd[3], (B, N_T, DIM_Y), jnp.float32)
    x_pred = jax.random.normal(kd[4], (B, N_PRED, DIM_X), jnp.float32)
    y_pred = jax.random.normal(kd[5], (B, N_PRED, DIM_Y), jnp.float32)

    params = init_params(k_param)
    fwd = jax.jit(np_vem_forward)
    iw_nll, iw_proposal_nll, iw_nll_evidence = fwd(
        params, x_c, y_c, x_t, y_t, x_pred, y_pred, k_sample)
    jax.block_until_ready((iw_nll, iw_proposal_nll, iw_nll_evidence))
    assert bool(jnp.isfinite(iw_nll)) and bool(jnp.isfinite(iw_proposal_nll)) \
        and bool(jnp.isfinite(iw_nll_evidence))
    print("KERNEL_OK")
</pallas_src>

<mosaic_0001>
module attributes {stable_mosaic.version = 11 : i64} {
  func.func @_np_vem_kernel(%arg0: memref<16x3xf32, #tpu.memory_space<vmem>>, %arg1: memref<16x3xf32, #tpu.memory_space<vmem>>, %arg2: memref<16x2xf32, #tpu.memory_space<vmem>>, %arg3: memref<16x1xf32, #tpu.memory_space<vmem>>, %arg4: memref<16x8xf32, #tpu.memory_space<vmem>>, %arg5: memref<2x16xf32, #tpu.memory_space<vmem>>, %arg6: memref<2x16xf32, #tpu.memory_space<vmem>>, %arg7: memref<16x2xf32, #tpu.memory_space<vmem>>, %arg8: memref<128x16xf32, #tpu.memory_space<vmem>>, %arg9: memref<128x16xf32, #tpu.memory_space<vmem>>, %arg10: memref<16x8xf32, #tpu.memory_space<vmem>>, %arg11: memref<2x16xf32, #tpu.memory_space<vmem>>, %arg12: memref<128x8xf32, #tpu.memory_space<vmem>>, %arg13: memref<2x128xf32, #tpu.memory_space<vmem>>, %arg14: memref<3x32xf32, #tpu.memory_space<vmem>>, %arg15: memref<1x32xf32, #tpu.memory_space<vmem>>, %arg16: memref<32x32xf32, #tpu.memory_space<vmem>>, %arg17: memref<1x32xf32, #tpu.memory_space<vmem>>, %arg18: memref<32x32xf32, #tpu.memory_space<vmem>>, %arg19: memref<1x32xf32, #tpu.memory_space<vmem>>, %arg20: memref<32x8xf32, #tpu.memory_space<vmem>>, %arg21: memref<1x8xf32, #tpu.memory_space<vmem>>, %arg22: memref<32x8xf32, #tpu.memory_space<vmem>>, %arg23: memref<1x8xf32, #tpu.memory_space<vmem>>, %arg24: memref<3x32xf32, #tpu.memory_space<vmem>>, %arg25: memref<1x32xf32, #tpu.memory_space<vmem>>, %arg26: memref<32x32xf32, #tpu.memory_space<vmem>>, %arg27: memref<1x32xf32, #tpu.memory_space<vmem>>, %arg28: memref<32x32xf32, #tpu.memory_space<vmem>>, %arg29: memref<1x32xf32, #tpu.memory_space<vmem>>, %arg30: memref<32x8xf32, #tpu.memory_space<vmem>>, %arg31: memref<1x8xf32, #tpu.memory_space<vmem>>, %arg32: memref<32x8xf32, #tpu.memory_space<vmem>>, %arg33: memref<1x8xf32, #tpu.memory_space<vmem>>, %arg34: memref<2x32xf32, #tpu.memory_space<vmem>>, %arg35: memref<8x32xf32, #tpu.memory_space<vmem>>, %arg36: memref<1x32xf32, #tpu.memory_space<vmem>>, %arg37: memref<32x32xf32, #tpu.memory_space<vmem>>, %arg38: memref<1x32xf32, #tpu.memory_space<vmem>>, %arg39: memref<32x32xf32, #tpu.memory_space<vmem>>, %arg40: memref<1x32xf32, #tpu.memory_space<vmem>>, %arg41: memref<32x2xf32, #tpu.memory_space<vmem>>, %arg42: memref<1x2xf32, #tpu.memory_space<vmem>>, %arg43: memref<1x1xf32, #tpu.memory_space<vmem>>, %arg44: memref<1x1xf32, #tpu.memory_space<vmem>>, %arg45: memref<1x1xf32, #tpu.memory_space<vmem>>) attributes {dimension_semantics = [], scalar_prefetch = 0 : i64, scratch_operands = 0 : i64, tpu.core_type = #tpu.core_type<tc>} {
    %c0 = arith.constant 0 : index
    %c0_0 = arith.constant 0 : index
    %0 = vector.load %arg0[%c0, %c0_0] : memref<16x3xf32, #tpu.memory_space<vmem>>, vector<16x3xf32>
    %c0_1 = arith.constant 0 : index
    %c0_2 = arith.constant 0 : index
    %1 = vector.load %arg5[%c0_1, %c0_2] : memref<2x16xf32, #tpu.memory_space<vmem>>, vector<2x16xf32>
    %c0_3 = arith.constant 0 : index
    %c0_4 = arith.constant 0 : index
    %2 = vector.load %arg14[%c0_3, %c0_4] : memref<3x32xf32, #tpu.memory_space<vmem>>, vector<3x32xf32>
    %cst = arith.constant dense<0.000000e+00> : vector<16x32xf32>
    %3 = tpu.matmul %0, %2, %cst {dimension_numbers = #tpu.dot_dimension_numbers<[1], [0], [0], [1], [0, 0, 1, 1], [], []>} : vector<16x3xf32>, vector<3x32xf32>, vector<16x32xf32> -> vector<16x32xf32>
    %c0_5 = arith.constant 0 : index
    %c0_6 = arith.constant 0 : index
    %4 = vector.load %arg15[%c0_5, %c0_6] : memref<1x32xf32, #tpu.memory_space<vmem>>, vector<1x32xf32>
    %5 = vector.broadcast %4 : vector<1x32xf32> to vector<16x32xf32>
    %6 = arith.addf %3, %5 : vector<16x32xf32>
    %cst_7 = arith.constant 0.000000e+00 : f32
    %7 = vector.broadcast %cst_7 : f32 to vector<16x32xf32>
    %8 = arith.maximumf %6, %7 : vector<16x32xf32>
    %c0_8 = arith.constant 0 : index
    %c0_9 = arith.constant 0 : index
    %9 = vector.load %arg16[%c0_8, %c0_9] : memref<32x32xf32, #tpu.memory_space<vmem>>, vector<32x32xf32>
    %cst_10 = arith.constant dense<0.000000e+00> : vector<16x32xf32>
    %10 = tpu.matmul %8, %9, %cst_10 {dimension_numbers = #tpu.dot_dimension_numbers<[1], [0], [0], [1], [0, 0, 1, 1], [], []>} : vector<16x32xf32>, vector<32x32xf32>, vector<16x32xf32> -> vector<16x32xf32>
    %c0_11 = arith.constant 0 : index
    %c0_12 = arith.constant 0 : index
    %11 = vector.load %arg17[%c0_11, %c0_12] : memref<1x32xf32, #tpu.memory_space<vmem>>, vector<1x32xf32>
    %12 = vector.broadcast %11 : vector<1x32xf32> to vector<16x32xf32>
    %13 = arith.addf %10, %12 : vector<16x32xf32>
    %cst_13 = arith.constant 0.000000e+00 : f32
    %14 = vector.broadcast %cst_13 : f32 to vector<16x32xf32>
    %15 = arith.maximumf %13, %14 : vector<16x32xf32>
    %c0_14 = arith.constant 0 : index
    %c0_15 = arith.constant 0 : index
    %16 = vector.load %arg18[%c0_14, %c0_15] : memref<32x32xf32, #tpu.memory_space<vmem>>, vector<32x32xf32>
    %cst_16 = arith.constant dense<0.000000e+00> : vector<16x32xf32>
    %17 = tpu.matmul %15, %16, %cst_16 {dimension_numbers = #tpu.dot_dimension_numbers<[1], [0], [0], [1], [0, 0, 1, 1], [], []>} : vector<16x32xf32>, vector<32x32xf32>, vector<16x32xf32> -> vector<16x32xf32>
    %c0_17 = arith.constant 0 : index
    %c0_18 = arith.constant 0 : index
    %18 = vector.load %arg19[%c0_17, %c0_18] : memref<1x32xf32, #tpu.memory_space<vmem>>, vector<1x32xf32>
    %19 = vector.broadcast %18 : vector<1x32xf32> to vector<16x32xf32>
    %20 = arith.addf %17, %19 : vector<16x32xf32>
    %cst_19 = arith.constant 0.000000e+00 : f32
    %21 = vector.broadcast %cst_19 : f32 to vector<16x32xf32>
    %22 = arith.maximumf %20, %21 : vector<16x32xf32>
    %cst_20 = arith.constant dense<0.000000e+00> : vector<2x32xf32>
    %23 = tpu.matmul %1, %22, %cst_20 {dimension_numbers = #tpu.dot_dimension_numbers<[1], [0], [0], [1], [0, 0, 1, 1], [], []>} : vector<2x16xf32>, vector<16x32xf32>, vector<2x32xf32> -> vector<2x32xf32>
    %c0_21 = arith.constant 0 : index
    %c0_22 = arith.constant 0 : index
    %24 = vector.load %arg20[%c0_21, %c0_22] : memref<32x8xf32, #tpu.memory_space<vmem>>, vector<32x8xf32>
    %cst_23 = arith.constant dense<0.000000e+00> : vector<2x8xf32>
    %25 = tpu.matmul %23, %24, %cst_23 {dimension_numbers = #tpu.dot_dimension_numbers<[1], [0], [0], [1], [0, 0, 1, 1], [], []>} : vector<2x32xf32>, vector<32x8xf32>, vector<2x8xf32> -> vector<2x8xf32>
    %c0_24 = arith.constant 0 : index
    %c0_25 = arith.constant 0 : index
    %26 = vector.load %arg21[%c0_24, %c0_25] : memref<1x8xf32, #tpu.memory_space<vmem>>, vector<1x8xf32>
    %27 = vector.broadcast %26 : vector<1x8xf32> to vector<2x8xf32>
    %28 = arith.addf %25, %27 : vector<2x8xf32>
    %c0_26 = arith.constant 0 : index
    %c0_27 = arith.constant 0 : index
    %29 = vector.load %arg22[%c0_26, %c0_27] : memref<32x8xf32, #tpu.memory_space<vmem>>, vector<32x8xf32>
    %cst_28 = arith.constant dense<0.000000e+00> : vector<2x8xf32>
    %30 = tpu.matmul %23, %29, %cst_28 {dimension_numbers = #tpu.dot_dimension_numbers<[1], [0], [0], [1], [0, 0, 1, 1], [], []>} : vector<2x32xf32>, vector<32x8xf32>, vector<2x8xf32> -> vector<2x8xf32>
    %c0_29 = arith.constant 0 : index
    %c0_30 = arith.constant 0 : index
    %31 = vector.load %arg23[%c0_29, %c0_30] : memref<1x8xf32, #tpu.memory_space<vmem>>, vector<1x8xf32>
    %32 = vector.broadcast %31 : vector<1x8xf32> to vector<2x8xf32>
    %33 = arith.addf %30, %32 : vector<2x8xf32>
    %c0_31 = arith.constant 0 : index
    %c0_32 = arith.constant 0 : index
    %34 = vector.load %arg1[%c0_31, %c0_32] : memref<16x3xf32, #tpu.memory_space<vmem>>, vector<16x3xf32>
    %c0_33 = arith.constant 0 : index
    %c0_34 = arith.constant 0 : index
    %35 = vector.load %arg6[%c0_33, %c0_34] : memref<2x16xf32, #tpu.memory_space<vmem>>, vector<2x16xf32>
    %c0_35 = arith.constant 0 : index
    %c0_36 = arith.constant 0 : index
    %36 = vector.load %arg24[%c0_35, %c0_36] : memref<3x32xf32, #tpu.memory_space<vmem>>, vector<3x32xf32>
    %cst_37 = arith.constant dense<0.000000e+00> : vector<16x32xf32>
    %37 = tpu.matmul %34, %36, %cst_37 {dimension_numbers = #tpu.dot_dimension_numbers<[1], [0], [0], [1], [0, 0, 1, 1], [], []>} : vector<16x3xf32>, vector<3x32xf32>, vector<16x32xf32> -> vector<16x32xf32>
    %c0_38 = arith.constant 0 : index
    %c0_39 = arith.constant 0 : index
    %38 = vector.load %arg25[%c0_38, %c0_39] : memref<1x32xf32, #tpu.memory_space<vmem>>, vector<1x32xf32>
    %39 = vector.broadcast %38 : vector<1x32xf32> to vector<16x32xf32>
    %40 = arith.addf %37, %39 : vector<16x32xf32>
    %cst_40 = arith.constant 0.000000e+00 : f32
    %41 = vector.broadcast %cst_40 : f32 to vector<16x32xf32>
    %42 = arith.maximumf %40, %41 : vector<16x32xf32>
    %c0_41 = arith.constant 0 : index
    %c0_42 = arith.constant 0 : index
    %43 = vector.load %arg26[%c0_41, %c0_42] : memref<32x32xf32, #tpu.memory_space<vmem>>, vector<32x32xf32>
    %cst_43 = arith.constant dense<0.000000e+00> : vector<16x32xf32>
    %44 = tpu.matmul %42, %43, %cst_43 {dimension_numbers = #tpu.dot_dimension_numbers<[1], [0], [0], [1], [0, 0, 1, 1], [], []>} : vector<16x32xf32>, vector<32x32xf32>, vector<16x32xf32> -> vector<16x32xf32>
    %c0_44 = arith.constant 0 : index
    %c0_45 = arith.constant 0 : index
    %45 = vector.load %arg27[%c0_44, %c0_45] : memref<1x32xf32, #tpu.memory_space<vmem>>, vector<1x32xf32>
    %46 = vector.broadcast %45 : vector<1x32xf32> to vector<16x32xf32>
    %47 = arith.addf %44, %46 : vector<16x32xf32>
    %cst_46 = arith.constant 0.000000e+00 : f32
    %48 = vector.broadcast %cst_46 : f32 to vector<16x32xf32>
    %49 = arith.maximumf %47, %48 : vector<16x32xf32>
    %c0_47 = arith.constant 0 : index
    %c0_48 = arith.constant 0 : index
    %50 = vector.load %arg28[%c0_47, %c0_48] : memref<32x32xf32, #tpu.memory_space<vmem>>, vector<32x32xf32>
    %cst_49 = arith.constant dense<0.000000e+00> : vector<16x32xf32>
    %51 = tpu.matmul %49, %50, %cst_49 {dimension_numbers = #tpu.dot_dimension_numbers<[1], [0], [0], [1], [0, 0, 1, 1], [], []>} : vector<16x32xf32>, vector<32x32xf32>, vector<16x32xf32> -> vector<16x32xf32>
    %c0_50 = arith.constant 0 : index
    %c0_51 = arith.constant 0 : index
    %52 = vector.load %arg29[%c0_50, %c0_51] : memref<1x32xf32, #tpu.memory_space<vmem>>, vector<1x32xf32>
    %53 = vector.broadcast %52 : vector<1x32xf32> to vector<16x32xf32>
    %54 = arith.addf %51, %53 : vector<16x32xf32>
    %cst_52 = arith.constant 0.000000e+00 : f32
    %55 = vector.broadcast %cst_52 : f32 to vector<16x32xf32>
    %56 = arith.maximumf %54, %55 : vector<16x32xf32>
    %cst_53 = arith.constant dense<0.000000e+00> : vector<2x32xf32>
    %57 = tpu.matmul %35, %56, %cst_53 {dimension_numbers = #tpu.dot_dimension_numbers<[1], [0], [0], [1], [0, 0, 1, 1], [], []>} : vector<2x16xf32>, vector<16x32xf32>, vector<2x32xf32> -> vector<2x32xf32>
    %c0_54 = arith.constant 0 : index
    %c0_55 = arith.constant 0 : index
    %58 = vector.load %arg30[%c0_54, %c0_55] : memref<32x8xf32, #tpu.memory_space<vmem>>, vector<32x8xf32>
    %cst_56 = arith.constant dense<0.000000e+00> : vector<2x8xf32>
    %59 = tpu.matmul %57, %58, %cst_56 {dimension_numbers = #tpu.dot_dimension_numbers<[1], [0], [0], [1], [0, 0, 1, 1], [], []>} : vector<2x32xf32>, vector<32x8xf32>, vector<2x8xf32> -> vector<2x8xf32>
    %c0_57 = arith.constant 0 : index
    %c0_58 = arith.constant 0 : index
    %60 = vector.load %arg31[%c0_57, %c0_58] : memref<1x8xf32, #tpu.memory_space<vmem>>, vector<1x8xf32>
    %61 = vector.broadcast %60 : vector<1x8xf32> to vector<2x8xf32>
    %62 = arith.addf %59, %61 : vector<2x8xf32>
    %c0_59 = arith.constant 0 : index
    %c0_60 = arith.constant 0 : index
    %63 = vector.load %arg32[%c0_59, %c0_60] : memref<32x8xf32, #tpu.memory_space<vmem>>, vector<32x8xf32>
    %cst_61 = arith.constant dense<0.000000e+00> : vector<2x8xf32>
    %64 = tpu.matmul %57, %63, %cst_61 {dimension_numbers = #tpu.dot_dimension_numbers<[1], [0], [0], [1], [0, 0, 1, 1], [], []>} : vector<2x32xf32>, vector<32x8xf32>, vector<2x8xf32> -> vector<2x8xf32>
    %c0_62 = arith.constant 0 : index
    %c0_63 = arith.constant 0 : index
    %65 = vector.load %arg33[%c0_62, %c0_63] : memref<1x8xf32, #tpu.memory_space<vmem>>, vector<1x8xf32>
    %66 = vector.broadcast %65 : vector<1x8xf32> to vector<2x8xf32>
    %67 = arith.addf %64, %66 : vector<2x8xf32>
    %cst_64 = arith.constant 5.000000e-01 : f32
    %68 = vector.broadcast %cst_64 : f32 to vector<2x8xf32>
    %69 = arith.mulf %68, %33 : vector<2x8xf32>
    %70 = math.exp %69 : vector<2x8xf32>
    %cst_65 = arith.constant 5.000000e-01 : f32
    %71 = vector.broadcast %cst_65 : f32 to vector<2x8xf32>
    %72 = arith.mulf %71, %67 : vector<2x8xf32>
    %73 = math.exp %72 : vector<2x8xf32>
    %cst_66 = arith.constant 9.99999997E-7 : f32
    %74 = vector.broadcast %cst_66 : f32 to vector<2x8xf32>
    %75 = arith.addf %73, %74 : vector<2x8xf32>
    %c0_67 = arith.constant 0 : index
    %c0_68 = arith.constant 0 : index
    %76 = vector.load %arg4[%c0_67, %c0_68] : memref<16x8xf32, #tpu.memory_space<vmem>>, vector<16x8xf32>
    %c0_69 = arith.constant 0 : index
    %c0_70 = arith.constant 0 : index
    %77 = vector.load %arg7[%c0_69, %c0_70] : memref<16x2xf32, #tpu.memory_space<vmem>>, vector<16x2xf32>
    %cst_71 = arith.constant dense<0.000000e+00> : vector<16x8xf32>
    %78 = tpu.matmul %77, %28, %cst_71 {dimension_numbers = #tpu.dot_dimension_numbers<[1], [0], [0], [1], [0, 0, 1, 1], [], []>} : vector<16x2xf32>, vector<2x8xf32>, vector<16x8xf32> -> vector<16x8xf32>
    %cst_72 = arith.constant dense<0.000000e+00> : vector<16x8xf32>
    %79 = tpu.matmul %77, %70, %cst_72 {dimension_numbers = #tpu.dot_dimension_numbers<[1], [0], [0], [1], [0, 0, 1, 1], [], []>} : vector<16x2xf32>, vector<2x8xf32>, vector<16x8xf32> -> vector<16x8xf32>
    %80 = arith.mulf %76, %79 : vector<16x8xf32>
    %81 = arith.addf %78, %80 : vector<16x8xf32>
    %cst_73 = arith.constant dense<0.000000e+00> : vector<16x8xf32>
    %82 = tpu.matmul %77, %62, %cst_73 {dimension_numbers = #tpu.dot_dimension_numbers<[1], [0], [0], [1], [0, 0, 1, 1], [], []>} : vector<16x2xf32>, vector<2x8xf32>, vector<16x8xf32> -> vector<16x8xf32>
    %83 = arith.subf %81, %82 : vector<16x8xf32>
    %cst_74 = arith.constant dense<0.000000e+00> : vector<16x8xf32>
    %84 = tpu.matmul %77, %75, %cst_74 {dimension_numbers = #tpu.dot_dimension_numbers<[1], [0], [0], [1], [0, 0, 1, 1], [], []>} : vector<16x2xf32>, vector<2x8xf32>, vector<16x8xf32> -> vector<16x8xf32>
    %85 = arith.divf %83, %84 : vector<16x8xf32>
    %86 = arith.mulf %85, %85 : vector<16x8xf32>
    %cst_75 = arith.constant dense<0.000000e+00> : vector<16xf32>
    %87 = vector.multi_reduction <add>, %86, %cst_75 [1] : vector<16x8xf32> to vector<16xf32>
    %88 = vector.shape_cast %87 : vector<16xf32> to vector<16x1xf32>
    %89 = arith.mulf %76, %76 : vector<16x8xf32>
    %cst_76 = arith.constant dense<0.000000e+00> : vector<16xf32>
    %90 = vector.multi_reduction <add>, %89, %cst_76 [1] : vector<16x8xf32> to vector<16xf32>
    %91 = vector.shape_cast %90 : vector<16xf32> to vector<16x1xf32>
    %c0_77 = arith.constant 0 : index
    %c0_78 = arith.constant 0 : index
    %92 = vector.load %arg11[%c0_77, %c0_78] : memref<2x16xf32, #tpu.memory_space<vmem>>, vector<2x16xf32>
    %c0_79 = arith.constant 0 : index
    %c0_80 = arith.constant 0 : index
    %93 = vector.load %arg10[%c0_79, %c0_80] : memref<16x8xf32, #tpu.memory_space<vmem>>, vector<16x8xf32>
    %94 = vector.broadcast %88 : vector<16x1xf32> to vector<16x8xf32>
    %95 = arith.mulf %94, %93 : vector<16x8xf32>
    %cst_81 = arith.constant dense<0.000000e+00> : vector<2x8xf32>
    %96 = tpu.matmul %92, %95, %cst_81 {dimension_numbers = #tpu.dot_dimension_numbers<[1], [0], [0], [1], [0, 0, 1, 1], [], []>} : vector<2x16xf32>, vector<16x8xf32>, vector<2x8xf32> -> vector<2x8xf32>
    %c0_82 = arith.constant 0 : index
    %c0_83 = arith.constant 0 : index
    %97 = vector.load %arg11[%c0_82, %c0_83] : memref<2x16xf32, #tpu.memory_space<vmem>>, vector<2x16xf32>
    %c0_84 = arith.constant 0 : index
    %c0_85 = arith.constant 0 : index
    %98 = vector.load %arg10[%c0_84, %c0_85] : memref<16x8xf32, #tpu.memory_space<vmem>>, vector<16x8xf32>
    %99 = vector.broadcast %91 : vector<16x1xf32> to vector<16x8xf32>
    %100 = arith.mulf %99, %98 : vector<16x8xf32>
    %cst_86 = arith.constant dense<0.000000e+00> : vector<2x8xf32>
    %101 = tpu.matmul %97, %100, %cst_86 {dimension_numbers = #tpu.dot_dimension_numbers<[1], [0], [0], [1], [0, 0, 1, 1], [], []>} : vector<2x16xf32>, vector<16x8xf32>, vector<2x8xf32> -> vector<2x8xf32>
    %cst_87 = arith.constant -5.000000e-01 : f32
    %102 = vector.broadcast %cst_87 : f32 to vector<2x8xf32>
    %103 = arith.mulf %102, %96 : vector<2x8xf32>
    %104 = math.log %75 : vector<2x8xf32>
    %cst_88 = arith.constant dense<0.000000e+00> : vector<2xf32>
    %105 = vector.multi_reduction <add>, %104, %cst_88 [1] : vector<2x8xf32> to vector<2xf32>
    %106 = vector.shape_cast %105 : vector<2xf32> to vector<2x1xf32>
    %107 = vector.broadcast %106 : vector<2x1xf32> to vector<2x8xf32>
    %108 = arith.subf %103, %107 : vector<2x8xf32>
    %cst_89 = arith.constant 7.35150814 : f32
    %109 = vector.broadcast %cst_89 : f32 to vector<2x8xf32>
    %110 = arith.subf %108, %109 : vector<2x8xf32>
    %cst_90 = arith.constant -5.000000e-01 : f32
    %111 = vector.broadcast %cst_90 : f32 to vector<2x8xf32>
    %112 = arith.mulf %111, %101 : vector<2x8xf32>
    %113 = math.log %70 : vector<2x8xf32>
    %cst_91 = arith.constant dense<0.000000e+00> : vector<2xf32>
    %114 = vector.multi_reduction <add>, %113, %cst_91 [1] : vector<2x8xf32> to vector<2xf32>
    %115 = vector.shape_cast %114 : vector<2xf32> to vector<2x1xf32>
    %116 = vector.broadcast %115 : vector<2x1xf32> to vector<2x8xf32>
    %117 = arith.subf %112, %116 : vector<2x8xf32>
    %cst_92 = arith.constant 7.35150814 : f32
    %118 = vector.broadcast %cst_92 : f32 to vector<2x8xf32>
    %119 = arith.subf %117, %118 : vector<2x8xf32>
    %c0_93 = arith.constant 0 : index
    %c0_94 = arith.constant 0 : index
    %120 = vector.load %arg2[%c0_93, %c0_94] : memref<16x2xf32, #tpu.memory_space<vmem>>, vector<16x2xf32>
    %c0_95 = arith.constant 0 : index
    %c0_96 = arith.constant 0 : index
    %121 = vector.load %arg34[%c0_95, %c0_96] : memref<2x32xf32, #tpu.memory_space<vmem>>, vector<2x32xf32>
    %cst_97 = arith.constant dense<0.000000e+00> : vector<16x32xf32>
    %122 = tpu.matmul %120, %121, %cst_97 {dimension_numbers = #tpu.dot_dimension_numbers<[1], [0], [0], [1], [0, 0, 1, 1], [], []>} : vector<16x2xf32>, vector<2x32xf32>, vector<16x32xf32> -> vector<16x32xf32>
    %c0_98 = arith.constant 0 : index
    %c0_99 = arith.constant 0 : index
    %123 = vector.load %arg36[%c0_98, %c0_99] : memref<1x32xf32, #tpu.memory_space<vmem>>, vector<1x32xf32>
    %124 = vector.broadcast %123 : vector<1x32xf32> to vector<16x32xf32>
    %125 = arith.addf %122, %124 : vector<16x32xf32>
    %c0_100 = arith.constant 0 : index
    %c0_101 = arith.constant 0 : index
    %126 = vector.load %arg35[%c0_100, %c0_101] : memref<8x32xf32, #tpu.memory_space<vmem>>, vector<8x32xf32>
    %cst_102 = arith.constant dense<0.000000e+00> : vector<16x32xf32>
    %127 = tpu.matmul %81, %126, %cst_102 {dimension_numbers = #tpu.dot_dimension_numbers<[1], [0], [0], [1], [0, 0, 1, 1], [], []>} : vector<16x8xf32>, vector<8x32xf32>, vector<16x32xf32> -> vector<16x32xf32>
    %c0_103 = arith.constant 0 : index
    %c0_104 = arith.constant 0 : index
    %128 = vector.load %arg8[%c0_103, %c0_104] : memref<128x16xf32, #tpu.memory_space<vmem>>, vector<128x16xf32>
    %cst_105 = arith.constant dense<0.000000e+00> : vector<128x32xf32>
    %129 = tpu.matmul %128, %125, %cst_105 {dimension_numbers = #tpu.dot_dimension_numbers<[1], [0], [0], [1], [0, 0, 1, 1], [], []>} : vector<128x16xf32>, vector<16x32xf32>, vector<128x32xf32> -> vector<128x32xf32>
    %c0_106 = arith.constant 0 : index
    %c0_107 = arith.constant 0 : index
    %130 = vector.load %arg9[%c0_106, %c0_107] : memref<128x16xf32, #tpu.memory_space<vmem>>, vector<128x16xf32>
    %cst_108 = arith.constant dense<0.000000e+00> : vector<128x32xf32>
    %131 = tpu.matmul %130, %127, %cst_108 {dimension_numbers = #tpu.dot_dimension_numbers<[1], [0], [0], [1], [0, 0, 1, 1], [], []>} : vector<128x16xf32>, vector<16x32xf32>, vector<128x32xf32> -> vector<128x32xf32>
    %132 = arith.addf %129, %131 : vector<128x32xf32>
    %cst_109 = arith.constant 0.000000e+00 : f32
    %133 = vector.broadcast %cst_109 : f32 to vector<128x32xf32>
    %134 = arith.maximumf %132, %133 : vector<128x32xf32>
    %c0_110 = arith.constant 0 : index
    %c0_111 = arith.constant 0 : index
    %135 = vector.load %arg37[%c0_110, %c0_111] : memref<32x32xf32, #tpu.memory_space<vmem>>, vector<32x32xf32>
    %cst_112 = arith.constant dense<0.000000e+00> : vector<128x32xf32>
    %136 = tpu.matmul %134, %135, %cst_112 {dimension_numbers = #tpu.dot_dimension_numbers<[1], [0], [0], [1], [0, 0, 1, 1], [], []>} : vector<128x32xf32>, vector<32x32xf32>, vector<128x32xf32> -> vector<128x32xf32>
    %c0_113 = arith.constant 0 : index
    %c0_114 = arith.constant 0 : index
    %137 = vector.load %arg38[%c0_113, %c0_114] : memref<1x32xf32, #tpu.memory_space<vmem>>, vector<1x32xf32>
    %138 = vector.broadcast %137 : vector<1x32xf32> to vector<128x32xf32>
    %139 = arith.addf %136, %138 : vector<128x32xf32>
    %cst_115 = arith.constant 0.000000e+00 : f32
    %140 = vector.broadcast %cst_115 : f32 to vector<128x32xf32>
    %141 = arith.maximumf %139, %140 : vector<128x32xf32>
    %c0_116 = arith.constant 0 : index
    %c0_117 = arith.constant 0 : index
    %142 = vector.load %arg39[%c0_116, %c0_117] : memref<32x32xf32, #tpu.memory_space<vmem>>, vector<32x32xf32>
    %cst_118 = arith.constant dense<0.000000e+00> : vector<128x32xf32>
    %143 = tpu.matmul %141, %142, %cst_118 {dimension_numbers = #tpu.dot_dimension_numbers<[1], [0], [0], [1], [0, 0, 1, 1], [], []>} : vector<128x32xf32>, vector<32x32xf32>, vector<128x32xf32> -> vector<128x32xf32>
    %c0_119 = arith.constant 0 : index
    %c0_120 = arith.constant 0 : index
    %144 = vector.load %arg40[%c0_119, %c0_120] : memref<1x32xf32, #tpu.memory_space<vmem>>, vector<1x32xf32>
    %145 = vector.broadcast %144 : vector<1x32xf32> to vector<128x32xf32>
    %146 = arith.addf %143, %145 : vector<128x32xf32>
    %cst_121 = arith.constant 0.000000e+00 : f32
    %147 = vector.broadcast %cst_121 : f32 to vector<128x32xf32>
    %148 = arith.maximumf %146, %147 : vector<128x32xf32>
    %c0_122 = arith.constant 0 : index
    %c0_123 = arith.constant 0 : index
    %149 = vector.load %arg41[%c0_122, %c0_123] : memref<32x2xf32, #tpu.memory_space<vmem>>, vector<32x2xf32>
    %cst_124 = arith.constant dense<0.000000e+00> : vector<128x2xf32>
    %150 = tpu.matmul %148, %149, %cst_124 {dimension_numbers = #tpu.dot_dimension_numbers<[1], [0], [0], [1], [0, 0, 1, 1], [], []>} : vector<128x32xf32>, vector<32x2xf32>, vector<128x2xf32> -> vector<128x2xf32>
    %c0_125 = arith.constant 0 : index
    %c0_126 = arith.constant 0 : index
    %151 = vector.load %arg42[%c0_125, %c0_126] : memref<1x2xf32, #tpu.memory_space<vmem>>, vector<1x2xf32>
    %152 = vector.broadcast %151 : vector<1x2xf32> to vector<128x2xf32>
    %153 = arith.addf %150, %152 : vector<128x2xf32>
    %154 = vector.extract_strided_slice %153 {offsets = [0, 0], sizes = [128, 1], strides = [1, 1]} : vector<128x2xf32> to vector<128x1xf32>
    %155 = vector.extract_strided_slice %153 {offsets = [0, 1], sizes = [128, 1], strides = [1, 1]} : vector<128x2xf32> to vector<128x1xf32>
    %cst_127 = arith.constant 0.000000e+00 : f32
    %156 = vector.broadcast %cst_127 : f32 to vector<128x1xf32>
    %157 = arith.maximumf %155, %156 : vector<128x1xf32>
    %158 = math.absf %155 : vector<128x1xf32>
    %cst_128 = arith.constant 0.000000e+00 : f32
    %159 = vector.broadcast %cst_128 : f32 to vector<128x1xf32>
    %160 = arith.subf %159, %158 : vector<128x1xf32>
    %161 = math.exp %160 : vector<128x1xf32>
    %cst_129 = arith.constant 1.000000e+00 : f32
    %162 = vector.broadcast %cst_129 : f32 to vector<128x1xf32>
    %163 = arith.addf %162, %161 : vector<128x1xf32>
    %164 = math.log %163 : vector<128x1xf32>
    %165 = arith.addf %157, %164 : vector<128x1xf32>
    %cst_130 = arith.constant 0.899999976 : f32
    %166 = vector.broadcast %cst_130 : f32 to vector<128x1xf32>
    %167 = arith.mulf %166, %165 : vector<128x1xf32>
    %cst_131 = arith.constant 1.000000e-01 : f32
    %168 = vector.broadcast %cst_131 : f32 to vector<128x1xf32>
    %169 = arith.addf %168, %167 : vector<128x1xf32>
    %c0_132 = arith.constant 0 : index
    %c0_133 = arith.constant 0 : index
    %170 = vector.load %arg8[%c0_132, %c0_133] : memref<128x16xf32, #tpu.memory_space<vmem>>, vector<128x16xf32>
    %c0_134 = arith.constant 0 : index
    %c0_135 = arith.constant 0 : index
    %171 = vector.load %arg3[%c0_134, %c0_135] : memref<16x1xf32, #tpu.memory_space<vmem>>, vector<16x1xf32>
    %cst_136 = arith.constant dense<0.000000e+00> : vector<128x1xf32>
    %172 = tpu.matmul %170, %171, %cst_136 {dimension_numbers = #tpu.dot_dimension_numbers<[1], [0], [0], [1], [0, 0, 1, 1], [], []>} : vector<128x16xf32>, vector<16x1xf32>, vector<128x1xf32> -> vector<128x1xf32>
    %173 = arith.subf %172, %154 : vector<128x1xf32>
    %174 = tpu.reciprocal %169 {approx = true} : vector<128x1xf32> -> vector<128x1xf32>
    %175 = arith.mulf %173, %174 : vector<128x1xf32>
    %176 = arith.mulf %175, %175 : vector<128x1xf32>
    %cst_137 = arith.constant dense<0.000000e+00> : vector<128xf32>
    %177 = vector.multi_reduction <add>, %176, %cst_137 [1] : vector<128x1xf32> to vector<128xf32>
    %178 = vector.shape_cast %177 : vector<128xf32> to vector<128x1xf32>
    %cst_138 = arith.constant -5.000000e-01 : f32
    %179 = vector.broadcast %cst_138 : f32 to vector<128x1xf32>
    %180 = arith.mulf %179, %178 : vector<128x1xf32>
    %181 = math.log %169 : vector<128x1xf32>
    %cst_139 = arith.constant dense<0.000000e+00> : vector<128xf32>
    %182 = vector.multi_reduction <add>, %181, %cst_139 [1] : vector<128x1xf32> to vector<128xf32>
    %183 = vector.shape_cast %182 : vector<128xf32> to vector<128x1xf32>
    %184 = arith.subf %180, %183 : vector<128x1xf32>
    %cst_140 = arith.constant 0.918938517 : f32
    %185 = vector.broadcast %cst_140 : f32 to vector<128x1xf32>
    %186 = arith.subf %184, %185 : vector<128x1xf32>
    %c0_141 = arith.constant 0 : index
    %c0_142 = arith.constant 0 : index
    %187 = vector.load %arg13[%c0_141, %c0_142] : memref<2x128xf32, #tpu.memory_space<vmem>>, vector<2x128xf32>
    %c0_143 = arith.constant 0 : index
    %c0_144 = arith.constant 0 : index
    %188 = vector.load %arg12[%c0_143, %c0_144] : memref<128x8xf32, #tpu.memory_space<vmem>>, vector<128x8xf32>
    %189 = vector.broadcast %186 : vector<128x1xf32> to vector<128x8xf32>
    %190 = arith.mulf %189, %188 : vector<128x8xf32>
    %cst_145 = arith.constant dense<0.000000e+00> : vector<2x8xf32>
    %191 = tpu.matmul %187, %190, %cst_145 {dimension_numbers = #tpu.dot_dimension_numbers<[1], [0], [0], [1], [0, 0, 1, 1], [], []>} : vector<2x128xf32>, vector<128x8xf32>, vector<2x8xf32> -> vector<2x8xf32>
    %cst_146 = arith.constant 1.250000e-01 : f32
    %192 = vector.broadcast %cst_146 : f32 to vector<2x8xf32>
    %193 = arith.mulf %191, %192 : vector<2x8xf32>
    %194 = arith.addf %191, %110 : vector<2x8xf32>
    %195 = arith.subf %194, %119 : vector<2x8xf32>
    %cst_147 = arith.constant dense<0xFF800000> : vector<2xf32>
    %196 = vector.multi_reduction <maximumf>, %195, %cst_147 [1] : vector<2x8xf32> to vector<2xf32>
    %197 = vector.shape_cast %196 : vector<2xf32> to vector<2x1xf32>
    %198 = vector.broadcast %197 : vector<2x1xf32> to vector<2x8xf32>
    %199 = arith.subf %195, %198 : vector<2x8xf32>
    %200 = math.exp %199 : vector<2x8xf32>
    %cst_148 = arith.constant dense<0.000000e+00> : vector<2xf32>
    %201 = vector.multi_reduction <add>, %200, %cst_148 [1] : vector<2x8xf32> to vector<2xf32>
    %202 = vector.shape_cast %201 : vector<2xf32> to vector<2x1xf32>
    %203 = math.log %202 : vector<2x1xf32>
    %204 = arith.addf %197, %203 : vector<2x1xf32>
    %205 = vector.broadcast %204 : vector<2x1xf32> to vector<2x8xf32>
    %206 = arith.subf %195, %205 : vector<2x8xf32>
    %207 = math.exp %206 : vector<2x8xf32>
    %208 = arith.subf %110, %119 : vector<2x8xf32>
    %cst_149 = arith.constant dense<0xFF800000> : vector<2xf32>
    %209 = vector.multi_reduction <maximumf>, %208, %cst_149 [1] : vector<2x8xf32> to vector<2xf32>
    %210 = vector.shape_cast %209 : vector<2xf32> to vector<2x1xf32>
    %211 = vector.broadcast %210 : vector<2x1xf32> to vector<2x8xf32>
    %212 = arith.subf %208, %211 : vector<2x8xf32>
    %213 = math.exp %212 : vector<2x8xf32>
    %cst_150 = arith.constant dense<0.000000e+00> : vector<2xf32>
    %214 = vector.multi_reduction <add>, %213, %cst_150 [1] : vector<2x8xf32> to vector<2xf32>
    %215 = vector.shape_cast %214 : vector<2xf32> to vector<2x1xf32>
    %216 = math.log %215 : vector<2x1xf32>
    %217 = arith.addf %210, %216 : vector<2x1xf32>
    %218 = vector.broadcast %217 : vector<2x1xf32> to vector<2x8xf32>
    %219 = arith.subf %208, %218 : vector<2x8xf32>
    %220 = math.exp %219 : vector<2x8xf32>
    %cst_151 = arith.constant 1.000000e+00 : f32
    %221 = vector.broadcast %cst_151 : f32 to vector<2x8xf32>
    %222 = arith.mulf %221, %207 : vector<2x8xf32>
    %223 = arith.mulf %222, %191 : vector<2x8xf32>
    %224 = arith.subf %207, %220 : vector<2x8xf32>
    %cst_152 = arith.constant 1.000000e+00 : f32
    %225 = vector.broadcast %cst_152 : f32 to vector<2x8xf32>
    %226 = arith.mulf %225, %224 : vector<2x8xf32>
    %227 = arith.mulf %226, %110 : vector<2x8xf32>
    %228 = arith.addf %223, %227 : vector<2x8xf32>
    %229 = vector.shape_cast %228 : vector<2x8xf32> to vector<1x2x8xf32>
    %cst_153 = arith.constant dense<0.000000e+00> : vector<1xf32>
    %230 = vector.multi_reduction <add>, %229, %cst_153 [1, 2] : vector<1x2x8xf32> to vector<1xf32>
    %231 = vector.shape_cast %230 : vector<1xf32> to vector<1x1x1xf32>
    %232 = vector.extract %231[0, 0, 0] : f32 from vector<1x1x1xf32>
    %233 = vector.broadcast %232 : f32 to vector<1x1xf32>
    %cst_154 = arith.constant 0.000000e+00 : f32
    %234 = vector.broadcast %cst_154 : f32 to vector<1x1xf32>
    %235 = arith.subf %234, %233 : vector<1x1xf32>
    %cst_155 = arith.constant 5.000000e-01 : f32
    %236 = vector.broadcast %cst_155 : f32 to vector<1x1xf32>
    %237 = arith.mulf %235, %236 : vector<1x1xf32>
    %c0_156 = arith.constant 0 : index
    %c0_157 = arith.constant 0 : index
    %238 = vector.load %arg43[%c0_156, %c0_157] : memref<1x1xf32, #tpu.memory_space<vmem>>, vector<1x1xf32>
    tpu.vector_store %arg43[%c0_156, %c0_157], %237 {strides = array<i32>} : memref<1x1xf32, #tpu.memory_space<vmem>>, vector<1x1xf32>,
    %239 = arith.mulf %207, %193 : vector<2x8xf32>
    %240 = vector.shape_cast %239 : vector<2x8xf32> to vector<1x2x8xf32>
    %cst_158 = arith.constant dense<0.000000e+00> : vector<1xf32>
    %241 = vector.multi_reduction <add>, %240, %cst_158 [1, 2] : vector<1x2x8xf32> to vector<1xf32>
    %242 = vector.shape_cast %241 : vector<1xf32> to vector<1x1x1xf32>
    %243 = vector.extract %242[0, 0, 0] : f32 from vector<1x1x1xf32>
    %244 = vector.broadcast %243 : f32 to vector<1x1xf32>
    %cst_159 = arith.constant 0.000000e+00 : f32
    %245 = vector.broadcast %cst_159 : f32 to vector<1x1xf32>
    %246 = arith.subf %245, %244 : vector<1x1xf32>
    %cst_160 = arith.constant 5.000000e-01 : f32
    %247 = vector.broadcast %cst_160 : f32 to vector<1x1xf32>
    %248 = arith.mulf %246, %247 : vector<1x1xf32>
    %c0_161 = arith.constant 0 : index
    %c0_162 = arith.constant 0 : index
    %249 = vector.load %arg45[%c0_161, %c0_162] : memref<1x1xf32, #tpu.memory_space<vmem>>, vector<1x1xf32>
    tpu.vector_store %arg45[%c0_161, %c0_162], %248 {strides = array<i32>} : memref<1x1xf32, #tpu.memory_space<vmem>>, vector<1x1xf32>,
    %cst_163 = arith.constant 1.250000e-01 : f32
    %250 = vector.broadcast %cst_163 : f32 to vector<2x8xf32>
    %251 = arith.subf %207, %250 : vector<2x8xf32>
    %252 = arith.mulf %251, %119 : vector<2x8xf32>
    %253 = vector.shape_cast %252 : vector<2x8xf32> to vector<1x2x8xf32>
    %cst_164 = arith.constant dense<0.000000e+00> : vector<1xf32>
    %254 = vector.multi_reduction <add>, %253, %cst_164 [1, 2] : vector<1x2x8xf32> to vector<1xf32>
    %255 = vector.shape_cast %254 : vector<1xf32> to vector<1x1x1xf32>
    %256 = vector.extract %255[0, 0, 0] : f32 from vector<1x1x1xf32>
    %257 = vector.broadcast %256 : f32 to vector<1x1xf32>
    %cst_165 = arith.constant -1.000000e+00 : f32
    %258 = vector.broadcast %cst_165 : f32 to vector<1x1xf32>
    %259 = arith.mulf %258, %257 : vector<1x1xf32>
    %cst_166 = arith.constant 5.000000e-01 : f32
    %260 = vector.broadcast %cst_166 : f32 to vector<1x1xf32>
    %261 = arith.mulf %259, %260 : vector<1x1xf32>
    %c0_167 = arith.constant 0 : index
    %c0_168 = arith.constant 0 : index
    %262 = vector.load %arg44[%c0_167, %c0_168] : memref<1x1xf32, #tpu.memory_space<vmem>>, vector<1x1xf32>
    tpu.vector_store %arg44[%c0_167, %c0_168], %261 {strides = array<i32>} : memref<1x1xf32, #tpu.memory_space<vmem>>, vector<1x1xf32>,
    return
  }
}

</mosaic_0001>

<bundles_post_ra>
// kernel: np_vem_forward.1
= control target key start
LH: loop header
LB: loop body
LE: loop exit
PB: predicated region body
PF: predicated region fallthrough
CT: control target
= control target key end

     0   :  { %s5827_s6 = smov 1   ;;  %s5828_s10 = smov 2   ;;  %s6846_s0 = inlined_call_operand.smem [shape: u32[46], index: -1, kind: input, shape index: {}] }
   0x1   :  { %s5908_s5 = sld [smem:[%s6846_s0]]   ;;  %s5829_s14 = smov 3  }
   0x2   :  { %s5913_s9 = sld [smem:[%s6846_s0 + %s5827_s6]]   ;;  %s5830_s18 = smov 4  }
   0x3   :  { %s5918_s13 = sld [smem:[%s6846_s0 + %s5828_s10]]   ;;  %s5831_s22 = smov 5  }
   0x4   :  { %s5923_s17 = sld [smem:[%s6846_s0 + %s5829_s14]]   ;;  %s5832_s26 = smov 6  }
   0x5   :  { %s5928_s21 = sld [smem:[%s6846_s0 + %s5830_s18]]   ;;  %s5833_s30 = smov 7  }
   0x6   :  { %s5933_s25 = sld [smem:[%s6846_s0 + %s5831_s22]]   ;;  %s5834_s4 = smov 8  }
   0x7   :  { %6871 = sst [smem:[#allocation47_spill]] %s5908_s5  ;;  %s5835_s10 = smov 9  }
   0x8   :  { %6872 = sst [smem:[#allocation48_spill]] %s5913_s9  ;;  %s5836_s15 = smov 10  }
   0x9   :  { %6873 = sst [smem:[#allocation49_spill]] %s5918_s13  ;;  %s5837_s20 = smov 11  }
   0xa   :  { %6874 = sst [smem:[#allocation50_spill]] %s5923_s17  ;;  %s5839_s1 = smov 13  }
   0xb   :  { %6875 = sst [smem:[#allocation51_spill]] %s5928_s21  ;;  %s5840_s7 = smov 14  }
   0xc   :  { %6876 = sst [smem:[#allocation52_spill]] %s5933_s25  ;;  %s5842_s22 = smov 16  }
   0xd   :  { %s5938_s29 = sld [smem:[%s6846_s0 + %s5832_s26]]   ;;  %s5838_s26 = smov 12  }
   0xe   :  { %s5943_s3 = sld [smem:[%s6846_s0 + %s5833_s30]]   ;;  %s5843_s28 = smov 17  }
   0xf   :  { %s5948_s8 = sld [smem:[%s6846_s0 + %s5834_s4]]  }
  0x10   :  { %s5953_s14 = sld [smem:[%s6846_s0 + %s5835_s10]]  }
  0x11   :  { %s5958_s19 = sld [smem:[%s6846_s0 + %s5836_s15]]   ;;  %s5841_s15 = smov 15  }
  0x12   :  { %s5963_s24 = sld [smem:[%s6846_s0 + %s5837_s20]]  }
  0x13   :  { %6877 = sst [smem:[#allocation53_spill]] %s5938_s29 }
  0x14   :  { %6878 = sst [smem:[#allocation54_spill]] %s5943_s3 }
  0x15   :  { %6879 = sst [smem:[#allocation55_spill]] %s5948_s8 }
  0x16   :  { %6880 = sst [smem:[#allocation56_spill]] %s5953_s14 }
  0x17   :  { %6881 = sst [smem:[#allocation57_spill]] %s5958_s19 }
  0x18   :  { %6882 = sst [smem:[#allocation58_spill]] %s5963_s24 }
  0x19   :  { %s5968_s30 = sld [smem:[%s6846_s0 + %s5838_s26]]  }
  0x1a   :  { %s5973_s6 = sld [smem:[%s6846_s0 + %s5839_s1]]  }
  0x1b   :  { %s5978_s12 = sld [smem:[%s6846_s0 + %s5840_s7]]   ;;  %s5844_s7 = smov 18  }
  0x1c   :  { %s5983_s20 = sld [smem:[%s6846_s0 + %s5841_s15]]   ;;  %s5845_s15 = smov 19  }
  0x1d   :  { %s5988_s27 = sld [smem:[%s6846_s0 + %s5842_s22]]   ;;  %s5846_s22 = smov 20  }
  0x1e   :  { %s5993_s4 = sld [smem:[%s6846_s0 + %s5843_s28]]   ;;  %s5847_s28 = smov 21  }
  0x1f   :  { %6883 = sst [smem:[#allocation59_spill]] %s5968_s30 }
  0x20   :  { %6884 = sst [smem:[#allocation60_spill]] %s5973_s6 }
  0x21   :  { %s5998_s6 = sld [smem:[%s6846_s0 + %s5844_s7]]   ;;  %s5848_s7 = smov 22  }
  0x22   :  { %s6003_s30 = sld [smem:[%s6846_s0 + %s5845_s15]]   ;;  %s5849_s15 = smov 23  }
  0x23   :  { %6885 = sst [smem:[#allocation61_spill]] %s5988_s27 }
  0x24   :  { %s6008_s17 = sld [smem:[%s6846_s0 + %s5846_s22]]   ;;  %s5850_s22 = smov 24  }
  0x25   :  { %s6013_s8 = sld [smem:[%s6846_s0 + %s5847_s28]]   ;;  %s5851_s28 = smov 25  }
  0x26   :  { %s6018_s14 = sld [smem:[%s6846_s0 + %s5848_s7]]   ;;  %s5852_s7 = smov 26  }
  0x27   :  { %6886 = sst [smem:[#allocation62_spill]] %s5998_s6 }
  0x28   :  { %s6023_s13 = sld [smem:[%s6846_s0 + %s5849_s15]]   ;;  %s5853_s15 = smov 27  }
  0x29   :  { %s6028_s24 = sld [smem:[%s6846_s0 + %s5850_s22]]   ;;  %s5854_s22 = smov 28  }
  0x2a   :  { %6887 = sst [smem:[#allocation63_spill]] %s6008_s17 }
  0x2b   :  { %s6033_s19 = sld [smem:[%s6846_s0 + %s5851_s28]]   ;;  %s5855_s28 = smov 29  }
  0x2c   :  { %6888 = sst [smem:[#allocation64_spill]] %s6018_s14 }
  0x2d   :  { %s6038_s21 = sld [smem:[%s6846_s0 + %s5852_s7]]   ;;  %s5856_s7 = smov 30  }
  0x2e   :  { %s6043_s3 = sld [smem:[%s6846_s0 + %s5853_s15]]   ;;  %s5857_s15 = smov 31  }
  0x2f   :  { %s6048_s29 = sld [smem:[%s6846_s0 + %s5854_s22]]   ;;  %s5858_s22 = smov 32  }
  0x30   :  { %s6053_s9 = sld [smem:[%s6846_s0 + %s5855_s28]]   ;;  %s5859_s28 = smov 33  }
  0x31   :  { %s6063_s25 = sld [smem:[%s6846_s0 + %s5857_s15]]   ;;  %s5861_s15 = smov 35  }
  0x32   :  { %s6068_s14 = sld [smem:[%s6846_s0 + %s5858_s22]]   ;;  %s5862_s22 = smov 36  }
  0x33   :  { %6889 = sst [smem:[#allocation65_spill]] %s6038_s21 }
  0x34   :  { %s6058_s21 = sld [smem:[%s6846_s0 + %s5856_s7]]   ;;  %s5860_s7 = smov 34  }
  0x35   :  { %s6073_s17 = sld [smem:[%s6846_s0 + %s5859_s28]]   ;;  %s5863_s28 = smov 37  }
  0x36   :  { %s6083_s6 = sld [smem:[%s6846_s0 + %s5861_s15]]   ;;  %s5865_s15 = smov 39  }
  0x37   :  { %s6093_s27 = sld [smem:[%s6846_s0 + %s5863_s28]]   ;;  %s5867_s28 = smov 41  }
  0x38   :  { %6891 = sst [smem:[#allocation67_spill]] %s6068_s14 }
  0x39   :  { %s6088_s14 = sld [smem:[%s6846_s0 + %s5862_s22]]   ;;  %s5866_s22 = smov 40  }
  0x3a   :  { %6890 = sst [smem:[#allocation66_spill]] %s6058_s21 }
  0x3b   :  { %6892 = sst [smem:[#allocation68_spill]] %s6073_s17 }
  0x3c   :  { %s6078_s21 = sld [smem:[%s6846_s0 + %s5860_s7]]   ;;  %s5864_s7 = smov 38  }
  0x3d   :  { %6894 = sst [smem:[#allocation70_spill]] %s6083_s6 }
  0x3e   :  { %6895 = sst [smem:[#allocation71_spill]] %s6093_s27 }
  0x3f   :  { %s6103_s6 = sld [smem:[%s6846_s0 + %s5865_s15]]   ;;  %s5869_s15 = smov 43  }
  0x40   :  { %s6108_s5 = sld [smem:[%s6846_s0 + %s5866_s22]]   ;;  %s5870_s22 = smov 44  }
  0x41   :  { %s6113_s27 = sld [smem:[%s6846_s0 + %s5867_s28]]   ;;  %s5871_s28 = smov 45  }
  0x42   :  { %6893 = sst [smem:[#allocation69_spill]] %s6078_s21 }
  0x43   :  { %s6098_s21 = sld [smem:[%s6846_s0 + %s5864_s7]]   ;;  %s5868_s7 = smov 42  }
  0x44   :  { %s6123_s17 = sld [smem:[%s6846_s0 + %s5869_s15]]  }
  0x46   :  { %6897 = sst [smem:[#allocation73_spill]] %s6108_s5 }
  0x47   :  { %6898 = sst [smem:[#allocation74_spill]] %s6113_s27 }
  0x48   :  { %s6128_s5 = sld [smem:[%s6846_s0 + %s5870_s22]]  }
  0x49   :  { %6896 = sst [smem:[#allocation72_spill]] %s6098_s21 }
  0x4a   :  { %s6118_s21 = sld [smem:[%s6846_s0 + %s5868_s7]]  }
  0x4b   :  { %s6133_s27 = sld [smem:[%s6846_s0 + %s5871_s28]]  }
  0x4c   :  { %97 = vsyncpa [#allocation3], 0 }
  0x4d   :  { %98 = vsyncpa [#allocation6], 0 }
  0x4e   :  { %99 = vsyncpa [#allocation9], 0 }
  0x4f   :  { %100 = vsyncpa [#allocation12], 0 }
  0x50   :  { %101 = vsyncpa [#allocation15], 0 }
  0x51   :  { %102 = vsyncpa [#allocation18], 0 }
  0x52   :  { %103 = vsyncpa [#allocation21], 0 }
  0x53   :  { %104 = vsyncpa [#allocation24], 0 }
  0x54   :  { %105 = vsyncpa [#allocation27], 0 }
  0x55   :  { %106 = vsyncpa [#allocation30], 0 }
  0x56   :  { %107 = vsyncpa [#allocation4], 0 }
  0x57   :  { %108 = vsyncpa [#allocation33], 0  ;;  %s5872_s7 = smov [#allocation5]   ;;  %s5873_s11 = smov [#allocation8]  }
  0x58   :  { %s153_s10 = sshll.u32 %s5872_s7, 4  ;;  %s177_s0 = sshll.u32 %s5873_s11, 4  ;;  %s154_s10 = int_to_ptr.vmem [resolvable:$true] %s153_s10  ;;  %s178_s0 = int_to_ptr.vmem [resolvable:$true] %s177_s0 }
  0x59   :  { %s5341_s15 = scalar_lea.hbm %s5983_s20, 16 }
  0x5a   :  { %p5342_p0 = scmp.ne.s32.totalorder %s5983_s20, %s5341_s15  ;;  %p5345_p1 = scmp.lt.u32.totalorder %s5341_s15, %s5983_s20 }
  0x5c   :  { %p5347_p2 = pnand %p5345_p1, %p5342_p0 }
  0x5e   :  { %5350 = shalt.err (!%p5347_p2)
}
  0x5f   :  { %s5351_s16 = scalar_lea.vmem %s154_s10, 16  ;;  %s5355_s18 = scalar_lea.vmem %s154_s10, 32 }
  0x60   :  { %p5352_p3 = scmp.ne.s32.totalorder %s154_s10, %s5351_s16  ;;  %p5356_p4 = scmp.lt.s32.totalorder %s154_s10, %s154_s10 }
  0x61   :  { %p5357_p5 = scmp.lt.s32.totalorder %s5355_s18, %s5351_s16 }
  0x63   :  { %p5358_p6 = por %p5357_p5, %p5356_p4 }
  0x65   :  { %p5359_p7 = pnand %p5358_p6, %p5352_p3 }
  0x67   :  { %5362 = shalt.err (!%p5359_p7)
}
  0x68   :  { %156 = dma.hbm_to_vmem [thread:$0]  %s5983_s20, 16, %s154_s10, [#allocation6]  }
  0x69   :  { %s5363_s22 = scalar_lea.hbm %s6003_s30, 16 }
  0x6a   :  { %p5364_p8 = scmp.ne.s32.totalorder %s6003_s30, %s5363_s22  ;;  %p5367_p9 = scmp.lt.u32.totalorder %s5363_s22, %s6003_s30 }
  0x6c   :  { %p5369_p10 = pnand %p5367_p9, %p5364_p8 }
  0x6e   :  { %5372 = shalt.err (!%p5369_p10)
}
  0x6f   :  { %s5373_s23 = scalar_lea.vmem %s178_s0, 16  ;;  %s5377_s26 = scalar_lea.vmem %s178_s0, 32 }
  0x70   :  { %p5374_p11 = scmp.ne.s32.totalorder %s178_s0, %s5373_s23  ;;  %p5378_p12 = scmp.lt.s32.totalorder %s178_s0, %s178_s0 }
  0x71   :  { %p5379_p13 = scmp.lt.s32.totalorder %s5377_s26, %s5373_s23 }
  0x73   :  { %p5380_p0 = por %p5379_p13, %p5378_p12 }
  0x75   :  { %p5381_p1 = pnand %p5380_p0, %p5374_p11 }
  0x77   :  { %5384 = shalt.err (!%p5381_p1)
}
  0x78   :  { %180 = dma.hbm_to_vmem [thread:$0]  %s6003_s30, 16, %s178_s0, [#allocation9]  }
  0x79   :  { %s5874_s28 = smov [#allocation11]   ;;  %s5875_s1 = smov [#allocation14]  }
  0x7a   :  { %s201_s20 = sshll.u32 %s5874_s28, 4  ;;  %s221_s2 = sshll.u32 %s5875_s1, 4  ;;  %s202_s20 = int_to_ptr.vmem [resolvable:$true] %s201_s20  ;;  %s222_s2 = int_to_ptr.vmem [resolvable:$true] %s221_s2 }
  0x7b   :  { %s5385_s7 = scalar_lea.hbm %s6023_s13, 16 }
  0x7c   :  { %p5386_p2 = scmp.ne.s32.totalorder %s6023_s13, %s5385_s7  ;;  %p5389_p3 = scmp.lt.u32.totalorder %s5385_s7, %s6023_s13 }
  0x7e   :  { %p5391_p4 = pnand %p5389_p3, %p5386_p2 }
  0x80   :  { %5394 = shalt.err (!%p5391_p4)
}
  0x81   :  { %s5395_s10 = scalar_lea.vmem %s202_s20, 16  ;;  %s5399_s11 = scalar_lea.vmem %s202_s20, 32 }
  0x82   :  { %p5396_p5 = scmp.ne.s32.totalorder %s202_s20, %s5395_s10  ;;  %p5400_p6 = scmp.lt.s32.totalorder %s202_s20, %s202_s20 }
  0x83   :  { %p5401_p7 = scmp.lt.s32.totalorder %s5399_s11, %s5395_s10 }
  0x85   :  { %p5402_p8 = por %p5401_p7, %p5400_p6 }
  0x87   :  { %p5403_p9 = pnand %p5402_p8, %p5396_p5 }
  0x89   :  { %5406 = shalt.err (!%p5403_p9)
}
  0x8a   :  { %204 = dma.hbm_to_vmem [thread:$0]  %s6023_s13, 16, %s202_s20, [#allocation12]  }
  0x8b   :  { %s5407_s30 = scalar_lea.hbm %s6033_s19, 16 }
  0x8c   :  { %p5408_p10 = scmp.ne.s32.totalorder %s6033_s19, %s5407_s30  ;;  %p5411_p11 = scmp.lt.u32.totalorder %s5407_s30, %s6033_s19 }
  0x8e   :  { %p5413_p12 = pnand %p5411_p11, %p5408_p10 }
  0x90   :  { %5416 = shalt.err (!%p5413_p12)
}
  0x91   :  { %s5417_s0 = scalar_lea.vmem %s222_s2, 16  ;;  %s5421_s15 = scalar_lea.vmem %s222_s2, 32 }
  0x92   :  { %p5418_p13 = scmp.ne.s32.totalorder %s222_s2, %s5417_s0  ;;  %p5422_p0 = scmp.lt.s32.totalorder %s222_s2, %s222_s2 }
  0x93   :  { %p5423_p1 = scmp.lt.s32.totalorder %s5421_s15, %s5417_s0 }
  0x95   :  { %p5424_p2 = por %p5423_p1, %p5422_p0 }
  0x97   :  { %p5425_p3 = pnand %p5424_p2, %p5418_p13 }
  0x99   :  { %5428 = shalt.err (!%p5425_p3)
}
  0x9a   :  { %224 = dma.hbm_to_vmem [thread:$0]  %s6033_s19, 16, %s222_s2, [#allocation15]  }
  0x9b   :  { %s5876_s16 = smov [#allocation17]   ;;  %s5429_s18 = scalar_lea.hbm %s6048_s29, 512 }
  0x9c   :  { %s242_s13 = sshll.u32 %s5876_s16, 4  ;;  %p5430_p4 = scmp.ne.s32.totalorder %s6048_s29, %s5429_s18  ;;  %s243_s13 = int_to_ptr.vmem [resolvable:$true] %s242_s13 }
  0x9d   :  { %p5433_p5 = scmp.lt.u32.totalorder %s5429_s18, %s6048_s29 }
  0x9f   :  { %p5435_p6 = pnand %p5433_p5, %p5430_p4 }
  0xa1   :  { %5438 = shalt.err (!%p5435_p6)
}
  0xa2   :  { %s5439_s22 = scalar_lea.vmem %s243_s13, 512  ;;  %p5444_p8 = scmp.lt.s32.totalorder %s243_s13, %s243_s13 }
  0xa3   :  { %p5440_p7 = scmp.ne.s32.totalorder %s243_s13, %s5439_s22  ;;  %p5445_p9 = scmp.lt.s32.totalorder %s5439_s22, %s5439_s22 }
  0xa5   :  { %p5446_p10 = por %p5445_p9, %p5444_p8 }
  0xa7   :  { %p5447_p11 = pnand %p5446_p10, %p5440_p7 }
  0xa9   :  { %5450 = shalt.err (!%p5447_p11)
}
  0xaa   :  { %s5877_s23 = smov 128   ;;  %s5878_s19 = smov 8  }
  0xab   :  { %248 = dma.hbm_to_vmem [thread:$0]  %s6048_s29, 512, %s243_s13, [#allocation18], %s5877_s23, %s5877_s23, %s5878_s19  }
  0xac   :  { %s5879_s26 = smov [#allocation20]   ;;  %s5880_s20 = smov [#allocation23]  }
  0xad   :  { %s267_s28 = sshll.u32 %s5879_s26, 4  ;;  %s293_s1 = sshll.u32 %s5880_s20, 4  ;;  %s268_s28 = int_to_ptr.vmem [resolvable:$true] %s267_s28  ;;  %s294_s1 = int_to_ptr.vmem [resolvable:$true] %s293_s1 }
  0xae   :  { %s5451_s2 = scalar_lea.hbm %s6063_s25, 16 }
  0xaf   :  { %p5452_p12 = scmp.ne.s32.totalorder %s6063_s25, %s5451_s2  ;;  %p5455_p13 = scmp.lt.u32.totalorder %s5451_s2, %s6063_s25 }
  0xb1   :  { %p5457_p0 = pnand %p5455_p13, %p5452_p12 }
  0xb3   :  { %5460 = shalt.err (!%p5457_p0)
}
  0xb4   :  { %s5461_s7 = scalar_lea.vmem %s268_s28, 16  ;;  %s5465_s10 = scalar_lea.vmem %s268_s28, 32 }
  0xb5   :  { %p5462_p1 = scmp.ne.s32.totalorder %s268_s28, %s5461_s7  ;;  %p5466_p2 = scmp.lt.s32.totalorder %s268_s28, %s268_s28 }
  0xb6   :  { %p5467_p3 = scmp.lt.s32.totalorder %s5465_s10, %s5461_s7 }
  0xb8   :  { %p5468_p4 = por %p5467_p3, %p5466_p2 }
  0xba   :  { %p5469_p5 = pnand %p5468_p4, %p5462_p1 }
  0xbc   :  { %5472 = shalt.err (!%p5469_p5)
}
  0xbd   :  { %270 = dma.hbm_to_vmem [thread:$0]  %s6063_s25, 16, %s268_s28, [#allocation21]  }
  0xbe   :  { %s5473_s29 = scalar_lea.hbm %s6088_s14, 16 }
  0xbf   :  { %p5474_p6 = scmp.ne.s32.totalorder %s6088_s14, %s5473_s29  ;;  %p5477_p7 = scmp.lt.u32.totalorder %s5473_s29, %s6088_s14 }
  0xc1   :  { %p5479_p8 = pnand %p5477_p7, %p5474_p6 }
  0xc3   :  { %5482 = shalt.err (!%p5479_p8)
}
  0xc4   :  { %s5483_s11 = scalar_lea.vmem %s294_s1, 16  ;;  %s5487_s30 = scalar_lea.vmem %s294_s1, 32 }
  0xc5   :  { %p5484_p9 = scmp.ne.s32.totalorder %s294_s1, %s5483_s11  ;;  %p5488_p10 = scmp.lt.s32.totalorder %s294_s1, %s294_s1 }
  0xc6   :  { %p5489_p11 = scmp.lt.s32.totalorder %s5487_s30, %s5483_s11 }
  0xc8   :  { %p5490_p12 = por %p5489_p11, %p5488_p10 }
  0xca   :  { %p5491_p13 = pnand %p5490_p12, %p5484_p9 }
  0xcc   :  { %5494 = shalt.err (!%p5491_p13)
}
  0xcd   :  { %296 = dma.hbm_to_vmem [thread:$0]  %s6088_s14, 16, %s294_s1, [#allocation24]  }
  0xce   :  { %s5881_s25 = smov [#allocation26]   ;;  %s5882_s15 = smov [#allocation2]  }
  0xcf   :  { %s314_s0 = sshll.u32 %s5881_s25, 4  ;;  %s143_s16 = sshll.u32 %s5882_s15, 4  ;;  %s315_s0 = int_to_ptr.vmem [resolvable:$true] %s314_s0  ;;  %s144_s16 = int_to_ptr.vmem [resolvable:$true] %s143_s16 }
  0xd0   :  { %s5495_s13 = scalar_lea.hbm %s6103_s6, 512 }
  0xd1   :  { %p5496_p0 = scmp.ne.s32.totalorder %s6103_s6, %s5495_s13  ;;  %p5499_p1 = scmp.lt.u32.totalorder %s5495_s13, %s6103_s6 }
  0xd3   :  { %p5501_p2 = pnand %p5499_p1, %p5496_p0 }
  0xd5   :  { %5504 = shalt.err (!%p5501_p2)
}
  0xd6   :  { %s5505_s18 = scalar_lea.vmem %s315_s0, 512  ;;  %p5510_p4 = scmp.lt.s32.totalorder %s315_s0, %s315_s0 }
  0xd7   :  { %p5506_p3 = scmp.ne.s32.totalorder %s315_s0, %s5505_s18  ;;  %p5511_p5 = scmp.lt.s32.totalorder %s5505_s18, %s5505_s18 }
  0xd9   :  { %p5512_p6 = por %p5511_p5, %p5510_p4 }
  0xdb   :  { %p5513_p7 = pnand %p5512_p6, %p5506_p3 }
  0xdd   :  { %5516 = shalt.err (!%p5513_p7)
}
  0xde   :  { %320 = dma.hbm_to_vmem [thread:$0]  %s6103_s6, 512, %s315_s0, [#allocation27], %s5877_s23, %s5877_s23, %s5878_s19  }
  0xdf   :  { %s5517_s14 = scalar_lea.hbm %s5978_s12, 64 }
  0xe0   :  { %p5518_p8 = scmp.ne.s32.totalorder %s5978_s12, %s5517_s14  ;;  %p5521_p9 = scmp.lt.u32.totalorder %s5517_s14, %s5978_s12 }
  0xe2   :  { %p5523_p10 = pnand %p5521_p9, %p5518_p8 }
  0xe4   :  { %5526 = shalt.err (!%p5523_p10)
}
  0xe5   :  { %s5527_s22 = scalar_lea.vmem %s144_s16, 64  ;;  %p5532_p12 = scmp.lt.s32.totalorder %s144_s16, %s144_s16 }
  0xe6   :  { %p5528_p11 = scmp.ne.s32.totalorder %s144_s16, %s5527_s22  ;;  %p5533_p13 = scmp.lt.s32.totalorder %s5527_s22, %s5527_s22 }
  0xe8   :  { %p5534_p0 = por %p5533_p13, %p5532_p12 }
  0xea   :  { %p5535_p1 = pnand %p5534_p0, %p5528_p11 }
  0xec   :  { %5538 = shalt.err (!%p5535_p1)
}
  0xed   :  { %146 = dma.hbm_to_vmem [thread:$0]  %s5978_s12, 64, %s144_s16, [#allocation3]  }
  0xee   :  { %s5883_s26 = smov [#allocation7]   ;;  %s5884_s23 = smov [#allocation10]  }
  0xef   :  { %s165_s6 = sshll.u32 %s5883_s26, 4  ;;  %s189_s19 = sshll.u32 %s5884_s23, 4  ;;  %s166_s6 = int_to_ptr.vmem [resolvable:$true] %s165_s6  ;;  %s190_s19 = int_to_ptr.vmem [resolvable:$true] %s189_s19 }
  0xf0   :  { %s5539_s28 = scalar_lea.hbm %s5993_s4, 16 }
  0xf1   :  { %p5540_p2 = scmp.ne.s32.totalorder %s5993_s4, %s5539_s28  ;;  %p5543_p3 = scmp.lt.u32.totalorder %s5539_s28, %s5993_s4 }
  0xf3   :  { %p5545_p4 = pnand %p5543_p3, %p5540_p2 }
  0xf5   :  { %5548 = shalt.err (!%p5545_p4)
}
  0xf6   :  { %s5549_s20 = scalar_lea.vmem %s166_s6, 16  ;;  %s5553_s1 = scalar_lea.vmem %s166_s6, 32 }
  0xf7   :  { %p5550_p5 = scmp.ne.s32.totalorder %s166_s6, %s5549_s20  ;;  %p5554_p6 = scmp.lt.s32.totalorder %s166_s6, %s166_s6 }
  0xf8   :  { %p5555_p7 = scmp.lt.s32.totalorder %s5553_s1, %s5549_s20 }
  0xfa   :  { %p5556_p8 = por %p5555_p7, %p5554_p6 }
  0xfc   :  { %p5557_p9 = pnand %p5556_p8, %p5550_p5 }
  0xfe   :  { %5560 = shalt.err (!%p5557_p9)
}
  0xff   :  { %168 = dma.hbm_to_vmem [thread:$0]  %s5993_s4, 16, %s166_s6, [#allocation6]  }
 0x100   :  { %s5561_s12 = scalar_lea.hbm %s6013_s8, 16 }
 0x101   :  { %p5562_p10 = scmp.ne.s32.totalorder %s6013_s8, %s5561_s12  ;;  %p5565_p11 = scmp.lt.u32.totalorder %s5561_s12, %s6013_s8 }
 0x103   :  { %p5567_p12 = pnand %p5565_p11, %p5562_p10 }
 0x105   :  { %5570 = shalt.err (!%p5567_p12)
}
 0x106   :  { %s5571_s2 = scalar_lea.vmem %s190_s19, 16  ;;  %s5575_s7 = scalar_lea.vmem %s190_s19, 32 }
 0x107   :  { %p5572_p13 = scmp.ne.s32.totalorder %s190_s19, %s5571_s2  ;;  %p5576_p0 = scmp.lt.s32.totalorder %s190_s19, %s190_s19 }
 0x108   :  { %p5577_p1 = scmp.lt.s32.totalorder %s5575_s7, %s5571_s2 }
 0x10a   :  { %p5578_p2 = por %p5577_p1, %p5576_p0 }
 0x10c   :  { %p5579_p3 = pnand %p5578_p2, %p5572_p13 }
 0x10e   :  { %5582 = shalt.err (!%p5579_p3)
}
 0x10f   :  { %192 = dma.hbm_to_vmem [thread:$0]  %s6013_s8, 16, %s190_s19, [#allocation9]  }
 0x110   :  { %s5885_s4 = smov [#allocation13]   ;;  %s5886_s29 = smov [#allocation16]  }
 0x111   :  { %s211_s10 = sshll.u32 %s5885_s4, 4  ;;  %s233_s11 = sshll.u32 %s5886_s29, 4  ;;  %s212_s10 = int_to_ptr.vmem [resolvable:$true] %s211_s10  ;;  %s234_s11 = int_to_ptr.vmem [resolvable:$true] %s233_s11 }
 0x112   :  { %s5583_s30 = scalar_lea.hbm %s6028_s24, 64 }
 0x113   :  { %p5584_p4 = scmp.ne.s32.totalorder %s6028_s24, %s5583_s30  ;;  %p5587_p5 = scmp.lt.u32.totalorder %s5583_s30, %s6028_s24 }
 0x115   :  { %p5589_p6 = pnand %p5587_p5, %p5584_p4 }
 0x117   :  { %5592 = shalt.err (!%p5589_p6)
}
 0x118   :  { %s5593_s25 = scalar_lea.vmem %s212_s10, 64  ;;  %p5598_p8 = scmp.lt.s32.totalorder %s212_s10, %s212_s10 }
 0x119   :  { %p5594_p7 = scmp.ne.s32.totalorder %s212_s10, %s5593_s25  ;;  %p5599_p9 = scmp.lt.s32.totalorder %s5593_s25, %s5593_s25 }
 0x11b   :  { %p5600_p10 = por %p5599_p9, %p5598_p8 }
 0x11d   :  { %p5601_p11 = pnand %p5600_p10, %p5594_p7 }
 0x11f   :  { %5604 = shalt.err (!%p5601_p11)
}
 0x120   :  { %214 = dma.hbm_to_vmem [thread:$0]  %s6028_s24, 64, %s212_s10, [#allocation12]  }
 0x121   :  { %s5605_s8 = scalar_lea.hbm %s6043_s3, 16 }
 0x122   :  { %p5606_p12 = scmp.ne.s32.totalorder %s6043_s3, %s5605_s8  ;;  %p5609_p13 = scmp.lt.u32.totalorder %s5605_s8, %s6043_s3 }
 0x124   :  { %p5611_p0 = pnand %p5609_p13, %p5606_p12 }
 0x126   :  { %5614 = shalt.err (!%p5611_p0)
}
 0x127   :  { %s5615_s0 = scalar_lea.vmem %s234_s11, 16  ;;  %s5619_s15 = scalar_lea.vmem %s234_s11, 32 }
 0x128   :  { %p5616_p1 = scmp.ne.s32.totalorder %s234_s11, %s5615_s0  ;;  %p5620_p2 = scmp.lt.s32.totalorder %s234_s11, %s234_s11 }
 0x129   :  { %p5621_p3 = scmp.lt.s32.totalorder %s5619_s15, %s5615_s0 }
 0x12b   :  { %p5622_p4 = por %p5621_p3, %p5620_p2 }
 0x12d   :  { %p5623_p5 = pnand %p5622_p4, %p5616_p1 }
 0x12f   :  { %5626 = shalt.err (!%p5623_p5)
}
 0x130   :  { %236 = dma.hbm_to_vmem [thread:$0]  %s6043_s3, 16, %s234_s11, [#allocation15]  }
 0x131   :  { %s5887_s24 = smov [#allocation19]   ;;  %s5888_s13 = smov [#allocation22]  }
 0x132   :  { %s255_s16 = sshll.u32 %s5887_s24, 4  ;;  %s279_s18 = sshll.u32 %s5888_s13, 4  ;;  %s256_s16 = int_to_ptr.vmem [resolvable:$true] %s255_s16  ;;  %s280_s18 = int_to_ptr.vmem [resolvable:$true] %s279_s18 }
 0x133   :  { %s5627_s14 = scalar_lea.hbm %s6053_s9, 16 }
 0x134   :  { %p5628_p6 = scmp.ne.s32.totalorder %s6053_s9, %s5627_s14  ;;  %p5631_p7 = scmp.lt.u32.totalorder %s5627_s14, %s6053_s9 }
 0x136   :  { %p5633_p8 = pnand %p5631_p7, %p5628_p6 }
 0x138   :  { %5636 = shalt.err (!%p5633_p8)
}
 0x139   :  { %s5637_s22 = scalar_lea.vmem %s256_s16, 16  ;;  %s5641_s26 = scalar_lea.vmem %s256_s16, 32 }
 0x13a   :  { %p5638_p9 = scmp.ne.s32.totalorder %s256_s16, %s5637_s22  ;;  %p5642_p10 = scmp.lt.s32.totalorder %s256_s16, %s256_s16 }
 0x13b   :  { %p5643_p11 = scmp.lt.s32.totalorder %s5641_s26, %s5637_s22 }
 0x13d   :  { %p5644_p12 = por %p5643_p11, %p5642_p10 }
 0x13f   :  { %p5645_p13 = pnand %p5644_p12, %p5638_p9 }
 0x141   :  { %5648 = shalt.err (!%p5645_p13)
}
 0x142   :  { %s6899_s3 = sld [smem:[#allocation68_spill]] }
 0x143   :  { %258 = dma.hbm_to_vmem [thread:$0]  %s6053_s9, 16, %s256_s16, [#allocation18]  }
 0x148   :  { %s5649_s6 = scalar_lea.hbm %s6899_s3, 16 }
 0x149   :  { %p5650_p0 = scmp.ne.s32.totalorder %s6899_s3, %s5649_s6  ;;  %p5653_p1 = scmp.lt.u32.totalorder %s5649_s6, %s6899_s3 }
 0x14b   :  { %p5655_p2 = pnand %p5653_p1, %p5650_p0 }
 0x14d   :  { %5658 = shalt.err (!%p5655_p2)
}
 0x14e   :  { %s5659_s23 = scalar_lea.vmem %s280_s18, 16  ;;  %s5663_s19 = scalar_lea.vmem %s280_s18, 32 }
 0x14f   :  { %p5660_p3 = scmp.ne.s32.totalorder %s280_s18, %s5659_s23  ;;  %p5664_p4 = scmp.lt.s32.totalorder %s280_s18, %s280_s18 }
 0x150   :  { %p5665_p5 = scmp.lt.s32.totalorder %s5663_s19, %s5659_s23 }
 0x152   :  { %p5666_p6 = por %p5665_p5, %p5664_p4 }
 0x154   :  { %p5667_p7 = pnand %p5666_p6, %p5660_p3 }
 0x156   :  { %5670 = shalt.err (!%p5667_p7)
}
 0x157   :  { %s6900_s28 = sld [smem:[#allocation72_spill]]  ;;  %s5889_s9 = smov [#allocation25]  }
 0x158   :  { %282 = dma.hbm_to_vmem [thread:$0]  %s6899_s3, 16, %s280_s18, [#allocation21]  }
 0x159   :  { %s305_s20 = sshll.u32 %s5889_s9, 4  ;;  %s5890_s1 = smov [#allocation28]   ;;  %s306_s20 = int_to_ptr.vmem [resolvable:$true] %s305_s20 }
 0x15a   :  { %s327_s12 = sshll.u32 %s5890_s1, 4  ;;  %s328_s12 = int_to_ptr.vmem [resolvable:$true] %s327_s12 }
 0x15d   :  { %s5671_s2 = scalar_lea.hbm %s6900_s28, 16 }
 0x15e   :  { %p5672_p8 = scmp.ne.s32.totalorder %s6900_s28, %s5671_s2  ;;  %p5675_p9 = scmp.lt.u32.totalorder %s5671_s2, %s6900_s28 }
 0x160   :  { %p5677_p10 = pnand %p5675_p9, %p5672_p8 }
 0x162   :  { %5680 = shalt.err (!%p5677_p10)
}
 0x163   :  { %s5681_s7 = scalar_lea.vmem %s306_s20, 16  ;;  %s5685_s4 = scalar_lea.vmem %s306_s20, 32 }
 0x164   :  { %p5682_p11 = scmp.ne.s32.totalorder %s306_s20, %s5681_s7  ;;  %p5686_p12 = scmp.lt.s32.totalorder %s306_s20, %s306_s20 }
 0x165   :  { %p5687_p13 = scmp.lt.s32.totalorder %s5685_s4, %s5681_s7 }
 0x167   :  { %p5688_p0 = por %p5687_p13, %p5686_p12 }
 0x169   :  { %p5689_p1 = pnand %p5688_p0, %p5682_p11 }
 0x16b   :  { %5692 = shalt.err (!%p5689_p1)
}
 0x16c   :  { %s6901_s10 = sld [smem:[#allocation73_spill]] }
 0x16d   :  { %308 = dma.hbm_to_vmem [thread:$0]  %s6900_s28, 16, %s306_s20, [#allocation24]  }
 0x172   :  { %s5693_s29 = scalar_lea.hbm %s6901_s10, 16 }
 0x173   :  { %p5694_p2 = scmp.ne.s32.totalorder %s6901_s10, %s5693_s29  ;;  %p5697_p3 = scmp.lt.u32.totalorder %s5693_s29, %s6901_s10 }
 0x175   :  { %p5699_p4 = pnand %p5697_p3, %p5694_p2 }
 0x177   :  { %5702 = shalt.err (!%p5699_p4)
}
 0x178   :  { %s5703_s11 = scalar_lea.vmem %s328_s12, 16  ;;  %s5707_s30 = scalar_lea.vmem %s328_s12, 32 }
 0x179   :  { %p5704_p5 = scmp.ne.s32.totalorder %s328_s12, %s5703_s11  ;;  %p5708_p6 = scmp.lt.s32.totalorder %s328_s12, %s328_s12 }
 0x17a   :  { %p5709_p7 = scmp.lt.s32.totalorder %s5707_s30, %s5703_s11 }
 0x17c   :  { %p5710_p8 = por %p5709_p7, %p5708_p6 }
 0x17e   :  { %p5711_p9 = pnand %p5710_p8, %p5704_p5 }
 0x180   :  { %5714 = shalt.err (!%p5711_p9)
}
 0x181   :  { %330 = dma.hbm_to_vmem [thread:$0]  %s6901_s10, 16, %s328_s12, [#allocation27]  }
 0x182   :  { %s5891_s25 = smov [#allocation29]   ;;  %s5715_s0 = scalar_lea.hbm %s6118_s21, 16 }
 0x183   :  { %s339_s8 = sshll.u32 %s5891_s25, 4  ;;  %p5716_p10 = scmp.ne.s32.totalorder %s6118_s21, %s5715_s0  ;;  %s340_s8 = int_to_ptr.vmem [resolvable:$true] %s339_s8 }
 0x184   :  { %p5719_p11 = scmp.lt.u32.totalorder %s5715_s0, %s6118_s21 }
 0x186   :  { %p5721_p12 = pnand %p5719_p11, %p5716_p10 }
 0x188   :  { %5724 = shalt.err (!%p5721_p12)
}
 0x189   :  { %s5725_s15 = scalar_lea.vmem %s340_s8, 16  ;;  %s5729_s24 = scalar_lea.vmem %s340_s8, 32 }
 0x18a   :  { %p5726_p13 = scmp.ne.s32.totalorder %s340_s8, %s5725_s15  ;;  %p5730_p0 = scmp.lt.s32.totalorder %s340_s8, %s340_s8 }
 0x18b   :  { %p5731_p1 = scmp.lt.s32.totalorder %s5729_s24, %s5725_s15 }
 0x18d   :  { %p5732_p2 = por %p5731_p1, %p5730_p0 }
 0x18f   :  { %p5733_p3 = pnand %p5732_p2, %p5726_p13 }
 0x191   :  { %5736 = shalt.err (!%p5733_p3)
}
 0x192   :  { %342 = dma.hbm_to_vmem [thread:$0]  %s6118_s21, 16, %s340_s8, [#allocation30]  }
 0x193   :  { %5803 = dma.done.wait [#allocation3], 64  }
 0x194   :  { %5804 = vsyncadd [#allocation3], 4294967232 }
 0x195   :  { %5805 = dma.done.wait [#allocation6], 32  }
 0x196   :  { %5806 = vsyncadd [#allocation6], 4294967264 }
 0x197   :  { %5807 = dma.done.wait [#allocation9], 32  }
 0x198   :  { %5808 = vsyncadd [#allocation9], 4294967264 }
 0x199   :  { %5809 = dma.done.wait [#allocation12], 80  }
 0x19a   :  { %5810 = vsyncadd [#allocation12], 4294967216 }
 0x19b   :  { %5811 = dma.done.wait [#allocation15], 32  }
 0x19c   :  { %5812 = vsyncadd [#allocation15], 4294967264 }
 0x19d   :  { %5813 = dma.done.wait [#allocation18], 528  }
 0x19e   :  { %5814 = vsyncadd [#allocation18], 4294966768 }
 0x19f   :  { %5815 = dma.done.wait [#allocation21], 32  }
 0x1a0   :  { %5816 = vsyncadd [#allocation21], 4294967264 }
 0x1a1   :  { %5817 = dma.done.wait [#allocation24], 32  }
 0x1a2   :  { %5818 = vsyncadd [#allocation24], 4294967264 }
 0x1a3   :  { %5819 = dma.done.wait [#allocation27], 528  }
 0x1a4   :  { %5820 = vsyncadd [#allocation27], 4294966768 }
 0x1a5   :  { %5821 = dma.done.wait [#allocation30], 16  }
 0x1a6   :  { %5822 = vsyncadd [#allocation30], 4294967280  ;;  %s6902_s21 = sld [smem:[#allocation47_spill]]  ;;  %s6903_s16 = sld [smem:[#allocation61_spill]]  ;;  %vm415_vm0 = vcmask 1042432   ;;  %vm408_vm1 = vcmask 23552  }
 0x1a7   :  { %v400_v0 = vld [vmem:[#allocation2] sm:$0x7]  ;;  %s6904_s13 = sld [smem:[#allocation62_spill]]  ;;  %v4214_v12 = vld [vmem:[#allocation5] ss:$0 sm:$0xff]  ;;  %vm507_vm2 = vcmask 261120  }
 0x1a8   :  { %4593 = vmatprep.subr.msk.mxu0 %vm415_vm0, %v400_v0  ;;  %v4218_v22 = vld [vmem:[#allocation7] ss:$0 sm:$0xff]  ;;  %s6905_s18 = sld [smem:[#allocation63_spill]]  ;;  %v6869_v29 = vmov 0.0|0.0   ;;  %vm5893_vm3 = vmmov 0   ;;  %v5894_v30 = vmov 0.0  }
 0x1a9   :  { %4594 = vmatpush3.msk.msra.mxu0 %vm415_vm0, %v400_v0  ;;  %s6906_s14 = sld [smem:[#allocation64_spill]]  ;;  %s6907_s22 = sld [smem:[#allocation52_spill]]  ;;  %v4221_v37 = vld [vmem:[#allocation8] ss:$0 sm:$0xff]  ;;  %vm685_vm4 = vcmask 130048   ;;  %v1115_v63 = vld [vmem:[#allocation17] sm:$0xff] }
 0x1aa   :  { %s6908_s26 = sld [smem:[#allocation48_spill]]  ;;  %s6909_s3 = sld [smem:[#allocation65_spill]]  ;;  %v927_v52 = vld [vmem:[#allocation13] sm:$0x7]  ;;  %v1116_v0 = vld [vmem:[#allocation17 + $0x8] sm:$0xff]  ;;  %vm1465_vm5 = vcmask 1041408  }
 0x1ab   :  { %s6910_s6 = sld [smem:[#allocation66_spill]]  ;;  %s6911_s23 = sld [smem:[#allocation67_spill]]  ;;  %vm1458_vm6 = vcmask 15360   ;;  %vm1788_vm7 = vcmask 64512   ;;  %vm1956_vm8 = vcmask 58368   ;;  %vm4085_vm9 = vcmask 0  }
 0x1ac   :  { %v397_v1 = vld [vmem:[%s6902_s21] sm:$0xff]  ;;  %v398_v2 = vld [vmem:[%s6902_s21 + $0x8] sm:$0xff]  ;;  %v498_v6 = vld [vmem:[%s6903_s16 + $0x10] sm:$0xff]  ;;  %s6912_s19 = sld [smem:[#allocation53_spill]]  ;;  %s6913_s28 = sld [smem:[#allocation54_spill]] }
 0x1ad   :  { %4595 = vmatprep.mubr.msk.f32.mxu0 %vm408_vm1, %v397_v1  ;;  %v496_v3 = vld [vmem:[%s6903_s16] sm:$0xff]  ;;  %v497_v4 = vld [vmem:[%s6903_s16 + $0x8] sm:$0xff]  ;;  %v499_v7 = vld [vmem:[%s6903_s16 + $0x18] sm:$0xff]  ;;  %v5003_v1 = vpack.c.bf16 %v1116_v0, %v1115_v63  ;;  %s6914_s9 = sld [smem:[#allocation51_spill]]  ;;  %s6915_s20 = sld [smem:[#allocation57_spill]] }
 0x1ae   :  { %v4964_v5 = vpack.c.bf16 %v497_v4, %v496_v3  ;;  %4596 = vmatmul.mubr.msk.f32.vlgmr.msra.gmra.mrb[0].mxu0 %vm408_vm1, %v398_v2  ;;  %v4968_v8 = vpack.c.bf16 %v499_v7, %v498_v6  ;;  %v591_v9 = vld [vmem:[%s6904_s13] sm:$0xff]  ;;  %v592_v10 = vld [vmem:[%s6904_s13 + $0x8] sm:$0xff]  ;;  %v593_v19 = vld [vmem:[%s6904_s13 + $0x10] sm:$0xff]  ;;  %s6916_s1 = sld [smem:[#allocation70_spill]]  ;;  %s6917_s12 = sld [smem:[#allocation58_spill]] }
 0x1af   :  { %v4972_v11 = vpack.c.bf16 %v592_v10, %v591_v9  ;;  %v594_v20 = vld [vmem:[%s6904_s13 + $0x18] sm:$0xff]  ;;  %v759_v31 = vld [vmem:[%s6905_s18] sm:$0xff]  ;;  %v760_v32 = vld [vmem:[%s6905_s18 + $0x8] sm:$0xff]  ;;  %s6918_s2 = sld [smem:[#allocation69_spill]]  ;;  %s6919_s7 = sld [smem:[#allocation49_spill]] }
 0x1b0   :  { %4965 = vmatprep.subr.bf16.mxu1 %v4964_v5  ;;  %v4976_v21 = vpack.c.bf16 %v594_v20, %v593_v19  ;;  %v4984_v33 = vpack.c.bf16 %v760_v32, %v759_v31  ;;  %v761_v34 = vld [vmem:[%s6905_s18 + $0x10] sm:$0xff]  ;;  %v762_v35 = vld [vmem:[%s6905_s18 + $0x18] sm:$0xff]  ;;  %v843_v44 = vld [vmem:[%s6906_s14] sm:$0xff]  ;;  %s6920_s4 = sld [smem:[#allocation56_spill]]  ;;  %s6921_s10 = sld [smem:[#allocation55_spill]] }
 0x1b1   :  { %4967 = vmatpush3.bf16.msra.mxu1 %v4964_v5  ;;  %4973 = vmatprep.subr.bf16.mxu0 %v4972_v11  ;;  %v4987_v36 = vpack.c.bf16 %v762_v35, %v761_v34  ;;  %v844_v45 = vld [vmem:[%s6906_s14 + $0x8] sm:$0xff]  ;;  %v399_v47 = vld [vmem:[%s6907_s22] sm:$0x3]  ;;  %v845_v49 = vld [vmem:[%s6906_s14 + $0x10] sm:$0xff]  ;;  %s6922_s29 = sld [smem:[#allocation71_spill]]  ;;  %s6923_s11 = sld [smem:[#allocation74_spill]] }
 0x1b2   :  { %4969 = vmatprep.subr.bf16.mxu1 %v4968_v8  ;;  %4975 = vmatpush3.bf16.msra.mxu0 %v4972_v11  ;;  %v4990_v48 = vpack.c.bf16 %v844_v45, %v843_v44  ;;  %v846_v50 = vld [vmem:[%s6906_s14 + $0x18] sm:$0xff]  ;;  %v924_v53 = vld [vmem:[%s6908_s26] sm:$0xff]  ;;  %v925_v56 = vld [vmem:[%s6908_s26 + $0x8] sm:$0xff]  ;;  %s6924_s30 = sld [smem:[#allocation50_spill]]  ;;  %s5895_s25 = smov 127  }
 0x1b3   :  { %4977 = vmatprep.subr.bf16.mxu0 %v4976_v21  ;;  %v4993_v51 = vpack.c.bf16 %v846_v50, %v845_v49  ;;  %v1021_v57 = vld [vmem:[%s6909_s3] sm:$0xff]  ;;  %v1022_v58 = vld [vmem:[%s6909_s3 + $0x8] sm:$0xff]  ;;  %v1023_v60 = vld [vmem:[%s6909_s3 + $0x10] sm:$0xff]  ;;  %s6941_s8 = sld [smem:[#allocation59_spill]]  ;;  %s6943_s0 = sld [smem:[#allocation60_spill]] }
 0x1b4   :  { %v4995_v59 = vpack.c.bf16 %v1022_v58, %v1021_v57  ;;  %v1024_v61 = vld [vmem:[%s6909_s3 + $0x18] sm:$0xff]  ;;  %v4229_v6 = vld [vmem:[#allocation14] ss:$0 sm:$0xff]  ;;  %v4233_v20 = vld [vmem:[#allocation16] ss:$0 sm:$0xff]  ;;  %s5897_s21 = smov [#allocation31]  }
 0x1b5   :  { %4971 = vmatpush3.bf16.msra.mxu1 %v4968_v8  ;;  %v4999_v62 = vpack.c.bf16 %v1024_v61, %v1023_v60  ;;  %v1284_v32 = vld [vmem:[%s6910_s6 + $0x10] sm:$0xff]  ;;  %v1367_v44 = vld [vmem:[%s6911_s23 + $0x8] sm:$0xff]  ;;  %v1369_v49 = vld [vmem:[%s6911_s23 + $0x18] sm:$0xff]  ;;  %s4124_s16 = sshll.u32 %s5897_s21, 4  ;;  %s5898_s18 = smov [#allocation32]   ;;  %s4125_s16 = int_to_ptr.vmem [resolvable:$true] %s4124_s16 }
 0x1b6   :  { %4979 = vmatpush3.bf16.msra.mxu0 %v4976_v21  ;;  %4980 = vmatprep.subr.bf16.mxu1 %v6869_v29  ;;  %v4225_v50 = vld [vmem:[#allocation10] ss:$0 sm:$0xff]  ;;  %v1454_v57 = vld [vmem:[%s6914_s9] sm:$0xff]  ;;  %v4240_v63 = vld [vmem:[#allocation20] ss:$0 sm:$0xff]  ;;  %s4134_s14 = sshll.u32 %s5898_s18, 4  ;;  %p5742_p5 = scmp.lt.s32.totalorder %s4125_s16, %s4125_s16  ;;  %s4135_s14 = int_to_ptr.vmem [resolvable:$true] %s4134_s14 }
 0x1b7   :  { %4983 = vmatprep.subr.bf16.mxu0 %v6869_v29  ;;  %v1455_v58 = vld [vmem:[%s6914_s9 + $0x8] sm:$0xff]  ;;  %v4242_v0 = vld [vmem:[#allocation22] ss:$0 sm:$0xff]  ;;  %s5899_s22 = smov [#allocation34]   ;;  %s5737_s3 = scalar_lea.vmem %s4125_s16, 16 }
 0x1b8   :  { %v1796_v60 = vmul.f32 %v1455_v58, %v1455_v58  ;;  %s4144_s26 = sshll.u32 %s5899_s22, 4  ;;  %p5738_p4 = scmp.ne.s32.totalorder %s4125_s16, %s5737_s3  ;;  %s6829_s26 = int_to_ptr.vmem [resolvable:$true] %s4144_s26 }
 0x281   :  { %v4597_v13 = vpop.f32.mrb[0].mxu0 }
 0x282   :  { %v491_v14 = vadd.f32 %v4597_v13, %v4214_v12  ;;  %v485_v15 = vpop.f32.mrb[1].mxu0  ;;  %v1117_v13 = vld [vmem:[#allocation17 + $0x10] sm:$0xff] }
 0x283   :  { %v486_v16 = vadd.f32 %v4214_v12, %v485_v15 }
 0x284   :  { %v495_v18 = vmax.f32 %v491_v14, 0.0  ;;  %v1118_v14 = vld [vmem:[#allocation17 + $0x18] sm:$0xff] }
 0x285   :  { %v494_v17 = vmax.f32 %v486_v16, 0.0  ;;  %v5007_v15 = vpack.c.bf16 %v1118_v14, %v1117_v13  ;;  %v4227_v16 = vld [vmem:[#allocation11] ss:$0 sm:$0xff] }
 0x286   :  { %v1805_v13 = vld [vmem:[%s6915_s20 + $0x8] sm:$0xff] }
 0x287   :  { %4606 = vmatprep.mubr.msk.f32.mxu1 %vm507_vm2, %v494_v17 }
 0x288   :  { %4607 = vmatmul.mubr.msk.f32.vlgmr.msra.gmra.mrb[0].mxu1 %vm507_vm2, %v495_v18 }
 0x289   :  { %4624 = vmatprep.mubr.msk.f32.mxu1 %vm5893_vm3, %v5894_v30 }
 0x35b   :  { %v4608_v23 = vpop.f32.mrb[0].mxu1 }
 0x35c   :  { %v586_v24 = vadd.f32 %v4608_v23, %v4218_v22  ;;  %v580_v25 = vpop.f32.mrb[1].mxu1 }
 0x35d   :  { %v581_v26 = vadd.f32 %v4218_v22, %v580_v25  ;;  %v1283_v25 = vld [vmem:[%s6910_s6 + $0x8] sm:$0xff] }
 0x35e   :  { %v590_v28 = vmax.f32 %v586_v24, 0.0  ;;  %v1282_v24 = vld [vmem:[%s6910_s6] sm:$0xff] }
 0x35f   :  { %v589_v27 = vmax.f32 %v581_v26, 0.0 }
 0x361   :  { %4617 = vmatprep.mubr.msk.f32.mxu0 %vm507_vm2, %v589_v27 }
 0x362   :  { %4618 = vmatmul.mubr.msk.f32.vlgmr.msra.gmra.mrb[2].mxu0 %vm507_vm2, %v590_v28  ;;  %v5015_v28 = vpack.c.bf16 %v1283_v25, %v1282_v24 }
 0x363   :  { %4635 = vmatprep.mubr.msk.f32.mxu0 %vm5893_vm3, %v5894_v30  ;;  %4985 = vmatpush3.bf16.msra.mxu0 %v4984_v33  ;;  %v1285_v33 = vld [vmem:[%s6910_s6 + $0x18] sm:$0xff]  ;;  %s5741_s6 = scalar_lea.vmem %s4125_s16, 32 }
 0x364   :  { %4986 = vmatprep.subr.bf16.mxu0 %v6869_v29  ;;  %v5018_v34 = vpack.c.bf16 %v1285_v33, %v1284_v32  ;;  %p5743_p6 = scmp.lt.s32.totalorder %s5741_s6, %s5737_s3 }
 0x366   :  { %p5744_p7 = por %p5743_p6, %p5742_p5 }
 0x367   :  { %4988 = vmatpush3.bf16.msra.mxu0 %v4987_v36  ;;  %v4236_v36 = vld [vmem:[#allocation19] ss:$0 sm:$0xff] }
 0x368   :  { %4649 = vmatprep.subr.msk.mxu0 %vm415_vm0, %v927_v52  ;;  %p5745_p8 = pnand %p5744_p7, %p5738_p4 }
 0x435   :  { %v4619_v38 = vpop.f32.mrb[2].mxu0 }
 0x436   :  { %v680_v39 = vadd.f32 %v4619_v38, %v4221_v37  ;;  %v674_v40 = vpop.f32.mrb[3].mxu0 }
 0x437   :  { %v675_v41 = vadd.f32 %v4221_v37, %v674_v40 }
 0x438   :  { %v684_v42 = vmax.f32 %v680_v39, 0.0 }
 0x439   :  { %v683_v43 = vmax.f32 %v675_v41, 0.0 }
 0x43b   :  { %v4981_v46 = vpack.c.bf16 %v684_v42, %v683_v43  ;;  %v1366_v43 = vld [vmem:[%s6911_s23] sm:$0xff] }
 0x43d   :  { %4982 = vmatpush3.bf16.msra.mxu1 %v4981_v46  ;;  %v926_v46 = vld [vmem:[%s6912_s19] sm:$0x3] }
 0x43e   :  { %4989 = vmatprep.subr.bf16.mxu1 %v6869_v29 }
 0x440   :  { %4625 = vmatmul.mubr.msk.f32.vlgmr.msra.gmra.mrb[2].mxu1 %vm685_vm4, %v399_v47  ;;  %v5021_v47 = vpack.c.bf16 %v1367_v44, %v1366_v43 }
 0x441   :  { %4991 = vmatpush3.bf16.msra.mxu1 %v4990_v48  ;;  %4646 = vmatprep.mubr.msk.f32.mxu1 %vm5893_vm3, %v5894_v30  ;;  %v1368_v48 = vld [vmem:[%s6911_s23 + $0x10] sm:$0xff] }
 0x442   :  { %4992 = vmatprep.subr.bf16.mxu1 %v6869_v29 }
 0x445   :  { %4994 = vmatpush3.bf16.msra.mxu1 %v4993_v51  ;;  %v5024_v51 = vpack.c.bf16 %v1369_v49, %v1368_v48 }
 0x446   :  { %4996 = vmatprep.subr.bf16.mxu1 %v4995_v59 }
 0x513   :  { %v755_v54 = vpop.f32.mrb[2].mxu1 }
 0x514   :  { %v4626_v55 = vpop.f32.mrb[3].mxu1  ;;  %4636 = vmatmul.mubr.msk.f32.vlgmr.msra.gmra.mrb[4].mxu0 %vm507_vm2, %v755_v54  ;;  %4647 = vmatmul.mubr.msk.f32.vlgmr.msra.gmra.mrb[4].mxu1 %vm507_vm2, %v755_v54 }
 0x515   :  { %4650 = vmatpush3.msk.msra.mxu0 %vm415_vm0, %v927_v52  ;;  %4651 = vmatprep.mubr.msk.f32.mxu0 %vm408_vm1, %v924_v53  ;;  %v1456_v55 = vld [vmem:[%s6913_s28] sm:$0xff] }
 0x516   :  { %4998 = vmatpush3.bf16.msra.mxu1 %v4995_v59  ;;  %5004 = vmatprep.subr.bf16.mxu0 %v5003_v1  ;;  %v1795_v59 = vmul.f32 %v1454_v57, %v1454_v57 }
 0x517   :  { %5000 = vmatprep.subr.bf16.mxu1 %v4999_v62 }
 0x518   :  { %4652 = vmatmul.mubr.msk.f32.vlgmr.msra.gmra.mrb[6].mxu0 %vm408_vm1, %v925_v56  ;;  %v1457_v56 = vld [vmem:[%s6913_s28 + $0x8] sm:$0xff]  ;;  %v1797_v61 = vsel %vm1788_vm7, %v1795_v59, 0.0 }
 0x519   :  { %5006 = vmatpush3.bf16.msra.mxu0 %v5003_v1  ;;  %1798 = vadd.xlane.f32.xlu0 %v1797_v61  ;;  %v2163_v59 = vld [vmem:[%s6920_s4 + $0x8] sm:$0xff]  ;;  %v2165_v61 = vld [vmem:[%s6920_s4 + $0x18] sm:$0xff] }
 0x51a   :  { %5002 = vmatpush3.bf16.msra.mxu1 %v4999_v62  ;;  %5008 = vmatprep.subr.bf16.mxu0 %v5007_v15  ;;  %v1800_v62 = vsel %vm1788_vm7, %v1796_v60, 0.0  ;;  %v2164_v60 = vld [vmem:[%s6920_s4 + $0x10] sm:$0xff] }
 0x51b   :  { %5011 = vmatprep.subr.bf16.mxu1 %v6869_v29 }
 0x51d   :  { %5010 = vmatpush3.bf16.msra.mxu0 %v5007_v15  ;;  %1801 = vadd.xlane.f32.xlu0 %v1800_v62  ;;  %v2166_v62 = vld [vmem:[%s6920_s4 + $0x20] sm:$0xff] }
 0x51e   :  { %5014 = vmatprep.subr.bf16.mxu0 %v6869_v29 }
 0x5e7   :  { %v6265_v2 = vpop.f32.mrb[4].mxu0  ;;  %v920_v3 = vpop.f32.mrb[4].mxu1 }
 0x5e8   :  { %v4637_v4 = vpop.f32.mrb[5].mxu0  ;;  %v4648_v5 = vpop.f32.mrb[5].mxu1  ;;  %v921_v17 = vadd.f32 %v4227_v16, %v920_v3  ;;  %v840_v52 = vadd.f32 %v4225_v50, %v6265_v2 }
 0x5ea   :  { %v1447_v18 = vmul.f32 0.5, %v921_v17 }
 0x5eb   :  { %v4653_v7 = vpop.f32.mrb[6].mxu0 }
 0x5ec   :  { %v1016_v8 = vadd.f32 %v4653_v7, %v4229_v6  ;;  %v1010_v9 = vpop.f32.mrb[7].mxu0  ;;  %v1448_v19 = vmul.f32 1.442695, %v1447_v18  ;;  %v2064_v18 = vld [vmem:[%s6916_s1] sm:$0xff] }
 0x5ed   :  { %v1011_v10 = vadd.f32 %v4229_v6, %v1010_v9 }
 0x5ee   :  { %v1020_v12 = vmax.f32 %v1016_v8, 0.0  ;;  %5189 = vpow2.f32 %v1448_v19  ;;  %v1803_v19 = vld [vmem:[%s6917_s12] sm:$0x3] }
 0x5ef   :  { %v1019_v11 = vmax.f32 %v1011_v10, 0.0 }
 0x5f1   :  { %4662 = vmatprep.mubr.msk.f32.mxu1 %vm507_vm2, %v1019_v11  ;;  %v1804_v11 = vld [vmem:[%s6915_s20] sm:$0xff] }
 0x5f2   :  { %4663 = vmatmul.mubr.msk.f32.vlgmr.msra.gmra.mrb[6].mxu1 %vm507_vm2, %v1020_v12  ;;  %v1799_v12 = vpop.xlane.xlu0 %1798 }
 0x5f3   :  { %4680 = vmatprep.mubr.msk.f32.mxu1 %vm5893_vm3, %v5894_v30  ;;  %v1881_v14 = vmul.f32 %v1804_v11, %v1799_v12  ;;  %v2580_v12 = vld [vmem:[%s6922_s29] sm:$0xff] }
 0x5f6   :  { %v1802_v15 = vpop.xlane.xlu0 %1801 }
 0x5f7   :  { %v1882_v16 = vmul.f32 %v1805_v13, %v1802_v15 }
 0x5f8   :  { %v6281_v35 = vpop.eup %5189 }
 0x5f9   :  { %v5030_v17 = vpack.c.bf16 %v1882_v16, %v1881_v14 }
 0x6c5   :  { %v4664_v21 = vpop.f32.mrb[6].mxu1 }
 0x6c6   :  { %v1110_v22 = vadd.f32 %v4664_v21, %v4233_v20  ;;  %v1104_v23 = vpop.f32.mrb[7].mxu1 }
 0x6c7   :  { %v1105_v26 = vadd.f32 %v4233_v20, %v1104_v23 }
 0x6c8   :  { %v1114_v31 = vmax.f32 %v1110_v22, 0.0 }
 0x6c9   :  { %v1113_v27 = vmax.f32 %v1105_v26, 0.0 }
 0x6cb   :  { %4673 = vmatprep.mubr.msk.f32.mxu0 %vm507_vm2, %v1113_v27 }
 0x6cc   :  { %4674 = vmatmul.mubr.msk.f32.vlgmr.msra.gmra.mrb[8].mxu0 %vm507_vm2, %v1114_v31 }
 0x6cd   :  { %5016 = vmatpush3.bf16.msra.mxu0 %v5015_v28  ;;  %4691 = vmatprep.mubr.msk.f32.mxu0 %vm5893_vm3, %v5894_v30 }
 0x6ce   :  { %5017 = vmatprep.subr.bf16.mxu0 %v6869_v29 }
 0x6d1   :  { %5019 = vmatpush3.bf16.msra.mxu0 %v5018_v34 }
 0x6d2   :  { %4705 = vmatprep.subr.msk.mxu0 %vm1465_vm5, %v6281_v35 }
 0x79f   :  { %v4675_v37 = vpop.f32.mrb[8].mxu0 }
 0x7a0   :  { %v1204_v38 = vadd.f32 %v4675_v37, %v4236_v36  ;;  %v1198_v39 = vpop.f32.mrb[9].mxu0 }
 0x7a1   :  { %v1199_v40 = vadd.f32 %v4236_v36, %v1198_v39 }
 0x7a2   :  { %v1208_v41 = vmax.f32 %v1204_v38, 0.0 }
 0x7a3   :  { %v1207_v42 = vmax.f32 %v1199_v40, 0.0 }
 0x7a5   :  { %v5012_v45 = vpack.c.bf16 %v1208_v41, %v1207_v42 }
 0x7a7   :  { %5013 = vmatpush3.bf16.msra.mxu1 %v5012_v45 }
 0x7a8   :  { %5020 = vmatprep.subr.bf16.mxu1 %v6869_v29 }
 0x7aa   :  { %4681 = vmatmul.mubr.msk.f32.vlgmr.msra.gmra.mrb[8].mxu1 %vm685_vm4, %v926_v46 }
 0x7ab   :  { %5022 = vmatpush3.bf16.msra.mxu1 %v5021_v47  ;;  %4702 = vmatprep.mubr.msk.f32.mxu1 %vm5893_vm3, %v5894_v30 }
 0x7ac   :  { %5023 = vmatprep.subr.bf16.mxu1 %v6869_v29 }
 0x7af   :  { %5025 = vmatpush3.bf16.msra.mxu1 %v5024_v51 }
 0x7b0   :  { %4710 = vmatprep.subr.msk.mxu1 %vm1465_vm5, %v840_v52 }
 0x87d   :  { %v1278_v53 = vpop.f32.mrb[8].mxu1 }
 0x87e   :  { %v4682_v54 = vpop.f32.mrb[9].mxu1  ;;  %4692 = vmatmul.mubr.msk.f32.vlgmr.msra.gmra.mrb[10].mxu0 %vm507_vm2, %v1278_v53  ;;  %4703 = vmatmul.mubr.msk.f32.vlgmr.msra.gmra.mrb[10].mxu1 %vm507_vm2, %v1278_v53 }
 0x87f   :  { %4706 = vmatpush3.msk.msra.mxu0 %vm1465_vm5, %v6281_v35  ;;  %4711 = vmatpush3.msk.msra.mxu1 %vm1465_vm5, %v840_v52 }
 0x880   :  { %4707 = vmatprep.mubr.msk.f32.mxu0 %vm1458_vm6, %v1456_v55  ;;  %4712 = vmatprep.mubr.msk.f32.mxu1 %vm1458_vm6, %v1456_v55 }
 0x882   :  { %4708 = vmatmul.mubr.msk.f32.vlgmr.msra.gmra.mrb[12].mxu0 %vm1458_vm6, %v1457_v56  ;;  %4713 = vmatmul.mubr.msk.f32.vlgmr.msra.gmra.mrb[12].mxu1 %vm1458_vm6, %v1457_v56 }
 0x883   :  { %4717 = vmatprep.mubr.msk.f32.mxu0 %vm1458_vm6, %v1456_v55  ;;  %4722 = vmatprep.mubr.msk.f32.mxu1 %vm1458_vm6, %v1456_v55  ;;  %v1972_v55 = vld [vmem:[%s6918_s2] sm:$0x3] }
 0x951   :  { %v1362_v1 = vpop.f32.mrb[10].mxu0  ;;  %v1443_v2 = vpop.f32.mrb[10].mxu1 }
 0x952   :  { %v1363_v3 = vadd.f32 %v4240_v63, %v1362_v1  ;;  %v1444_v4 = vadd.f32 %v4242_v0, %v1443_v2  ;;  %v4693_v5 = vpop.f32.mrb[11].mxu0  ;;  %v4704_v6 = vpop.f32.mrb[11].mxu1  ;;  %v2167_v63 = vld [vmem:[%s6920_s4 + $0x28] sm:$0xff]  ;;  %v2168_v0 = vld [vmem:[%s6920_s4 + $0x30] sm:$0xff]  ;;  %v2169_v1 = vld [vmem:[%s6920_s4 + $0x38] sm:$0xff] }
 0x953   :  { %v2170_v2 = vld [vmem:[%s6920_s4 + $0x40] sm:$0xff]  ;;  %v2173_v5 = vld [vmem:[%s6920_s4 + $0x58] sm:$0xff] }
 0x954   :  { %v1450_v7 = vmul.f32 0.5, %v1444_v4  ;;  %4715 = vmatprep.subr.msk.mxu0 %vm1465_vm5, %v1363_v3  ;;  %v2172_v4 = vld [vmem:[%s6920_s4 + $0x50] sm:$0xff]  ;;  %v2174_v6 = vld [vmem:[%s6920_s4 + $0x60] sm:$0xff] }
 0x955   :  { %4716 = vmatpush3.msk.msra.mxu0 %vm1465_vm5, %v1363_v3  ;;  %v4709_v20 = vpop.f32.mrb[12].mxu0  ;;  %v4714_v21 = vpop.f32.mrb[12].mxu1  ;;  %v2171_v3 = vld [vmem:[%s6920_s4 + $0x48] sm:$0xff] }
 0x956   :  { %v1451_v8 = vmul.f32 1.442695, %v1450_v7  ;;  %4718 = vmatmul.mubr.msk.f32.vlgmr.msra.gmra.mrb[14].mxu0 %vm1458_vm6, %v1457_v56  ;;  %5026 = vmatprep.subr.bf16.mxu0 %v6869_v29  ;;  %v1545_v22 = vmul.f32 %v4709_v20, %v1455_v58  ;;  %v1535_v23 = vpop.f32.mrb[13].mxu0  ;;  %v1615_v24 = vpop.f32.mrb[13].mxu1  ;;  %v2162_v58 = vld [vmem:[%s6920_s4] sm:$0xff]  ;;  %v2175_v7 = vld [vmem:[%s6920_s4 + $0x68] sm:$0xff] }
 0x957   :  { %4729 = vmatprep.mubr.msk.f32.mxu0 %vm5893_vm3, %v5894_v30  ;;  %v1544_v25 = vmul.f32 %v1535_v23, %v1454_v57  ;;  %v1971_v57 = vld [vmem:[%s6919_s7 + $0x8] sm:$0xff] }
 0x958   :  { %5191 = vpow2.f32 %v1451_v8  ;;  %v1621_v26 = vadd.f32 %v4714_v21, %v1545_v22  ;;  %v2176_v8 = vld [vmem:[%s6920_s4 + $0x70] sm:$0xff]  ;;  %v6391_v23 = vld [vmem:[%s6921_s10 + $0x8] sm:$0xff] }
 0x959   :  { %v1616_v27 = vadd.f32 %v1615_v24, %v1544_v25  ;;  %v6394_v24 = vld [vmem:[%s6921_s10 + $0x10] sm:$0xff]  ;;  %v6401_v25 = vld [vmem:[%s6921_s10 + $0x18] sm:$0xff] }
 0x962   :  { %v5192_v9 = vpop.eup %5191 }
 0x963   :  { %v6320_v10 = vadd.f32 1e-06, %v5192_v9  ;;  %v2177_v9 = vld [vmem:[%s6920_s4 + $0x78] sm:$0xff] }
 0x965   :  { %4720 = vmatprep.subr.msk.mxu1 %vm1465_vm5, %v6320_v10 }
 0x966   :  { %4721 = vmatpush3.msk.msra.mxu1 %vm1465_vm5, %v6320_v10 }
 0x967   :  { %4723 = vmatmul.mubr.msk.f32.vlgmr.msra.gmra.mrb[14].mxu1 %vm1458_vm6, %v1457_v56  ;;  %5029 = vmatprep.subr.bf16.mxu1 %v6869_v29  ;;  %v1970_v56 = vld [vmem:[%s6919_s7] sm:$0xff] }
 0x968   :  { %4736 = vmatprep.mubr.msk.f32.mxu1 %vm5893_vm3, %v5894_v30  ;;  %5031 = vmatpush3.bf16.msra.mxu1 %v5030_v17  ;;  %v4260_v17 = vld [vmem:[#allocation23] ss:$0 sm:$0xff] }
 0x969   :  { %4744 = vmatprep.subr.mxu1 %v2064_v18 }
 0x96b   :  { %4737 = vmatmul.mubr.msk.f32.vlgmr.msra.gmra.mrb[16].mxu1 %vm685_vm4, %v1803_v19 }
 0x96c   :  { %4745 = vmatpush3.msra.mxu1 %v2064_v18  ;;  %4746 = vmatprep.mubr.msk.f32.mxu1 %vm1788_vm7, %v1616_v27 }
 0x96f   :  { %4747 = vmatmul.mubr.msk.f32.vlgmr.msra.gmra.mrb[18].mxu1 %vm1788_vm7, %v1621_v26 }
 0xa29   :  { %v4719_v28 = vpop.f32.mrb[14].mxu0 }
 0xa2a   :  { %v1693_v31 = vpop.f32.mrb[15].mxu0  ;;  %v1703_v34 = vsub.f32 %v1621_v26, %v4719_v28  ;;  %v6404_v26 = vld [vmem:[%s6921_s10 + $0x20] sm:$0xff]  ;;  %v6414_v28 = vld [vmem:[%s6921_s10 + $0x30] sm:$0xff] }
 0xa2b   :  { %v1702_v37 = vsub.f32 %v1616_v27, %v1693_v31  ;;  %v6411_v27 = vld [vmem:[%s6921_s10 + $0x28] sm:$0xff]  ;;  %v6421_v31 = vld [vmem:[%s6921_s10 + $0x38] sm:$0xff] }
 0xa3a   :  { %v4724_v32 = vpop.f32.mrb[14].mxu1 }
 0xa3b   :  { %5193 = vrcp.f32 %v4724_v32  ;;  %v1773_v33 = vpop.f32.mrb[15].mxu1  ;;  %v6424_v32 = vld [vmem:[%s6921_s10 + $0x40] sm:$0xff] }
 0xa3c   :  { %5195 = vrcp.f32 %v1773_v33  ;;  %v6431_v33 = vld [vmem:[%s6921_s10 + $0x48] sm:$0xff] }
 0xa3e   :  { %v6339_v45 = vpop.f32.mrb[16].mxu1 }
 0xa3f   :  { %v4738_v46 = vpop.f32.mrb[17].mxu1 }
 0xa40   :  { %v2801_v46 = vld [vmem:[#allocation26 + $0x8] sm:$0xff] }
 0xa42   :  { %v4748_v47 = vpop.f32.mrb[18].mxu1 }
 0xa43   :  { %v2137_v48 = vpop.f32.mrb[19].mxu1 }
 0xa44   :  { %v5032_v49 = vpack.c.bf16 %v4748_v47, %v2137_v48 }
 0xa45   :  { %v5194_v36 = vpop.eup %5193 }
 0xa46   :  { %v5196_v38 = vpop.eup %5195  ;;  %v1785_v39 = vmul.f32 %v5194_v36, %v1703_v34  ;;  %v6434_v34 = vld [vmem:[%s6921_s10 + $0x50] sm:$0xff]  ;;  %v6441_v36 = vld [vmem:[%s6921_s10 + $0x58] sm:$0xff] }
 0xa47   :  { %v1783_v40 = vmul.f32 %v5196_v38, %v1702_v37  ;;  %v6444_v37 = vld [vmem:[%s6921_s10 + $0x60] sm:$0xff]  ;;  %v6451_v38 = vld [vmem:[%s6921_s10 + $0x68] sm:$0xff] }
 0xa48   :  { %v1787_v43 = vmul.f32 %v1785_v39, %v1785_v39  ;;  %v6454_v39 = vld [vmem:[%s6921_s10 + $0x70] sm:$0xff] }
 0xa49   :  { %v1786_v41 = vmul.f32 %v1783_v40, %v1783_v40  ;;  %v6461_v40 = vld [vmem:[%s6921_s10 + $0x78] sm:$0xff] }
 0xa4a   :  { %v1792_v44 = vsel %vm1788_vm7, %v1787_v43, 0.0 }
 0xa4b   :  { %v1789_v42 = vsel %vm1788_vm7, %v1786_v41, 0.0  ;;  %v2582_v41 = vld [vmem:[%s6922_s29 + $0x10] sm:$0xff] }
 0xa4c   :  { %1790 = vadd.xlane.f32.xlu1 %v1789_v42  ;;  %v2583_v42 = vld [vmem:[%s6922_s29 + $0x18] sm:$0xff] }
 0xa4d   :  { %v5044_v43 = vpack.c.bf16 %v2583_v42, %v2582_v41  ;;  %v3021_v41 = vld [vmem:[%s6923_s11 + $0x8] sm:$0xff] }
 0xa50   :  { %1793 = vadd.xlane.f32.xlu1 %v1792_v44  ;;  %v2800_v44 = vld [vmem:[#allocation26] sm:$0xff] }
 0xa51   :  { %v5048_v47 = vpack.c.bf16 %v2801_v46, %v2800_v44 }
 0xad9   :  { %v1791_v50 = vpop.xlane.xlu1 %1790 }
 0xada   :  { %v1806_v52 = vmul.f32 %v1804_v11, %v1791_v50  ;;  %v6382_v11 = vld [vmem:[%s6921_s10] sm:$0xff] }
 0xadd   :  { %v1794_v51 = vpop.xlane.xlu1 %1793 }
 0xade   :  { %v1807_v53 = vmul.f32 %v1805_v13, %v1794_v51  ;;  %v2581_v13 = vld [vmem:[%s6922_s29 + $0x8] sm:$0xff] }
 0xadf   :  { %v5040_v14 = vpack.c.bf16 %v2581_v13, %v2580_v12 }
 0xae0   :  { %v5027_v54 = vpack.c.bf16 %v1807_v53, %v1806_v52 }
 0xae1   :  { %5041 = vmatprep.subr.bf16.mxu1 %v5040_v14 }
 0xae2   :  { %5028 = vmatpush3.bf16.msra.mxu0 %v5027_v54  ;;  %5043 = vmatpush3.bf16.msra.mxu1 %v5040_v14 }
 0xae3   :  { %4739 = vmatprep.subr.msk.mxu0 %vm1465_vm5, %v1972_v55  ;;  %5045 = vmatprep.subr.bf16.mxu1 %v5044_v43 }
 0xae5   :  { %4730 = vmatmul.mubr.msk.f32.vlgmr.msra.gmra.mrb[16].mxu0 %vm685_vm4, %v1803_v19 }
 0xae6   :  { %4740 = vmatpush3.msk.msra.mxu0 %vm1465_vm5, %v1972_v55  ;;  %4741 = vmatprep.mubr.msk.f32.mxu0 %vm1458_vm6, %v1970_v56 }
 0xae7   :  { %5033 = vmatprep.subr.bf16.mxu0 %v5032_v49  ;;  %5047 = vmatpush3.bf16.msra.mxu1 %v5044_v43  ;;  %v4298_v43 = vld [vmem:[#allocation25] ss:$0 sm:$0xff] }
 0xae8   :  { %5049 = vmatprep.subr.bf16.mxu1 %v5048_v47 }
 0xae9   :  { %4742 = vmatmul.mubr.msk.f32.vlgmr.msra.gmra.mrb[18].mxu0 %vm1458_vm6, %v1971_v57 }
 0xaea   :  { %5035 = vmatpush3.bf16.msra.mxu0 %v5032_v49  ;;  %4753 = vmatprep.mubr.msk.f32.mxu0 %vm685_vm4, %v2162_v58 }
 0xaed   :  { %4754 = vmatmul.mubr.msk.f32.vlgmr.msra.gmra.mrb[20].mxu0 %vm685_vm4, %v2163_v59 }
 0xaee   :  { %4756 = vmatprep.mubr.msk.f32.mxu0 %vm685_vm4, %v2164_v60 }
 0xaf1   :  { %4757 = vmatmul.mubr.msk.f32.gmra.mrb[22].mxu0 %vm685_vm4, %v2165_v61 }
 0xaf2   :  { %4759 = vmatprep.mubr.msk.f32.mxu0 %vm685_vm4, %v2166_v62 }
 0xaf5   :  { %4760 = vmatmul.mubr.msk.f32.gmra.mrb[24].mxu0 %vm685_vm4, %v2167_v63 }
 0xaf6   :  { %4762 = vmatprep.mubr.msk.f32.mxu0 %vm685_vm4, %v2168_v0 }
 0xaf9   :  { %4763 = vmatmul.mubr.msk.f32.gmra.mrb[26].mxu0 %vm685_vm4, %v2169_v1 }
 0xafa   :  { %4765 = vmatprep.mubr.msk.f32.mxu0 %vm685_vm4, %v2170_v2 }
 0xafd   :  { %4766 = vmatmul.mubr.msk.f32.gmra.mrb[28].mxu0 %vm685_vm4, %v2171_v3 }
 0xafe   :  { %4768 = vmatprep.mubr.msk.f32.mxu0 %vm685_vm4, %v2172_v4 }
 0xb01   :  { %4769 = vmatmul.mubr.msk.f32.gmra.mrb[30].mxu0 %vm685_vm4, %v2173_v5 }
 0xb02   :  { %4771 = vmatprep.mubr.msk.f32.mxu0 %vm685_vm4, %v2174_v6 }
 0xb05   :  { %4772 = vmatmul.mubr.msk.f32.gmra.mrb[32].mxu0 %vm685_vm4, %v2175_v7 }
 0xb06   :  { %4774 = vmatprep.mubr.msk.f32.mxu0 %vm685_vm4, %v2176_v8 }
 0xb09   :  { %4775 = vmatmul.mubr.msk.f32.gmra.mrb[34].mxu0 %vm685_vm4, %v2177_v9 }
 0xb0a   :  { %4781 = vmatprep.mubr.msk.f32.mxu0 %vm685_vm4, %v6382_v11 }
 0xbb8   :  { %v6388_v15 = vpop.f32.mrb[16].mxu0 }
 0xbb9   :  { %v4731_v16 = vpop.f32.mrb[17].mxu0 }
 0xbbc   :  { %v4743_v18 = vpop.f32.mrb[18].mxu0 }
 0xbbd   :  { %v2061_v19 = vadd.f32 %v4743_v18, %v4260_v17  ;;  %v2055_v20 = vpop.f32.mrb[19].mxu0 }
 0xbbe   :  { %v2056_v21 = vadd.f32 %v4260_v17, %v2055_v20  ;;  %v2803_v20 = vld [vmem:[#allocation26 + $0x18] sm:$0xff] }
 0xbc0   :  { %v5036_v22 = vpack.c.bf16 %v2061_v19, %v2056_v21  ;;  %v2802_v19 = vld [vmem:[#allocation26 + $0x10] sm:$0xff] }
 0xbc1   :  { %v5052_v21 = vpack.c.bf16 %v2803_v20, %v2802_v19 }
 0xbc2   :  { %5037 = vmatprep.subr.bf16.mxu0 %v5036_v22 }
 0xbc3   :  { %5039 = vmatpush3.bf16.msra.mxu0 %v5036_v22  ;;  %v3020_v22 = vld [vmem:[%s6923_s11] sm:$0xff] }
 0xbc4   :  { %v5056_v42 = vpack.c.bf16 %v3021_v41, %v3020_v22 }
 0xbc6   :  { %4782 = vmatmul.mubr.msk.f32.vlgmr.msra.gmra.mrb[20].mxu0 %vm685_vm4, %v6391_v23  ;;  %5057 = vmatprep.subr.bf16.mxu0 %v5056_v42 }
 0xbc7   :  { %4784 = vmatprep.mubr.msk.f32.mxu0 %vm685_vm4, %v6394_v24  ;;  %5059 = vmatpush3.bf16.msra.mxu0 %v5056_v42 }
 0xbca   :  { %4785 = vmatmul.mubr.msk.f32.gmra.mrb[22].mxu0 %vm685_vm4, %v6401_v25 }
 0xbcb   :  { %4787 = vmatprep.mubr.msk.f32.mxu0 %vm685_vm4, %v6404_v26 }
 0xbce   :  { %4788 = vmatmul.mubr.msk.f32.gmra.mrb[24].mxu0 %vm685_vm4, %v6411_v27 }
 0xbcf   :  { %4790 = vmatprep.mubr.msk.f32.mxu0 %vm685_vm4, %v6414_v28 }
 0xbd2   :  { %4791 = vmatmul.mubr.msk.f32.gmra.mrb[26].mxu0 %vm685_vm4, %v6421_v31 }
 0xbd3   :  { %4793 = vmatprep.mubr.msk.f32.mxu0 %vm685_vm4, %v6424_v32 }
 0xbd6   :  { %4794 = vmatmul.mubr.msk.f32.gmra.mrb[28].mxu0 %vm685_vm4, %v6431_v33 }
 0xbd7   :  { %4796 = vmatprep.mubr.msk.f32.mxu0 %vm685_vm4, %v6434_v34 }
 0xbda   :  { %4797 = vmatmul.mubr.msk.f32.gmra.mrb[30].mxu0 %vm685_vm4, %v6441_v36 }
 0xbdb   :  { %4799 = vmatprep.mubr.msk.f32.mxu0 %vm685_vm4, %v6444_v37 }
 0xbde   :  { %4800 = vmatmul.mubr.msk.f32.gmra.mrb[32].mxu0 %vm685_vm4, %v6451_v38 }
 0xbdf   :  { %4802 = vmatprep.mubr.msk.f32.mxu0 %vm685_vm4, %v6454_v39 }
 0xbe2   :  { %4803 = vmatmul.mubr.msk.f32.gmra.mrb[34].mxu0 %vm685_vm4, %v6461_v40 }
 0xc99   :  { %v4783_v48 = vpop.f32.mrb[20].mxu0 }
 0xc9a   :  { %v2485_v49 = vpop.f32.mrb[21].mxu0  ;;  %v2565_v51 = vmax.f32 %v4783_v48, 0.0 }
 0xc9b   :  { %v2564_v50 = vmax.f32 %v2485_v49, 0.0 }
 0xc9d   :  { %v4786_v52 = vpop.f32.mrb[22].mxu0  ;;  %4813 = vmatprep.mubr.msk.f32.mxu1 %vm507_vm2, %v2564_v50 }
 0xc9e   :  { %v2495_v53 = vpop.f32.mrb[23].mxu0  ;;  %4814 = vmatmul.mubr.msk.f32.vlgmr.msra.gmra.mrb[20].mxu1 %vm507_vm2, %v2565_v51  ;;  %v2567_v55 = vmax.f32 %v4786_v52, 0.0 }
 0xc9f   :  { %v2566_v54 = vmax.f32 %v2495_v53, 0.0  ;;  %5051 = vmatpush3.bf16.msra.mxu1 %v5048_v47 }
 0xca0   :  { %5053 = vmatprep.subr.bf16.mxu1 %v5052_v21 }
 0xca1   :  { %v4789_v56 = vpop.f32.mrb[24].mxu0  ;;  %4816 = vmatprep.mubr.msk.f32.mxu1 %vm507_vm2, %v2566_v54 }
 0xca2   :  { %v2505_v57 = vpop.f32.mrb[25].mxu0  ;;  %4817 = vmatmul.mubr.msk.f32.gmra.mrb[22].mxu1 %vm507_vm2, %v2567_v55  ;;  %v2569_v59 = vmax.f32 %v4789_v56, 0.0 }
 0xca3   :  { %v2568_v58 = vmax.f32 %v2505_v57, 0.0  ;;  %5055 = vmatpush3.bf16.msra.mxu1 %v5052_v21 }
 0xca5   :  { %v4792_v60 = vpop.f32.mrb[26].mxu0  ;;  %4819 = vmatprep.mubr.msk.f32.mxu1 %vm507_vm2, %v2568_v58 }
 0xca6   :  { %v2515_v61 = vpop.f32.mrb[27].mxu0  ;;  %4820 = vmatmul.mubr.msk.f32.gmra.mrb[24].mxu1 %vm507_vm2, %v2569_v59  ;;  %v2571_v63 = vmax.f32 %v4792_v60, 0.0 }
 0xca7   :  { %v2570_v62 = vmax.f32 %v2515_v61, 0.0 }
 0xca9   :  { %v4795_v0 = vpop.f32.mrb[28].mxu0  ;;  %4822 = vmatprep.mubr.msk.f32.mxu1 %vm507_vm2, %v2570_v62 }
 0xcaa   :  { %v2525_v1 = vpop.f32.mrb[29].mxu0  ;;  %4823 = vmatmul.mubr.msk.f32.gmra.mrb[26].mxu1 %vm507_vm2, %v2571_v63  ;;  %v2573_v3 = vmax.f32 %v4795_v0, 0.0 }
 0xcab   :  { %v2572_v2 = vmax.f32 %v2525_v1, 0.0 }
 0xcad   :  { %v4798_v4 = vpop.f32.mrb[30].mxu0  ;;  %4825 = vmatprep.mubr.msk.f32.mxu1 %vm507_vm2, %v2572_v2 }
 0xcae   :  { %v2535_v5 = vpop.f32.mrb[31].mxu0  ;;  %4826 = vmatmul.mubr.msk.f32.gmra.mrb[28].mxu1 %vm507_vm2, %v2573_v3  ;;  %v2575_v7 = vmax.f32 %v4798_v4, 0.0 }
 0xcaf   :  { %v2574_v6 = vmax.f32 %v2535_v5, 0.0 }
 0xcb1   :  { %v4801_v8 = vpop.f32.mrb[32].mxu0  ;;  %4828 = vmatprep.mubr.msk.f32.mxu1 %vm507_vm2, %v2574_v6 }
 0xcb2   :  { %v2545_v9 = vpop.f32.mrb[33].mxu0  ;;  %4829 = vmatmul.mubr.msk.f32.gmra.mrb[30].mxu1 %vm507_vm2, %v2575_v7  ;;  %v2577_v13 = vmax.f32 %v4801_v8, 0.0 }
 0xcb3   :  { %v2576_v12 = vmax.f32 %v2545_v9, 0.0 }
 0xcb5   :  { %v4804_v14 = vpop.f32.mrb[34].mxu0  ;;  %4831 = vmatprep.mubr.msk.f32.mxu1 %vm507_vm2, %v2576_v12 }
 0xcb6   :  { %v2555_v16 = vpop.f32.mrb[35].mxu0  ;;  %4832 = vmatmul.mubr.msk.f32.gmra.mrb[32].mxu1 %vm507_vm2, %v2577_v13  ;;  %v2579_v18 = vmax.f32 %v4804_v14, 0.0 }
 0xcb7   :  { %v2578_v17 = vmax.f32 %v2555_v16, 0.0 }
 0xcb9   :  { %4834 = vmatprep.mubr.msk.f32.mxu1 %vm507_vm2, %v2578_v17 }
 0xcba   :  { %4835 = vmatmul.mubr.msk.f32.gmra.mrb[34].mxu1 %vm507_vm2, %v2579_v18 }
 0xd71   :  { %v4815_v44 = vpop.f32.mrb[20].mxu1 }
 0xd72   :  { %v2711_v46 = vadd.f32 %v4815_v44, %v4298_v43  ;;  %v2705_v47 = vpop.f32.mrb[21].mxu1 }
 0xd73   :  { %v2706_v48 = vadd.f32 %v4298_v43, %v2705_v47 }
 0xd74   :  { %v2785_v51 = vmax.f32 %v2711_v46, 0.0 }
 0xd75   :  { %v2784_v49 = vmax.f32 %v2706_v48, 0.0  ;;  %v4818_v50 = vpop.f32.mrb[22].mxu1 }
 0xd76   :  { %v2721_v52 = vadd.f32 %v4818_v50, %v4298_v43  ;;  %v2715_v53 = vpop.f32.mrb[23].mxu1 }
 0xd77   :  { %v2716_v54 = vadd.f32 %v4298_v43, %v2715_v53  ;;  %4845 = vmatprep.mubr.msk.f32.mxu1 %vm507_vm2, %v2784_v49  ;;  %v3023_v53 = vld [vmem:[%s6923_s11 + $0x18] sm:$0xff] }
 0xd78   :  { %4846 = vmatmul.mubr.msk.f32.vlgmr.msra.gmra.mrb[36].mxu1 %vm507_vm2, %v2785_v51  ;;  %v2787_v57 = vmax.f32 %v2721_v52, 0.0  ;;  %v3022_v52 = vld [vmem:[%s6923_s11 + $0x10] sm:$0xff] }
 0xd79   :  { %v2786_v55 = vmax.f32 %v2716_v54, 0.0  ;;  %v4821_v56 = vpop.f32.mrb[24].mxu1  ;;  %v5060_v54 = vpack.c.bf16 %v3023_v53, %v3022_v52 }
 0xd7a   :  { %v2731_v58 = vadd.f32 %v4821_v56, %v4298_v43  ;;  %v2725_v59 = vpop.f32.mrb[25].mxu1  ;;  %v3401_v56 = vld [vmem:[%s6924_s30 + $0x8] sm:$0xff] }
 0xd7b   :  { %v2726_v60 = vadd.f32 %v4298_v43, %v2725_v59  ;;  %4848 = vmatprep.mubr.msk.f32.mxu1 %vm507_vm2, %v2786_v55  ;;  %v3400_v55 = vld [vmem:[%s6924_s30] sm:$0xff]  ;;  %5061 = vmatprep.subr.bf16.mxu0 %v5060_v54 }
 0xd7c   :  { %4849 = vmatmul.mubr.msk.f32.gmra.mrb[38].mxu1 %vm507_vm2, %v2787_v57  ;;  %v2789_v63 = vmax.f32 %v2731_v58, 0.0  ;;  %5063 = vmatpush3.bf16.msra.mxu0 %v5060_v54 }
 0xd7d   :  { %v2788_v61 = vmax.f32 %v2726_v60, 0.0  ;;  %v4824_v62 = vpop.f32.mrb[26].mxu1  ;;  %5068 = vmatprep.subr.bf16.mxu0 %v6869_v29 }
 0xd7e   :  { %v2741_v0 = vadd.f32 %v4824_v62, %v4298_v43  ;;  %v2735_v1 = vpop.f32.mrb[27].mxu1 }
 0xd7f   :  { %v2736_v2 = vadd.f32 %v4298_v43, %v2735_v1  ;;  %4851 = vmatprep.mubr.msk.f32.mxu1 %vm507_vm2, %v2788_v61 }
 0xd80   :  { %4852 = vmatmul.mubr.msk.f32.gmra.mrb[40].mxu1 %vm507_vm2, %v2789_v63  ;;  %v2791_v5 = vmax.f32 %v2741_v0, 0.0 }
 0xd81   :  { %v2790_v3 = vmax.f32 %v2736_v2, 0.0  ;;  %v4827_v4 = vpop.f32.mrb[28].mxu1 }
 0xd82   :  { %v2751_v6 = vadd.f32 %v4827_v4, %v4298_v43  ;;  %v2745_v7 = vpop.f32.mrb[29].mxu1 }
 0xd83   :  { %v2746_v8 = vadd.f32 %v4298_v43, %v2745_v7  ;;  %4854 = vmatprep.mubr.msk.f32.mxu1 %vm507_vm2, %v2790_v3 }
 0xd84   :  { %4855 = vmatmul.mubr.msk.f32.gmra.mrb[42].mxu1 %vm507_vm2, %v2791_v5  ;;  %v2793_v13 = vmax.f32 %v2751_v6, 0.0 }
 0xd85   :  { %v2792_v9 = vmax.f32 %v2746_v8, 0.0  ;;  %v4830_v12 = vpop.f32.mrb[30].mxu1 }
 0xd86   :  { %v2761_v14 = vadd.f32 %v4830_v12, %v4298_v43  ;;  %v2755_v16 = vpop.f32.mrb[31].mxu1 }
 0xd87   :  { %v2756_v17 = vadd.f32 %v4298_v43, %v2755_v16  ;;  %4857 = vmatprep.mubr.msk.f32.mxu1 %vm507_vm2, %v2792_v9 }
 0xd88   :  { %4858 = vmatmul.mubr.msk.f32.gmra.mrb[44].mxu1 %vm507_vm2, %v2793_v13  ;;  %v2795_v20 = vmax.f32 %v2761_v14, 0.0 }
 0xd89   :  { %v2794_v18 = vmax.f32 %v2756_v17, 0.0  ;;  %v4833_v19 = vpop.f32.mrb[32].mxu1 }
 0xd8a   :  { %v2771_v21 = vadd.f32 %v4833_v19, %v4298_v43  ;;  %v2765_v22 = vpop.f32.mrb[33].mxu1 }
 0xd8b   :  { %v2766_v41 = vadd.f32 %v4298_v43, %v2765_v22  ;;  %4860 = vmatprep.mubr.msk.f32.mxu1 %vm507_vm2, %v2794_v18 }
 0xd8c   :  { %4861 = vmatmul.mubr.msk.f32.gmra.mrb[46].mxu1 %vm507_vm2, %v2795_v20  ;;  %v2797_v46 = vmax.f32 %v2771_v21, 0.0 }
 0xd8d   :  { %v2796_v42 = vmax.f32 %v2766_v41, 0.0  ;;  %v4836_v44 = vpop.f32.mrb[34].mxu1 }
 0xd8e   :  { %v2781_v47 = vadd.f32 %v4836_v44, %v4298_v43  ;;  %v2775_v48 = vpop.f32.mrb[35].mxu1 }
 0xd8f   :  { %v2776_v49 = vadd.f32 %v4298_v43, %v2775_v48  ;;  %4863 = vmatprep.mubr.msk.f32.mxu1 %vm507_vm2, %v2796_v42  ;;  %v5064_v43 = vpack.c.bf16 %v3401_v56, %v3400_v55 }
 0xd90   :  { %4864 = vmatmul.mubr.msk.f32.gmra.mrb[48].mxu1 %vm507_vm2, %v2797_v46  ;;  %v2799_v51 = vmax.f32 %v2781_v47, 0.0 }
 0xd91   :  { %v2798_v50 = vmax.f32 %v2776_v49, 0.0  ;;  %5065 = vmatprep.subr.bf16.mxu1 %v5064_v43 }
 0xd92   :  { %5067 = vmatpush3.bf16.msra.mxu1 %v5064_v43 }
 0xd93   :  { %4866 = vmatprep.mubr.msk.f32.mxu1 %vm507_vm2, %v2798_v50 }
 0xd94   :  { %4867 = vmatmul.mubr.msk.f32.gmra.mrb[50].mxu1 %vm507_vm2, %v2799_v51 }
 0xd95   :  { %4905 = vmatprep.mubr.msk.f32.mxu1 %vm685_vm4, %v6382_v11  ;;  %v4315_v11 = vld [vmem:[#allocation28] ss:$0 sm:$0xff] }
 0xd98   :  { %4906 = vmatmul.mubr.msk.f32.vlgmr.msra.gmra.mrb[52].mxu1 %vm685_vm4, %v6391_v23 }
 0xd99   :  { %4908 = vmatprep.mubr.msk.f32.mxu1 %vm685_vm4, %v6394_v24 }
 0xd9c   :  { %4909 = vmatmul.mubr.msk.f32.gmra.mrb[54].mxu1 %vm685_vm4, %v6401_v25 }
 0xd9d   :  { %4911 = vmatprep.mubr.msk.f32.mxu1 %vm685_vm4, %v6404_v26 }
 0xda0   :  { %4912 = vmatmul.mubr.msk.f32.gmra.mrb[56].mxu1 %vm685_vm4, %v6411_v27 }
 0xda1   :  { %4914 = vmatprep.mubr.msk.f32.mxu1 %vm685_vm4, %v6414_v28 }
 0xda4   :  { %4915 = vmatmul.mubr.msk.f32.gmra.mrb[58].mxu1 %vm685_vm4, %v6421_v31 }
 0xda5   :  { %4917 = vmatprep.mubr.msk.f32.mxu1 %vm685_vm4, %v6424_v32 }
 0xda8   :  { %4918 = vmatmul.mubr.msk.f32.gmra.mrb[60].mxu1 %vm685_vm4, %v6431_v33 }
 0xda9   :  { %4920 = vmatprep.mubr.msk.f32.mxu1 %vm685_vm4, %v6434_v34 }
 0xdac   :  { %4921 = vmatmul.mubr.msk.f32.gmra.mrb[62].mxu1 %vm685_vm4, %v6441_v36 }
 0xdad   :  { %4923 = vmatprep.mubr.msk.f32.mxu1 %vm685_vm4, %v6444_v37 }
 0xdb0   :  { %4924 = vmatmul.mubr.msk.f32.gmra.mrb[64].mxu1 %vm685_vm4, %v6451_v38 }
 0xdb1   :  { %4926 = vmatprep.mubr.msk.f32.mxu1 %vm685_vm4, %v6454_v39 }
 0xdb4   :  { %4927 = vmatmul.mubr.msk.f32.gmra.mrb[66].mxu1 %vm685_vm4, %v6461_v40 }
 0xe4b   :  { %v4847_v23 = vpop.f32.mrb[36].mxu1 }
 0xe4c   :  { %v2931_v24 = vadd.f32 %v4847_v23, %v4315_v11  ;;  %v2925_v25 = vpop.f32.mrb[37].mxu1 }
 0xe4d   :  { %v2926_v26 = vadd.f32 %v4315_v11, %v2925_v25 }
 0xe4e   :  { %v3005_v31 = vmax.f32 %v2931_v24, 0.0 }
 0xe4f   :  { %v3004_v27 = vmax.f32 %v2926_v26, 0.0  ;;  %v4850_v28 = vpop.f32.mrb[38].mxu1 }
 0xe50   :  { %v2941_v32 = vadd.f32 %v4850_v28, %v4315_v11  ;;  %v2935_v33 = vpop.f32.mrb[39].mxu1  ;;  %v6588_v28 = vld [vmem:[#allocation29] ss:$0 sm:$0xff] }
 0xe51   :  { %v2936_v34 = vadd.f32 %v4315_v11, %v2935_v33  ;;  %4877 = vmatprep.mubr.msk.f32.mxu0 %vm507_vm2, %v3004_v27 }
 0xe52   :  { %4878 = vmatmul.mubr.msk.f32.vlgmr.msra.gmra.mrb[36].mxu0 %vm507_vm2, %v3005_v31  ;;  %v3007_v38 = vmax.f32 %v2941_v32, 0.0 }
 0xe53   :  { %v3006_v36 = vmax.f32 %v2936_v34, 0.0  ;;  %v4853_v37 = vpop.f32.mrb[40].mxu1 }
 0xe54   :  { %v2951_v39 = vadd.f32 %v4853_v37, %v4315_v11  ;;  %v2945_v40 = vpop.f32.mrb[41].mxu1 }
 0xe55   :  { %v2946_v57 = vadd.f32 %v4315_v11, %v2945_v40  ;;  %4880 = vmatprep.mubr.msk.f32.mxu0 %vm507_vm2, %v3006_v36 }
 0xe56   :  { %4881 = vmatmul.mubr.msk.f32.gmra.mrb[38].mxu0 %vm507_vm2, %v3007_v38  ;;  %v3009_v60 = vmax.f32 %v2951_v39, 0.0 }
 0xe57   :  { %v3008_v58 = vmax.f32 %v2946_v57, 0.0  ;;  %v4856_v59 = vpop.f32.mrb[42].mxu1 }
 0xe58   :  { %v2961_v61 = vadd.f32 %v4856_v59, %v4315_v11  ;;  %v2955_v62 = vpop.f32.mrb[43].mxu1 }
 0xe59   :  { %v2956_v63 = vadd.f32 %v4315_v11, %v2955_v62  ;;  %4883 = vmatprep.mubr.msk.f32.mxu0 %vm507_vm2, %v3008_v58 }
 0xe5a   :  { %4884 = vmatmul.mubr.msk.f32.gmra.mrb[40].mxu0 %vm507_vm2, %v3009_v60  ;;  %v3011_v2 = vmax.f32 %v2961_v61, 0.0 }
 0xe5b   :  { %v3010_v0 = vmax.f32 %v2956_v63, 0.0  ;;  %v4859_v1 = vpop.f32.mrb[44].mxu1 }
 0xe5c   :  { %v2971_v3 = vadd.f32 %v4859_v1, %v4315_v11  ;;  %v2965_v4 = vpop.f32.mrb[45].mxu1 }
 0xe5d   :  { %v2966_v5 = vadd.f32 %v4315_v11, %v2965_v4  ;;  %4886 = vmatprep.mubr.msk.f32.mxu0 %vm507_vm2, %v3010_v0 }
 0xe5e   :  { %4887 = vmatmul.mubr.msk.f32.gmra.mrb[42].mxu0 %vm507_vm2, %v3011_v2  ;;  %v3013_v8 = vmax.f32 %v2971_v3, 0.0 }
 0xe5f   :  { %v3012_v6 = vmax.f32 %v2966_v5, 0.0  ;;  %v4862_v7 = vpop.f32.mrb[46].mxu1 }
 0xe60   :  { %v2981_v9 = vadd.f32 %v4862_v7, %v4315_v11  ;;  %v2975_v12 = vpop.f32.mrb[47].mxu1 }
 0xe61   :  { %v2976_v13 = vadd.f32 %v4315_v11, %v2975_v12  ;;  %4889 = vmatprep.mubr.msk.f32.mxu0 %vm507_vm2, %v3012_v6 }
 0xe62   :  { %4890 = vmatmul.mubr.msk.f32.gmra.mrb[44].mxu0 %vm507_vm2, %v3013_v8  ;;  %v3015_v17 = vmax.f32 %v2981_v9, 0.0 }
 0xe63   :  { %v3014_v14 = vmax.f32 %v2976_v13, 0.0  ;;  %v4865_v16 = vpop.f32.mrb[48].mxu1 }
 0xe64   :  { %v2991_v18 = vadd.f32 %v4865_v16, %v4315_v11  ;;  %v2985_v19 = vpop.f32.mrb[49].mxu1 }
 0xe65   :  { %v2986_v20 = vadd.f32 %v4315_v11, %v2985_v19  ;;  %4892 = vmatprep.mubr.msk.f32.mxu0 %vm507_vm2, %v3014_v14 }
 0xe66   :  { %4893 = vmatmul.mubr.msk.f32.gmra.mrb[46].mxu0 %vm507_vm2, %v3015_v17  ;;  %v3017_v41 = vmax.f32 %v2991_v18, 0.0 }
 0xe67   :  { %v3016_v21 = vmax.f32 %v2986_v20, 0.0  ;;  %v4868_v22 = vpop.f32.mrb[50].mxu1 }
 0xe68   :  { %v3001_v42 = vadd.f32 %v4868_v22, %v4315_v11  ;;  %v2995_v44 = vpop.f32.mrb[51].mxu1 }
 0xe69   :  { %v2996_v46 = vadd.f32 %v4315_v11, %v2995_v44  ;;  %4895 = vmatprep.mubr.msk.f32.mxu0 %vm507_vm2, %v3016_v21 }
 0xe6a   :  { %4896 = vmatmul.mubr.msk.f32.gmra.mrb[48].mxu0 %vm507_vm2, %v3017_v41  ;;  %v3019_v48 = vmax.f32 %v3001_v42, 0.0 }
 0xe6b   :  { %v3018_v47 = vmax.f32 %v2996_v46, 0.0  ;;  %v6556_v49 = vpop.f32.mrb[52].mxu1 }
 0xe6c   :  { %v6558_v50 = vpop.f32.mrb[53].mxu1 }
 0xe6d   :  { %4898 = vmatprep.mubr.msk.f32.mxu0 %vm507_vm2, %v3018_v47 }
 0xe6e   :  { %4899 = vmatmul.mubr.msk.f32.gmra.mrb[50].mxu0 %vm507_vm2, %v3019_v48 }
 0xe6f   :  { %4961 = vmatprep.mubr.msk.f32.mxu0 %vm5893_vm3, %v5894_v30  ;;  %v6560_v51 = vpop.f32.mrb[54].mxu1 }
 0xe70   :  { %v6562_v52 = vpop.f32.mrb[55].mxu1 }
 0xe73   :  { %v6564_v53 = vpop.f32.mrb[56].mxu1 }
 0xe74   :  { %v6566_v54 = vpop.f32.mrb[57].mxu1 }
 0xe77   :  { %v6568_v55 = vpop.f32.mrb[58].mxu1 }
 0xe78   :  { %v6570_v56 = vpop.f32.mrb[59].mxu1 }
 0xe7b   :  { %v6572_v43 = vpop.f32.mrb[60].mxu1 }
 0xe7c   :  { %v6574_v11 = vpop.f32.mrb[61].mxu1 }
 0xe7f   :  { %v6576_v30 = vpop.f32.mrb[62].mxu1 }
 0xe80   :  { %v6578_v23 = vpop.f32.mrb[63].mxu1 }
 0xe83   :  { %v6580_v24 = vpop.f32.mrb[64].mxu1 }
 0xe84   :  { %v6582_v25 = vpop.f32.mrb[65].mxu1 }
 0xe87   :  { %v6584_v26 = vpop.f32.mrb[66].mxu1 }
 0xe88   :  { %v6586_v27 = vpop.f32.mrb[67].mxu1 }
 0xf25   :  { %v4879_v31 = vpop.f32.mrb[36].mxu0 }
 0xf26   :  { %v6591_v32 = vadd.f32 %v4879_v31, %v6588_v28  ;;  %v3145_v33 = vpop.f32.mrb[37].mxu0 }
 0xf27   :  { %v6594_v34 = vadd.f32 %v6588_v28, %v3145_v33 }
 0xf28   :  { %v3241_v36 = vand.u32 2147483647, %v6591_v32 }
 0xf29   :  { %v3240_v38 = vand.u32 2147483647, %v6594_v34  ;;  %v4882_v40 = vpop.f32.mrb[38].mxu0  ;;  %v3224_v29 = vmax.f32 %v6594_v34, 0.0 }
 0xf2a   :  { %v3257_v57 = vsub.f32 0.0, %v3241_v36  ;;  %v6603_v58 = vadd.f32 %v4882_v40, %v6588_v28  ;;  %v3155_v59 = vpop.f32.mrb[39].mxu0 }
 0xf2b   :  { %v3256_v60 = vsub.f32 0.0, %v3240_v38  ;;  %v6606_v61 = vadd.f32 %v6588_v28, %v3155_v59 }
 0xf2c   :  { %v3274_v62 = vmul.f32 1.442695, %v3257_v57  ;;  %v3243_v63 = vand.u32 2147483647, %v6603_v58 }
 0xf2d   :  { %v3272_v1 = vmul.f32 1.442695, %v3256_v60  ;;  %v3242_v2 = vand.u32 2147483647, %v6606_v61  ;;  %v4885_v4 = vpop.f32.mrb[40].mxu0 }
 0xf2e   :  { %5197 = vpow2.f32 %v3274_v62  ;;  %v3259_v5 = vsub.f32 0.0, %v3243_v63  ;;  %v6615_v6 = vadd.f32 %v4885_v4, %v6588_v28  ;;  %v3165_v7 = vpop.f32.mrb[41].mxu0 }
 0xf2f   :  { %5199 = vpow2.f32 %v3272_v1  ;;  %v3258_v8 = vsub.f32 0.0, %v3242_v2  ;;  %v6618_v9 = vadd.f32 %v6588_v28, %v3165_v7 }
 0xf30   :  { %v3278_v12 = vmul.f32 1.442695, %v3259_v5  ;;  %v3245_v13 = vand.u32 2147483647, %v6615_v6 }
 0xf31   :  { %v3276_v16 = vmul.f32 1.442695, %v3258_v8  ;;  %v3244_v17 = vand.u32 2147483647, %v6618_v9  ;;  %v4888_v19 = vpop.f32.mrb[42].mxu0 }
 0xf32   :  { %v3261_v20 = vsub.f32 0.0, %v3245_v13  ;;  %v6627_v21 = vadd.f32 %v4888_v19, %v6588_v28  ;;  %v3175_v22 = vpop.f32.mrb[43].mxu0  ;;  %5201 = vpow2.f32 %v3278_v12 }
 0xf33   :  { %v3260_v41 = vsub.f32 0.0, %v3244_v17  ;;  %v6630_v42 = vadd.f32 %v6588_v28, %v3175_v22  ;;  %5203 = vpow2.f32 %v3276_v16 }
 0xf34   :  { %v3282_v46 = vmul.f32 1.442695, %v3261_v20  ;;  %v3247_v40 = vand.u32 2147483647, %v6627_v21 }
 0xf35   :  { %v4891_v48 = vpop.f32.mrb[44].mxu0  ;;  %v3280_v31 = vmul.f32 1.442695, %v3260_v41  ;;  %v3246_v33 = vand.u32 2147483647, %v6630_v42 }
 0xf36   :  { %v6638_v36 = vadd.f32 %v4891_v48, %v6588_v28  ;;  %v3185_v38 = vpop.f32.mrb[45].mxu0  ;;  %5205 = vpow2.f32 %v3282_v46  ;;  %v3263_v7 = vsub.f32 0.0, %v3247_v40 }
 0xf37   :  { %v6642_v57 = vadd.f32 %v6588_v28, %v3185_v38  ;;  %5207 = vpow2.f32 %v3280_v31  ;;  %v3262_v2 = vsub.f32 0.0, %v3246_v33 }
 0xf38   :  { %v5198_v59 = vpop.eup %5197  ;;  %v3286_v46 = vmul.f32 1.442695, %v3263_v7  ;;  %v3249_v48 = vand.u32 2147483647, %v6638_v36 }
 0xf39   :  { %v5200_v62 = vpop.eup %5199  ;;  %v3305_v63 = vadd.f32 1.0, %v5198_v59  ;;  %v4894_v5 = vpop.f32.mrb[46].mxu0  ;;  %v3284_v20 = vmul.f32 1.442695, %v3262_v2  ;;  %v3248_v22 = vand.u32 2147483647, %v6642_v57 }
 0xf3a   :  { %v3304_v1 = vadd.f32 1.0, %v5200_v62  ;;  %v6649_v8 = vadd.f32 %v4894_v5, %v6588_v28  ;;  %v3195_v12 = vpop.f32.mrb[47].mxu0  ;;  %v3265_v5 = vsub.f32 0.0, %v3249_v48 }
 0xf3b   :  { %5209 = vlog2.f32 %v3305_v63  ;;  %v6652_v13 = vadd.f32 %v6588_v28, %v3195_v12 }
 0xf3c   :  { %5211 = vlog2.f32 %v3304_v1  ;;  %v5202_v16 = vpop.eup %5201  ;;  %v3264_v1 = vsub.f32 0.0, %v3248_v22  ;;  %v3290_v33 = vmul.f32 1.442695, %v3265_v5  ;;  %v3251_v4 = vand.u32 2147483647, %v6649_v8 }
 0xf3d   :  { %v4897_v17 = vpop.f32.mrb[48].mxu0  ;;  %v5204_v19 = vpop.eup %5203  ;;  %v3307_v38 = vadd.f32 1.0, %v5202_v16  ;;  %5213 = vpow2.f32 %v3284_v20  ;;  %v3250_v48 = vand.u32 2147483647, %v6652_v13 }
 0xf3e   :  { %v3205_v41 = vpop.f32.mrb[49].mxu0  ;;  %v6661_v40 = vadd.f32 %v4897_v17, %v6588_v28  ;;  %v3306_v62 = vadd.f32 1.0, %v5204_v19  ;;  %5215 = vpow2.f32 %v3286_v46  ;;  %v3288_v46 = vmul.f32 1.442695, %v3264_v1 }
 0xf3f   :  { %v6664_v59 = vadd.f32 %v6588_v28, %v3205_v41  ;;  %5217 = vlog2.f32 %v3307_v38  ;;  %v3225_v41 = vmax.f32 %v6591_v32, 0.0  ;;  %v3266_v47 = vsub.f32 0.0, %v3250_v48 }
 0xf40   :  { %v5206_v2 = vpop.eup %5205  ;;  %5219 = vlog2.f32 %v3306_v62  ;;  %v3253_v5 = vand.u32 2147483647, %v6661_v40  ;;  %v3227_v48 = vmax.f32 %v6603_v58, 0.0 }
 0xf41   :  { %v4900_v63 = vpop.f32.mrb[50].mxu0  ;;  %v5208_v12 = vpop.eup %5207  ;;  %v3309_v44 = vadd.f32 1.0, %v5206_v2  ;;  %5221 = vpow2.f32 %v3288_v46  ;;  %v3252_v2 = vand.u32 2147483647, %v6664_v59 }
 0xf42   :  { %v3215_v7 = vpop.f32.mrb[51].mxu0  ;;  %v6672_v19 = vadd.f32 %v4900_v63, %v6588_v28  ;;  %v3308_v60 = vadd.f32 1.0, %v5208_v12  ;;  %5223 = vpow2.f32 %v3290_v33 }
 0xf43   :  { %v6676_v38 = vadd.f32 %v6588_v28, %v3215_v7  ;;  %v3267_v28 = vsub.f32 0.0, %v3251_v4 }
 0xf44   :  { %5225 = vlog2.f32 %v3308_v60  ;;  %v3255_v46 = vand.u32 2147483647, %v6672_v19 }
 0xf45   :  { %v5210_v17 = vpop.eup %5209  ;;  %5227 = vlog2.f32 %v3309_v44  ;;  %v3269_v44 = vsub.f32 0.0, %v3253_v5 }
 0xf46   :  { %v5212_v20 = vpop.eup %5211  ;;  %v3323_v22 = vmul.f32 0.6931472, %v5210_v17 }
 0xf47   :  { %v3321_v31 = vmul.f32 0.6931472, %v5212_v20  ;;  %v5214_v1 = vpop.eup %5213 }
 0xf48   :  { %v3353_v16 = vadd.f32 %v3323_v22, %v3225_v41  ;;  %v5216_v7 = vpop.eup %5215  ;;  %v3310_v60 = vadd.f32 1.0, %v5214_v1  ;;  %v3294_v41 = vmul.f32 1.442695, %v3267_v28  ;;  %v3268_v22 = vsub.f32 0.0, %v3252_v2 }
 0xf49   :  { %v3352_v62 = vadd.f32 %v3321_v31, %v3224_v29  ;;  %v5218_v29 = vpop.eup %5217  ;;  %v3292_v31 = vmul.f32 1.442695, %v3266_v47  ;;  %v3311_v47 = vadd.f32 1.0, %v5216_v7  ;;  %v3298_v1 = vmul.f32 1.442695, %v3269_v44 }
 0xf4a   :  { %v3369_v63 = vmul.f32 0.9, %v3353_v16  ;;  %v5220_v16 = vpop.eup %5219  ;;  %v3327_v4 = vmul.f32 0.6931472, %v5218_v29  ;;  %v3296_v5 = vmul.f32 1.442695, %v3268_v22 }
 0xf4b   :  { %v3368_v17 = vmul.f32 0.9, %v3352_v62  ;;  %v3325_v20 = vmul.f32 0.6931472, %v5220_v16  ;;  %v3254_v62 = vand.u32 2147483647, %v6676_v38 }
 0xf4c   :  { %v3385_v14 = vadd.f32 0.1, %v3369_v63  ;;  %v5222_v63 = vpop.eup %5221  ;;  %v3355_v33 = vadd.f32 %v3327_v4, %v3227_v48 }
 0xf4d   :  { %v6680_v18 = vadd.f32 0.1, %v3368_v17  ;;  %v3226_v17 = vmax.f32 %v6606_v61, 0.0  ;;  %v5224_v12 = vpop.eup %5223  ;;  %v3312_v16 = vadd.f32 1.0, %v5222_v63  ;;  %v3270_v3 = vsub.f32 0.0, %v3254_v62 }
 0xf4e   :  { %5229 = vrcp.f32 %v3385_v14  ;;  %v5226_v29 = vpop.eup %5225  ;;  %v3313_v37 = vadd.f32 1.0, %v5224_v12  ;;  %v3229_v12 = vmax.f32 %v6615_v6, 0.0 }
 0xf4f   :  { %5231 = vrcp.f32 %v6680_v18  ;;  %v3354_v28 = vadd.f32 %v3325_v20, %v3226_v17  ;;  %v5228_v2 = vpop.eup %5227  ;;  %v3329_v39 = vmul.f32 0.6931472, %v5226_v29  ;;  %v3228_v20 = vmax.f32 %v6618_v9, 0.0 }
 0xf50   :  { %5233 = vpow2.f32 %v3292_v31  ;;  %v3271_v31 = vsub.f32 0.0, %v3255_v46  ;;  %v3300_v22 = vmul.f32 1.442695, %v3270_v3 }
 0xf51   :  { %5235 = vlog2.f32 %v3310_v60  ;;  %v3371_v60 = vmul.f32 0.9, %v3355_v33  ;;  %v3370_v4 = vmul.f32 0.9, %v3354_v28 }
 0xf52   :  { %5237 = vpow2.f32 %v3294_v41  ;;  %v3302_v44 = vmul.f32 1.442695, %v3271_v31  ;;  %v3331_v41 = vmul.f32 0.6931472, %v5228_v2 }
 0xf53   :  { %5239 = vlog2.f32 %v3311_v47  ;;  %v3387_v33 = vadd.f32 0.1, %v3371_v60  ;;  %v3356_v47 = vadd.f32 %v3329_v39, %v3228_v20  ;;  %v3386_v62 = vadd.f32 0.1, %v3370_v4 }
 0xf54   :  { %5241 = vpow2.f32 %v3298_v1  ;;  %v5896_v60 = vmov 0   ;;  %v3231_v4 = vmax.f32 %v6627_v21, 0.0 }
 0xf55   :  { %5243 = vpow2.f32 %v3296_v5  ;;  %v3372_v3 = vmul.f32 0.9, %v3356_v47  ;;  %5187 = vset.pattern.permute.xlu1 %v5896_v60  ;;  %5188 = vset.pattern.permute.xlu0 %v5896_v60 }
 0xf56   :  { %5245 = vlog2.f32 %v3312_v16 }
 0xf57   :  { %5247 = vlog2.f32 %v3385_v14  ;;  %v3230_v14 = vmax.f32 %v6630_v42, 0.0 }
 0xf58   :  { %v5230_v0 = vpop.eup %5229  ;;  %5249 = vlog2.f32 %v3313_v37 }
 0xf59   :  { %v5232_v7 = vpop.eup %5231  ;;  %3597 = vrot.lane.b32.xlu1 %v5230_v0, %s5895_s25  ;;  %5251 = vpow2.f32 %v3302_v44  ;;  %v3357_v0 = vadd.f32 %v3331_v41, %v3229_v12 }
 0xf5a   :  { %3595 = vrot.lane.b32.xlu0 %v5232_v7, %s5895_s25  ;;  %v5234_v46 = vpop.eup %5233  ;;  %5253 = vpow2.f32 %v3300_v22  ;;  %v3388_v7 = vadd.f32 0.1, %v3372_v3 }
 0xf5b   :  { %v5236_v48 = vpop.eup %5235  ;;  %v3314_v1 = vadd.f32 1.0, %v5234_v46  ;;  %5255 = vlog2.f32 %v6680_v18  ;;  %v3373_v5 = vmul.f32 0.9, %v3357_v0 }
 0xf5c   :  { %v5238_v63 = vpop.eup %5237  ;;  %v3333_v17 = vmul.f32 0.6931472, %v5236_v48  ;;  %5257 = vrcp.f32 %v3387_v33 }
 0xf5d   :  { %v5240_v29 = vpop.eup %5239  ;;  %5259 = vlog2.f32 %v3386_v62  ;;  %v3315_v31 = vadd.f32 1.0, %v5238_v63  ;;  %v3389_v22 = vadd.f32 0.1, %v3373_v5 }
 0xf5e   :  { %v5242_v28 = vpop.eup %5241  ;;  %v3335_v37 = vmul.f32 0.6931472, %v5240_v29  ;;  %v3358_v2 = vadd.f32 %v3333_v17, %v3230_v14  ;;  %5261 = vlog2.f32 %v3314_v1  ;;  %v3232_v17 = vmax.f32 %v6642_v57, 0.0 }
 0xf5f   :  { %v5244_v39 = vpop.eup %5243  ;;  %5263 = vrcp.f32 %v3386_v62  ;;  %v3317_v1 = vadd.f32 1.0, %v5242_v28 }
 0xf60   :  { %v5246_v16 = vpop.eup %5245  ;;  %5265 = vlog2.f32 %v3387_v33  ;;  %v3359_v46 = vadd.f32 %v3335_v37, %v3231_v4  ;;  %v3374_v48 = vmul.f32 0.9, %v3358_v2  ;;  %v3316_v0 = vadd.f32 1.0, %v5244_v39 }
 0xf61   :  { %v5248_v18 = vpop.eup %5247  ;;  %5267 = vlog2.f32 %v3315_v31  ;;  %v3337_v47 = vmul.f32 0.6931472, %v5246_v16  ;;  %v3233_v16 = vmax.f32 %v6638_v36, 0.0 }
 0xf62   :  { %v5250_v44 = vpop.eup %5249  ;;  %v3710_v41 = vmul.f32 0.6931472, %v5248_v18  ;;  %5269 = vrcp.f32 %v3388_v7  ;;  %v3375_v3 = vmul.f32 0.9, %v3359_v46  ;;  %v3390_v14 = vadd.f32 0.1, %v3374_v48 }
 0xf63   :  { %v5252_v20 = vpop.eup %5251  ;;  %5271 = vlog2.f32 %v3388_v7  ;;  %v3339_v5 = vmul.f32 0.6931472, %v5250_v44  ;;  %v3360_v37 = vadd.f32 %v3337_v47, %v3232_v17  ;;  %v3234_v48 = vmax.f32 %v6652_v13, 0.0 }
 0xf64   :  { %v5254_v12 = vpop.eup %5253  ;;  %3773 = vrot.lane.b32.xlu1 %v3710_v41, %s5895_s25  ;;  %5273 = vrcp.f32 %v3389_v22  ;;  %v3319_v28 = vadd.f32 1.0, %v5252_v20  ;;  %v3391_v18 = vadd.f32 0.1, %v3375_v3 }
 0xf65   :  { %v5256_v62 = vpop.eup %5255  ;;  %5275 = vlog2.f32 %v3316_v0  ;;  %v3318_v31 = vadd.f32 1.0, %v5254_v12  ;;  %v3361_v4 = vadd.f32 %v3339_v5, %v3233_v16  ;;  %v3376_v44 = vmul.f32 0.9, %v3360_v37 }
 0xf66   :  { %v5258_v63 = vpop.eup %5257  ;;  %v3708_v33 = vmul.f32 0.6931472, %v5256_v62  ;;  %5277 = vlog2.f32 %v3389_v22 }
 0xf67   :  { %v5260_v29 = vpop.eup %5259  ;;  %5279 = vlog2.f32 %v3317_v1  ;;  %v3377_v47 = vmul.f32 0.9, %v3361_v4  ;;  %v3392_v0 = vadd.f32 0.1, %v3376_v44 }
 0xf68   :  { %3771 = vrot.lane.b32.xlu0 %v3708_v33, %s5895_s25  ;;  %3601 = vrot.lane.b32.xlu1 %v5258_v63, %s5895_s25  ;;  %v5262_v39 = vpop.eup %5261  ;;  %v3712_v7 = vmul.f32 0.6931472, %v5260_v29  ;;  %5281 = vrcp.f32 %v3390_v14  ;;  %v3235_v33 = vmax.f32 %v6649_v8, 0.0 }
 0xf69   :  { %v5264_v2 = vpop.eup %5263  ;;  %v3341_v41 = vmul.f32 0.6931472, %v5262_v39  ;;  %5283 = vlog2.f32 %v3318_v31  ;;  %v3393_v5 = vadd.f32 0.1, %v3377_v47 }
 0xf6a   :  { %v5266_v60 = vpop.eup %5265  ;;  %5285 = vlog2.f32 %v3390_v14 }
 0xf6b   :  { %v5268_v46 = vpop.eup %5267  ;;  %5287 = vlog2.f32 %v3319_v28  ;;  %v3714_v12 = vmul.f32 0.6931472, %v5266_v60  ;;  %v3362_v63 = vadd.f32 %v3341_v41, %v3234_v48 }
 0xf6c   :  { %3775 = vrot.lane.b32.xlu0 %v3712_v7, %s5895_s25  ;;  %3599 = vrot.lane.b32.xlu1 %v5264_v2, %s5895_s25  ;;  %v5270_v22 = vpop.eup %5269  ;;  %5289 = vrcp.f32 %v3391_v18  ;;  %v3343_v62 = vmul.f32 0.6931472, %v5268_v46 }
 0xf6d   :  { %v5272_v20 = vpop.eup %5271  ;;  %5291 = vlog2.f32 %v3391_v18  ;;  %v3378_v31 = vmul.f32 0.9, %v3362_v63  ;;  %v3236_v18 = vmax.f32 %v6664_v59, 0.0  ;;  %v3238_v63 = vmax.f32 %v6676_v38, 0.0 }
 0xf6e   :  { %v5274_v17 = vpop.eup %5273  ;;  %v3716_v29 = vmul.f32 0.6931472, %v5272_v20  ;;  %5293 = vrcp.f32 %v3392_v0  ;;  %v3363_v37 = vadd.f32 %v3343_v62, %v3235_v33  ;;  %v3239_v33 = vmax.f32 %v6672_v19, 0.0 }
 0xf6f   :  { %v5276_v1 = vpop.eup %5275  ;;  %5295 = vlog2.f32 %v3392_v0  ;;  %v3394_v41 = vadd.f32 0.1, %v3378_v31 }
 0xf70   :  { %3603 = vrot.lane.b32.xlu0 %v5270_v22, %s5895_s25  ;;  %3777 = vrot.lane.b32.xlu1 %v3714_v12, %s5895_s25  ;;  %v5278_v3 = vpop.eup %5277  ;;  %v3345_v2 = vmul.f32 0.6931472, %v5276_v1  ;;  %5297 = vrcp.f32 %v3393_v5  ;;  %v3379_v44 = vmul.f32 0.9, %v3363_v37  ;;  %v3237_v22 = vmax.f32 %v6661_v40, 0.0 }
 0xf71   :  { %v5280_v14 = vpop.eup %5279  ;;  %v3718_v28 = vmul.f32 0.6931472, %v5278_v3  ;;  %5299 = vlog2.f32 %v3393_v5 }
 0xf72   :  { %v5282_v39 = vpop.eup %5281  ;;  %v3347_v60 = vmul.f32 0.6931472, %v5280_v14  ;;  %v3364_v48 = vadd.f32 %v3345_v2, %v3236_v18  ;;  %5301 = vrcp.f32 %v3394_v41 }
 0xf73   :  { %v5284_v16 = vpop.eup %5283  ;;  %5303 = vlog2.f32 %v3394_v41 }
 0xf74   :  { %3779 = vrot.lane.b32.xlu0 %v3716_v29, %s5895_s25  ;;  %3605 = vrot.lane.b32.xlu1 %v5274_v17, %s5895_s25  ;;  %v5286_v7 = vpop.eup %5285  ;;  %v3349_v12 = vmul.f32 0.6931472, %v5284_v16  ;;  %v3365_v0 = vadd.f32 %v3347_v60, %v3237_v22  ;;  %v3395_v17 = vadd.f32 0.1, %v3379_v44  ;;  %v3380_v1 = vmul.f32 0.9, %v3364_v48 }
 0xf75   :  { %v5288_v4 = vpop.eup %5287  ;;  %v3720_v20 = vmul.f32 0.6931472, %v5286_v7 }
 0xf76   :  { %v5290_v46 = vpop.eup %5289  ;;  %v3351_v62 = vmul.f32 0.6931472, %v5288_v4  ;;  %v3366_v29 = vadd.f32 %v3349_v12, %v3238_v63  ;;  %v3381_v37 = vmul.f32 0.9, %v3365_v0  ;;  %5305 = vrcp.f32 %v3395_v17 }
 0xf77   :  { %v5292_v47 = vpop.eup %5291  ;;  %5307 = vlog2.f32 %v3395_v17 }
 0xf78   :  { %3607 = vrot.lane.b32.xlu0 %v5282_v39, %s5895_s25  ;;  %3781 = vrot.lane.b32.xlu1 %v3718_v28, %s5895_s25  ;;  %v5294_v3 = vpop.eup %5293  ;;  %v3722_v14 = vmul.f32 0.6931472, %v5292_v47  ;;  %v3367_v31 = vadd.f32 %v3351_v62, %v3239_v33  ;;  %v3396_v39 = vadd.f32 0.1, %v3380_v1  ;;  %v3382_v2 = vmul.f32 0.9, %v3366_v29 }
 0xf79   :  { %v5296_v5 = vpop.eup %5295  ;;  %v3397_v60 = vadd.f32 0.1, %v3381_v37 }
 0xf7a   :  { %v5298_v16 = vpop.eup %5297  ;;  %v3724_v28 = vmul.f32 0.6931472, %v5296_v5  ;;  %v3383_v18 = vmul.f32 0.9, %v3367_v31  ;;  %5309 = vrcp.f32 %v3396_v39  ;;  %v3398_v4 = vadd.f32 0.1, %v3382_v2 }
 0xf7b   :  { %v5300_v7 = vpop.eup %5299  ;;  %5311 = vrcp.f32 %v3397_v60  ;;  %v6925_v2 = vsub.f32 %v6556_v49, %v6591_v32 }
 0xf7c   :  { %3783 = vrot.lane.b32.xlu0 %v3720_v20, %s5895_s25  ;;  %3609 = vrot.lane.b32.xlu1 %v5290_v46, %s5895_s25  ;;  %v5302_v44 = vpop.eup %5301  ;;  %v3726_v41 = vmul.f32 0.6931472, %v5300_v7  ;;  %v3399_v22 = vadd.f32 0.1, %v3383_v18  ;;  %5313 = vlog2.f32 %v3396_v39 }
 0xf7d   :  { %v5304_v46 = vpop.eup %5303  ;;  %5315 = vrcp.f32 %v3398_v4 }
 0xf7e   :  { %v3728_v12 = vmul.f32 0.6931472, %v5304_v46  ;;  %5317 = vrcp.f32 %v3399_v22 }
 0xf7f   :  { %5319 = vlog2.f32 %v3397_v60  ;;  %v6926_v60 = vsub.f32 %v6558_v50, %v6594_v34  ;;  %v6928_v50 = vsub.f32 %v6562_v52, %v6606_v61  ;;  %v6930_v52 = vsub.f32 %v6564_v53, %v6615_v6 }
 0xf80   :  { %3611 = vrot.lane.b32.xlu0 %v5294_v3, %s5895_s25  ;;  %3785 = vrot.lane.b32.xlu1 %v3722_v14, %s5895_s25  ;;  %v5306_v48 = vpop.eup %5305  ;;  %5321 = vlog2.f32 %v3398_v4 }
 0xf81   :  { %v5308_v20 = vpop.eup %5307  ;;  %5323 = vlog2.f32 %v3399_v22 }
 0xf82   :  { %v3730_v47 = vmul.f32 0.6931472, %v5308_v20  ;;  %5325 = vlog2.f32 %v6281_v35 }
 0xf83   :  { %5327 = vlog2.f32 %v6320_v10 }
 0xf84   :  { %3787 = vrot.lane.b32.xlu0 %v3724_v28, %s5895_s25  ;;  %3613 = vrot.lane.b32.xlu1 %v5298_v16, %s5895_s25  ;;  %v5310_v0 = vpop.eup %5309 }
 0xf85   :  { %v5312_v62 = vpop.eup %5311 }
 0xf86   :  { %v5314_v63 = vpop.eup %5313 }
 0xf87   :  { %v5316_v17 = vpop.eup %5315  ;;  %v3732_v29 = vmul.f32 0.6931472, %v5314_v63 }
 0xf88   :  { %3615 = vrot.lane.b32.xlu0 %v5302_v44, %s5895_s25  ;;  %3789 = vrot.lane.b32.xlu1 %v3726_v41, %s5895_s25  ;;  %v5318_v1 = vpop.eup %5317 }
 0xf89   :  { %v5320_v33 = vpop.eup %5319 }
 0xf8a   :  { %v5322_v3 = vpop.eup %5321  ;;  %v3734_v5 = vmul.f32 0.6931472, %v5320_v33 }
 0xf8b   :  { %v3736_v14 = vmul.f32 0.6931472, %v5322_v3  ;;  %v5324_v37 = vpop.eup %5323 }
 0xf8c   :  { %3791 = vrot.lane.b32.xlu0 %v3728_v12, %s5895_s25  ;;  %3617 = vrot.lane.b32.xlu1 %v5306_v48, %s5895_s25  ;;  %v3738_v31 = vmul.f32 0.6931472, %v5324_v37 }
 0xf90   :  { %3619 = vrot.lane.b32.xlu0 %v5310_v0, %s5895_s25  ;;  %3793 = vrot.lane.b32.xlu1 %v3730_v47, %s5895_s25  ;;  %v6927_v0 = vsub.f32 %v6560_v51, %v6603_v58 }
 0xf94   :  { %3623 = vrot.lane.b32.xlu0 %v5316_v17, %s5895_s25  ;;  %3621 = vrot.lane.b32.xlu1 %v5312_v62, %s5895_s25 }
 0xf98   :  { %3795 = vrot.lane.b32.xlu0 %v3732_v29, %s5895_s25  ;;  %3625 = vrot.lane.b32.xlu1 %v5318_v1, %s5895_s25 }
 0xf9c   :  { %3799 = vrot.lane.b32.xlu0 %v3736_v14, %s5895_s25  ;;  %3797 = vrot.lane.b32.xlu1 %v3734_v5, %s5895_s25  ;;  %v6929_v5 = vsub.f32 %v6566_v54, %v6618_v9 }
 0xfa0   :  { %3801 = vrot.lane.b32.xlu1 %v3738_v31, %s5895_s25 }
 0xfcb   :  { %v3598_v39 = vpop.permute.xlu1 %3597 }
 0xfcc   :  { %v3644_v16 = vmul.f32 %v3598_v39, %v6925_v2  ;;  %v3596_v28 = vpop.permute.xlu0 %3595 }
 0xfcd   :  { %v3643_v18 = vmul.f32 %v3596_v28, %v6926_v60 }
 0xfce   :  { %v3660_v7 = vmul.f32 %v3644_v16, %v3644_v16 }
 0xfcf   :  { %v3659_v44 = vmul.f32 %v3643_v18, %v3643_v18 }
 0xfd0   :  { %v3692_v4 = vmul.f32 -0.5, %v3660_v7 }
 0xfd1   :  { %v3691_v46 = vmul.f32 -0.5, %v3659_v44 }
 0xfd6   :  { %v3774_v41 = vpop.permute.xlu1 %3773 }
 0xfd7   :  { %v3820_v22 = vsub.f32 %v3692_v4, %v3774_v41  ;;  %v6931_v41 = vsub.f32 %v6570_v56, %v6630_v42  ;;  %v6933_v56 = vsub.f32 %v6574_v11, %v6642_v57  ;;  %v6935_v11 = vsub.f32 %v6578_v23, %v6652_v13 }
 0xfd8   :  { %v6937_v23 = vsub.f32 %v6582_v25, %v6664_v59 }
 0xfd9   :  { %v4366_v48 = vadd.f32 -0.9189385, %v3820_v22 }
 0xfda   :  { %v3772_v12 = vpop.permute.xlu0 %3771  ;;  %v3602_v20 = vpop.permute.xlu1 %3601 }
 0xfdb   :  { %v3819_v47 = vsub.f32 %v3691_v46, %v3772_v12  ;;  %v3646_v49 = vmul.f32 %v3602_v20, %v6927_v0  ;;  %3875 = vperm.xlu1 %5187, %v4366_v48  }
 0xfdd   :  { %v4365_v32 = vadd.f32 -0.9189385, %v3819_v47  ;;  %v3662_v62 = vmul.f32 %v3646_v49, %v3646_v49  ;;  %v6932_v47 = vsub.f32 %v6568_v55, %v6627_v21  ;;  %v6934_v55 = vsub.f32 %v6572_v43, %v6638_v36 }
 0xfde   :  { %v3776_v63 = vpop.permute.xlu0 %3775  ;;  %v3600_v17 = vpop.permute.xlu1 %3599  ;;  %v6936_v43 = vsub.f32 %v6576_v30, %v6649_v8  ;;  %v6938_v30 = vsub.f32 %v6586_v27, %v6676_v38 }
 0xfdf   :  { %v3645_v34 = vmul.f32 %v3600_v17, %v6928_v50  ;;  %3870 = vperm.xlu0 %5188, %v4365_v32   ;;  %v3694_v1 = vmul.f32 -0.5, %v3662_v62 }
 0xfe1   :  { %v3661_v33 = vmul.f32 %v3645_v34, %v3645_v34 }
 0xfe2   :  { %v3604_v29 = vpop.permute.xlu0 %3603  ;;  %v3778_v3 = vpop.permute.xlu1 %3777 }
 0xfe3   :  { %v3693_v14 = vmul.f32 -0.5, %v3661_v33  ;;  %v3647_v51 = vmul.f32 %v3604_v29, %v6929_v5  ;;  %v3822_v58 = vsub.f32 %v3694_v1, %v3778_v3 }
 0xfe5   :  { %v3821_v37 = vsub.f32 %v3693_v14, %v3776_v63  ;;  %v3663_v31 = vmul.f32 %v3647_v51, %v3647_v51  ;;  %v4368_v39 = vadd.f32 -0.9189385, %v3822_v58 }
 0xfe6   :  { %v3780_v2 = vpop.permute.xlu0 %3779  ;;  %v3606_v16 = vpop.permute.xlu1 %3605 }
 0xfe7   :  { %v3695_v28 = vmul.f32 -0.5, %v3663_v31  ;;  %v3648_v61 = vmul.f32 %v3606_v16, %v6930_v52  ;;  %3885 = vperm.xlu0 %5188, %v4368_v39   ;;  %v4367_v7 = vadd.f32 -0.9189385, %v3821_v37 }
 0xfe9   :  { %v3823_v60 = vsub.f32 %v3695_v28, %v3780_v2  ;;  %v3664_v18 = vmul.f32 %v3648_v61, %v3648_v61  ;;  %3880 = vperm.xlu1 %5187, %v4367_v7  }
 0xfea   :  { %v3608_v4 = vpop.permute.xlu0 %3607  ;;  %v3782_v44 = vpop.permute.xlu1 %3781 }
 0xfeb   :  { %v4369_v54 = vadd.f32 -0.9189385, %v3823_v60  ;;  %v3696_v9 = vmul.f32 -0.5, %v3664_v18  ;;  %v3649_v46 = vmul.f32 %v3608_v4, %v6931_v41 }
 0xfed   :  { %v3665_v22 = vmul.f32 %v3649_v46, %v3649_v46  ;;  %v3824_v48 = vsub.f32 %v3696_v9, %v3782_v44  ;;  %3890 = vperm.xlu1 %5187, %v4369_v54  }
 0xfee   :  { %v3784_v12 = vpop.permute.xlu0 %3783  ;;  %v3610_v20 = vpop.permute.xlu1 %3609 }
 0xfef   :  { %v3697_v53 = vmul.f32 -0.5, %v3665_v22  ;;  %v4370_v6 = vadd.f32 -0.9189385, %v3824_v48  ;;  %v3650_v0 = vmul.f32 %v3610_v20, %v6932_v47  ;;  %v6939_v20 = vsub.f32 %v6580_v24, %v6661_v40 }
 0xff1   :  { %v3825_v49 = vsub.f32 %v3697_v53, %v3784_v12  ;;  %v3666_v32 = vmul.f32 %v3650_v0, %v3650_v0  ;;  %3895 = vperm.xlu0 %5188, %v4370_v6  }
 0xff2   :  { %v3612_v62 = vpop.permute.xlu0 %3611  ;;  %v3786_v63 = vpop.permute.xlu1 %3785 }
 0xff3   :  { %v4371_v17 = vadd.f32 -0.9189385, %v3825_v49  ;;  %v3698_v50 = vmul.f32 -0.5, %v3666_v32  ;;  %v3651_v42 = vmul.f32 %v3612_v62, %v6933_v56  ;;  %v6940_v32 = vsub.f32 %v6584_v26, %v6672_v19  ;;  %v5326_v19 = vpop.eup %5325 }
 0xff5   :  { %v3667_v34 = vmul.f32 %v3651_v42, %v3651_v42  ;;  %v3826_v1 = vsub.f32 %v3698_v50, %v3786_v63  ;;  %3900 = vperm.xlu1 %5187, %v4371_v17  }
 0xff6   :  { %v3788_v33 = vpop.permute.xlu0 %3787  ;;  %v3614_v29 = vpop.permute.xlu1 %3613 }
 0xff7   :  { %v3699_v3 = vmul.f32 -0.5, %v3667_v34  ;;  %v4372_v14 = vadd.f32 -0.9189385, %v3826_v1  ;;  %v3652_v21 = vmul.f32 %v3614_v29, %v6934_v55 }
 0xff9   :  { %v3827_v5 = vsub.f32 %v3699_v3, %v3788_v33  ;;  %v3668_v51 = vmul.f32 %v3652_v21, %v3652_v21  ;;  %3905 = vperm.xlu0 %5188, %v4372_v14   ;;  %v5328_v3 = vpop.eup %5327  ;;  %v1964_v14 = vmul.f32 0.6931472, %v5326_v19 }
 0xffa   :  { %v3616_v58 = vpop.permute.xlu0 %3615  ;;  %v3790_v37 = vpop.permute.xlu1 %3789  ;;  %v1955_v55 = vmul.f32 0.6931472, %v5328_v3  ;;  %v3851_v3 = vld [vmem:[%s6943_s0] sm:$0x3] }
 0xffb   :  { %v4373_v31 = vadd.f32 -0.9189385, %v3827_v5  ;;  %v3700_v39 = vmul.f32 -0.5, %v3668_v51  ;;  %v3653_v57 = vmul.f32 %v3616_v58, %v6935_v11  ;;  %v1965_v21 = vsel %vm1956_vm8, %v1964_v14, 0.0  ;;  %v3853_v51 = vld [vmem:[%s6941_s8 + $0x8] sm:$0xff] }
 0xffc   :  { %v1957_v5 = vsel %vm1956_vm8, %v1955_v55, 0.0  ;;  %v6942_v11 = vmov 0.0|0.0   ;;  %v1953_v55 = vmul.f32 -0.5, %v6388_v15 }
 0xffd   :  { %v3669_v2 = vmul.f32 %v3653_v57, %v3653_v57  ;;  %v3828_v16 = vsub.f32 %v3700_v39, %v3790_v37  ;;  %3910 = vperm.xlu1 %5187, %v4373_v31   ;;  %v3852_v37 = vld [vmem:[%s6941_s8] sm:$0xff]  ;;  %v3855_v57 = vld [vmem:[%s6941_s8 + $0x18] sm:$0xff] }
 0xffe   :  { %v3792_v28 = vpop.permute.xlu0 %3791  ;;  %v3618_v52 = vpop.permute.xlu1 %3617 }
 0xfff   :  { %v3701_v61 = vmul.f32 -0.5, %v3669_v2  ;;  %v4374_v7 = vadd.f32 -0.9189385, %v3828_v16  ;;  %v3654_v36 = vmul.f32 %v3618_v52, %v6936_v43  ;;  %v3854_v16 = vld [vmem:[%s6941_s8 + $0x10] sm:$0xff]  ;;  %v3856_v43 = vld [vmem:[%s6941_s8 + $0x20] sm:$0xff] }
0x1001   :  { %v3829_v60 = vsub.f32 %v3701_v61, %v3792_v28  ;;  %v3670_v18 = vmul.f32 %v3654_v36, %v3654_v36  ;;  %3915 = vperm.xlu0 %5188, %v4374_v7  }
0x1002   :  { %v3620_v4 = vpop.permute.xlu0 %3619  ;;  %v3794_v44 = vpop.permute.xlu1 %3793 }
0x1003   :  { %v4375_v54 = vadd.f32 -0.9189385, %v3829_v60  ;;  %v3702_v9 = vmul.f32 -0.5, %v3670_v18  ;;  %v3655_v13 = vmul.f32 %v3620_v4, %v6937_v23  ;;  %v3857_v60 = vld [vmem:[%s6941_s8 + $0x28] sm:$0xff] }
0x1005   :  { %v3671_v41 = vmul.f32 %v3655_v13, %v3655_v13  ;;  %v3830_v46 = vsub.f32 %v3702_v9, %v3794_v44  ;;  %3920 = vperm.xlu1 %5187, %v4375_v54   ;;  %v3858_v9 = vld [vmem:[%s6941_s8 + $0x30] sm:$0xff]  ;;  %v3859_v13 = vld [vmem:[%s6941_s8 + $0x38] sm:$0xff] }
0x1006   :  { %v3624_v22 = vpop.permute.xlu0 %3623  ;;  %v3622_v48 = vpop.permute.xlu1 %3621 }
0x1007   :  { %v4376_v12 = vadd.f32 -0.9189385, %v3830_v46  ;;  %v3657_v8 = vmul.f32 %v3624_v22, %v6938_v30  ;;  %v3656_v53 = vmul.f32 %v3622_v48, %v6939_v20  ;;  %v3703_v6 = vmul.f32 -0.5, %v3671_v41 }
0x1009   :  { %v3673_v47 = vmul.f32 %v3657_v8, %v3657_v8  ;;  %v3672_v0 = vmul.f32 %v3656_v53, %v3656_v53  ;;  %3925 = vperm.xlu0 %5188, %v4376_v12   ;;  %v3860_v12 = vld [vmem:[%s6941_s8 + $0x40] sm:$0xff]  ;;  %v3861_v8 = vld [vmem:[%s6941_s8 + $0x48] sm:$0xff] }
0x100a   :  { %v3796_v25 = vpop.permute.xlu0 %3795  ;;  %v3626_v59 = vpop.permute.xlu1 %3625 }
0x100b   :  { %v3831_v49 = vsub.f32 %v3703_v6, %v3796_v25  ;;  %v3658_v62 = vmul.f32 %v3626_v59, %v6940_v32  ;;  %v3705_v63 = vmul.f32 -0.5, %v3673_v47  ;;  %v3704_v17 = vmul.f32 -0.5, %v3672_v0  ;;  %v3862_v0 = vld [vmem:[%s6941_s8 + $0x50] sm:$0xff]  ;;  %v3863_v59 = vld [vmem:[%s6941_s8 + $0x58] sm:$0xff] }
0x100d   :  { %v4377_v50 = vadd.f32 -0.9189385, %v3831_v49  ;;  %v3674_v27 = vmul.f32 %v3658_v62, %v3658_v62 }
0x100e   :  { %v3800_v38 = vpop.permute.xlu0 %3799  ;;  %v3798_v56 = vpop.permute.xlu1 %3797 }
0x100f   :  { %v3833_v42 = vsub.f32 %v3705_v63, %v3800_v38  ;;  %3930 = vperm.xlu1 %5187, %v4377_v50   ;;  %v3832_v24 = vsub.f32 %v3704_v17, %v3798_v56  ;;  %v3706_v40 = vmul.f32 -0.5, %v3674_v27  ;;  %v3864_v50 = vld [vmem:[%s6941_s8 + $0x60] sm:$0xff]  ;;  %v3865_v27 = vld [vmem:[%s6941_s8 + $0x68] sm:$0xff] }
0x1011   :  { %v4379_v34 = vadd.f32 -0.9189385, %v3833_v42  ;;  %v4378_v1 = vadd.f32 -0.9189385, %v3832_v24  ;;  %v3866_v24 = vld [vmem:[%s6941_s8 + $0x70] sm:$0xff] }
0x1012   :  { %v3802_v33 = vpop.permute.xlu1 %3801 }
0x1013   :  { %3940 = vperm.xlu1 %5187, %v4379_v34   ;;  %v3834_v29 = vsub.f32 %v3706_v40, %v3802_v33  ;;  %3935 = vperm.xlu0 %5188, %v4378_v1   ;;  %v3867_v34 = vld [vmem:[%s6941_s8 + $0x78] sm:$0xff] }
0x1015   :  { %v4380_v26 = vadd.f32 -0.9189385, %v3834_v29 }
0x1017   :  { %3945 = vperm.xlu0 %5188, %v4380_v26  }
0x1036   :  { %1966 = vadd.xlane.f32.xlu0 %v1965_v21 }
0x1037   :  { %1958 = vadd.xlane.f32.xlu1 %v1957_v5  ;;  %v1962_v5 = vmul.f32 -0.5, %v6339_v45 }
0x105a   :  { %v3876_v58 = vpop.permute.xlu1 %3875 }
0x105b   :  { %v3949_v35 = vmul.f32 %v3876_v58, %v3853_v51 }
0x105e   :  { %v3871_v10 = vpop.permute.xlu0 %3870 }
0x105f   :  { %v3948_v31 = vmul.f32 %v3871_v10, %v3852_v37 }
0x1061   :  { %v5069_v39 = vpack.c.bf16 %v3949_v35, %v3948_v31 }
0x1063   :  { %5070 = vmatpush3.bf16.msra.mxu0 %v5069_v39 }
0x1064   :  { %5071 = vmatprep.subr.bf16.mxu0 %v6942_v11 }
0x1066   :  { %v3886_v2 = vpop.permute.xlu0 %3885 }
0x1067   :  { %v3951_v52 = vmul.f32 %v3886_v2, %v3855_v57 }
0x1068   :  { %v3881_v28 = vpop.permute.xlu1 %3880 }
0x1069   :  { %v3950_v61 = vmul.f32 %v3881_v28, %v3854_v16 }
0x106b   :  { %v5072_v7 = vpack.c.bf16 %v3951_v52, %v3950_v61 }
0x106c   :  { %v3891_v36 = vpop.permute.xlu1 %3890 }
0x106d   :  { %5073 = vmatpush3.bf16.msra.mxu0 %v5072_v7  ;;  %v3952_v4 = vmul.f32 %v3891_v36, %v3856_v43 }
0x106e   :  { %5074 = vmatprep.subr.bf16.mxu0 %v6942_v11 }
0x1070   :  { %v3896_v18 = vpop.permute.xlu0 %3895 }
0x1071   :  { %v3953_v44 = vmul.f32 %v3896_v18, %v3857_v60 }
0x1073   :  { %v5075_v54 = vpack.c.bf16 %v3953_v44, %v3952_v4 }
0x1074   :  { %v3901_v23 = vpop.permute.xlu1 %3900 }
0x1075   :  { %5076 = vmatpush3.bf16.msra.mxu0 %v5075_v54  ;;  %v3954_v46 = vmul.f32 %v3901_v23, %v3858_v9 }
0x1076   :  { %5077 = vmatprep.subr.bf16.mxu0 %v6942_v11 }
0x1078   :  { %v3906_v41 = vpop.permute.xlu0 %3905 }
0x1079   :  { %v3955_v22 = vmul.f32 %v3906_v41, %v3859_v13 }
0x107b   :  { %v5078_v48 = vpack.c.bf16 %v3955_v22, %v3954_v46 }
0x107c   :  { %v3911_v30 = vpop.permute.xlu1 %3910 }
0x107d   :  { %5079 = vmatpush3.bf16.msra.mxu0 %v5078_v48  ;;  %v3956_v53 = vmul.f32 %v3911_v30, %v3860_v12 }
0x107e   :  { %5080 = vmatprep.subr.bf16.mxu0 %v6942_v11 }
0x1080   :  { %v3916_v20 = vpop.permute.xlu0 %3915 }
0x1081   :  { %v3957_v6 = vmul.f32 %v3916_v20, %v3861_v8 }
0x1083   :  { %v5081_v47 = vpack.c.bf16 %v3957_v6, %v3956_v53 }
0x1084   :  { %v3921_v25 = vpop.permute.xlu1 %3920 }
0x1085   :  { %5082 = vmatpush3.bf16.msra.mxu0 %v5081_v47  ;;  %v3958_v32 = vmul.f32 %v3921_v25, %v3862_v0 }
0x1086   :  { %5083 = vmatprep.subr.bf16.mxu0 %v6942_v11 }
0x1088   :  { %v3926_v49 = vpop.permute.xlu0 %3925 }
0x1089   :  { %v3959_v62 = vmul.f32 %v3926_v49, %v3863_v59 }
0x108b   :  { %v5084_v63 = vpack.c.bf16 %v3959_v62, %v3958_v32 }
0x108d   :  { %5085 = vmatpush3.bf16.msra.mxu0 %v5084_v63 }
0x108e   :  { %v3931_v17 = vpop.permute.xlu1 %3930  ;;  %5086 = vmatprep.subr.bf16.mxu0 %v6942_v11 }
0x108f   :  { %v3960_v56 = vmul.f32 %v3931_v17, %v3864_v50 }
0x1092   :  { %v3936_v38 = vpop.permute.xlu0 %3935  ;;  %v3941_v40 = vpop.permute.xlu1 %3940 }
0x1093   :  { %v3961_v42 = vmul.f32 %v3936_v38, %v3865_v27  ;;  %v3962_v29 = vmul.f32 %v3941_v40, %v3866_v24 }
0x1095   :  { %v5087_v1 = vpack.c.bf16 %v3961_v42, %v3960_v56 }
0x1096   :  { %v3946_v33 = vpop.permute.xlu0 %3945 }
0x1097   :  { %v3963_v26 = vmul.f32 %v3946_v33, %v3867_v34  ;;  %5088 = vmatpush3.bf16.msra.mxu0 %v5087_v1 }
0x1098   :  { %5089 = vmatprep.subr.bf16.mxu0 %v6942_v11 }
0x1099   :  { %v5090_v19 = vpack.c.bf16 %v3963_v26, %v3962_v29 }
0x109b   :  { %5091 = vmatpush3.bf16.msra.mxu0 %v5090_v19 }
0x109e   :  { %4962 = vmatmul.mubr.f32.vlgmr.msra.gmra.mrb[52].mxu0 %v3851_v3 }
0x10c3   :  { %v1967_v21 = vpop.xlane.xlu0 %1966 }
0x10c4   :  { %v1959_v14 = vpop.xlane.xlu1 %1958  ;;  %v1968_v58 = vsub.f32 %v1962_v5, %v1967_v21 }
0x10c5   :  { %v1960_v51 = vsub.f32 %v1953_v55, %v1959_v14 }
0x10c6   :  { %v4259_v10 = vadd.f32 -7.351508, %v1968_v58 }
0x10c7   :  { %v4258_v37 = vadd.f32 -7.351508, %v1960_v51 }
0x10c9   :  { %v4052_v2 = vsub.f32 %v4258_v37, %v4259_v10 }
0x10cb   :  { %v4053_v16 = vsel %vm1956_vm8, %v4052_v2, -inf }
0x1171   :  { %v4030_v35 = vpop.f32.mrb[52].mxu0 }
0x1172   :  { %v4035_v31 = vadd.f32 %v4258_v37, %v4030_v35  ;;  %v4963_v39 = vpop.f32.mrb[53].mxu0  ;;  %v4034_v8 = vmul.f32 0.125, %v4030_v35 }
0x1174   :  { %v4036_v57 = vsub.f32 %v4035_v31, %v4259_v10 }
0x1176   :  { %v4037_v11 = vsel %vm1956_vm8, %v4036_v57, -inf }
0x1177   :  { %4038 = vmax.xlane.f32.xlu0 %v4037_v11 }
0x117b   :  { %4054 = vmax.xlane.f32.xlu0 %v4053_v16 }
0x1204   :  { %v4039_v28 = vpop.xlane.xlu0 %4038 }
0x1205   :  { %v4040_v15 = vsub.f32 %v4036_v57, %v4039_v28 }
0x1207   :  { %v4041_v52 = vmul.f32 1.442695, %v4040_v15 }
0x1208   :  { %v4055_v61 = vpop.xlane.xlu0 %4054 }
0x1209   :  { %5329 = vpow2.f32 %v4041_v52  ;;  %v4056_v45 = vsub.f32 %v4052_v2, %v4055_v61 }
0x120b   :  { %v4057_v7 = vmul.f32 1.442695, %v4056_v45 }
0x120d   :  { %5331 = vpow2.f32 %v4057_v7 }
0x1213   :  { %v5330_v43 = vpop.eup %5329 }
0x1214   :  { %v4043_v36 = vsel %vm1956_vm8, %v5330_v43, 0.0 }
0x1215   :  { %4044 = vadd.xlane.f32.xlu1 %v4043_v36 }
0x1217   :  { %v5332_v60 = vpop.eup %5331 }
0x1218   :  { %v4059_v18 = vsel %vm1956_vm8, %v5332_v60, 0.0 }
0x1219   :  { %4060 = vadd.xlane.f32.xlu0 %v4059_v18 }
0x12a2   :  { %v4045_v4 = vpop.xlane.xlu1 %4044 }
0x12a3   :  { %5333 = vlog2.f32 %v4045_v4 }
0x12a6   :  { %v4061_v44 = vpop.xlane.xlu0 %4060 }
0x12a7   :  { %5335 = vlog2.f32 %v4061_v44 }
0x12ad   :  { %v5334_v54 = vpop.eup %5333 }
0x12ae   :  { %v4047_v9 = vmul.f32 0.6931472, %v5334_v54 }
0x12b0   :  { %v4048_v23 = vadd.f32 %v4047_v9, %v4039_v28 }
0x12b1   :  { %v5336_v13 = vpop.eup %5335 }
0x12b2   :  { %v4049_v41 = vsub.f32 %v4036_v57, %v4048_v23  ;;  %v4063_v46 = vmul.f32 0.6931472, %v5336_v13 }
0x12b4   :  { %v4050_v22 = vmul.f32 1.442695, %v4049_v41  ;;  %v4064_v48 = vadd.f32 %v4063_v46, %v4055_v61 }
0x12b6   :  { %5337 = vpow2.f32 %v4050_v22  ;;  %v4065_v12 = vsub.f32 %v4052_v2, %v4064_v48 }
0x12b8   :  { %v4066_v30 = vmul.f32 1.442695, %v4065_v12 }
0x12ba   :  { %5339 = vpow2.f32 %v4066_v30 }
0x12c0   :  { %v5338_v20 = vpop.eup %5337 }
0x12c1   :  { %v4087_v53 = vmul.f32 %v5338_v20, %v4034_v8  ;;  %v4068_v25 = vmul.f32 %v5338_v20, %v4030_v35  ;;  %v4381_v49 = vadd.f32 -0.125, %v5338_v20 }
0x12c3   :  { %v4088_v6 = vsel %vm1956_vm8, %v4087_v53, 0.0  ;;  %v4103_v63 = vmul.f32 %v4381_v49, %v4259_v10 }
0x12c4   :  { %v5340_v47 = vpop.eup %5339  ;;  %4089 = vadd.xlane.f32.xlu0 %v4088_v6 }
0x12c5   :  { %v4069_v0 = vsub.f32 %v5338_v20, %v5340_v47  ;;  %v4104_v17 = vsel %vm1956_vm8, %v4103_v63, 0.0 }
0x12c7   :  { %v4070_v59 = vmul.f32 %v4258_v37, %v4069_v0 }
0x12c9   :  { %v4071_v32 = vadd.f32 %v4070_v59, %v4068_v25 }
0x12cb   :  { %v4072_v62 = vsel %vm1956_vm8, %v4071_v32, 0.0 }
0x12cc   :  { %4073 = vadd.xlane.f32.xlu1 %v4072_v62 }
0x12d0   :  { %4105 = vadd.xlane.f32.xlu1 %v4104_v17 }
0x1351   :  { %v4090_v50 = vpop.xlane.xlu0 %4089 }
0x1352   :  { %v4091_v27 = vrot.slane %v4090_v50, 4 }
0x1354   :  { %v4092_v38 = vadd.f32 %v4091_v27, %v4090_v50 }
0x1356   :  { %v4093_v56 = vrot.slane %v4092_v38, 2 }
0x1358   :  { %v4094_v34 = vadd.f32 %v4093_v56, %v4092_v38 }
0x1359   :  { %v4074_v42 = vpop.xlane.xlu1 %4073 }
0x135a   :  { %v4075_v24 = vrot.slane %v4074_v42, 4  ;;  %v4095_v3 = vrot.slane %v4094_v34, 1 }
0x135c   :  { %v4076_v40 = vadd.f32 %v4075_v24, %v4074_v42  ;;  %v4096_v51 = vadd.f32 %v4095_v3, %v4094_v34 }
0x135d   :  { %v4106_v1 = vpop.xlane.xlu1 %4105 }
0x135e   :  { %v4077_v33 = vrot.slane %v4076_v40, 2  ;;  %v4107_v29 = vrot.slane %v4106_v1, 4 }
0x1360   :  { %v4108_v26 = vadd.f32 %v4107_v29, %v4106_v1  ;;  %v4078_v19 = vadd.f32 %v4077_v33, %v4076_v40 }
0x1362   :  { %v4109_v14 = vrot.slane %v4108_v26, 2  ;;  %v4079_v55 = vrot.slane %v4078_v19, 1 }
0x1364   :  { %v4110_v21 = vadd.f32 %v4109_v14, %v4108_v26  ;;  %v4080_v5 = vadd.f32 %v4079_v55, %v4078_v19 }
0x1366   :  { %5108 = vpush %v4080_v5  ;;  %v4111_v58 = vrot.slane %v4110_v21, 1 }
0x1367   :  { %5110 = vpush %v4096_v51 }
0x1368   :  { %v4112_v37 = vadd.f32 %v4111_v58, %v4110_v21 }
0x136a   :  { %5112 = vpush %v4112_v37 }
0x1397   :  { %s5109_s15 = spop %5108 }
0x1398   :  { %v4082_v35 = vstv %s5109_s15  ;;  %s5111_s24 = spop %5110 }
0x1399   :  { %v4083_v10 = vsub.f32 0.0, %v4082_v35  ;;  %v4098_v31 = vstv %s5111_s24 }
0x139a   :  { %v4099_v39 = vsub.f32 0.0, %v4098_v31 }
0x139b   :  { %v4084_v57 = vmul.f32 0.5, %v4083_v10  ;;  %s5113_s13 = spop %5112 }
0x139c   :  { %v4100_v11 = vmul.f32 0.5, %v4099_v39  ;;  %v4114_v2 = vstv %s5113_s13 }
0x139d   :  { %v4115_v16 = vmul.f32 -1.0, %v4114_v2  ;;  %4086 = vst.msk [vmem:[#allocation31] sm:$0x1] %vm4085_vm9, %v4084_v57 }
0x139e   :  { %4101 = vst.msk [vmem:[#allocation34] sm:$0x1] %vm4085_vm9, %v4100_v11 }
0x139f   :  { %5748 = shalt.err (!%p5745_p8)
}
0x13a0   :  { %s5749_s23 = scalar_lea.hbm %s6123_s17, 16 }
0x13a1   :  { %p5750_p9 = scmp.ne.s32.totalorder %s6123_s17, %s5749_s23  ;;  %p5753_p10 = scmp.lt.u32.totalorder %s5749_s23, %s6123_s17 }
0x13a3   :  { %p5755_p11 = pnand %p5753_p10, %p5750_p9 }
0x13a5   :  { %5758 = shalt.err (!%p5755_p11)
}
0x13a6   :  { %4127 = dma.vmem_to_hbm [thread:$0]  %s4125_s16, 16, %s6123_s17, [#allocation4]   ;;  %v4116_v28 = vmul.f32 0.5, %v4115_v16 }
0x13a7   :  { %s5759_s19 = scalar_lea.vmem %s4135_s14, 16  ;;  %s5763_s28 = scalar_lea.vmem %s4135_s14, 32 }
0x13a8   :  { %4117 = vst.msk [vmem:[#allocation32] sm:$0x1] %vm4085_vm9, %v4116_v28  ;;  %p5760_p12 = scmp.ne.s32.totalorder %s4135_s14, %s5759_s19  ;;  %p5764_p13 = scmp.lt.s32.totalorder %s4135_s14, %s4135_s14 }
0x13a9   :  { %p5765_p0 = scmp.lt.s32.totalorder %s5763_s28, %s5759_s19 }
0x13ab   :  { %p5766_p1 = por %p5765_p0, %p5764_p13 }
0x13ad   :  { %p5767_p2 = pnand %p5766_p1, %p5760_p12 }
0x13af   :  { %5770 = shalt.err (!%p5767_p2)
}
0x13b0   :  { %s5771_s9 = scalar_lea.hbm %s6128_s5, 16 }
0x13b1   :  { %p5772_p3 = scmp.ne.s32.totalorder %s6128_s5, %s5771_s9  ;;  %p5775_p4 = scmp.lt.u32.totalorder %s5771_s9, %s6128_s5 }
0x13b3   :  { %p5777_p5 = pnand %p5775_p4, %p5772_p3 }
0x13b5   :  { %5780 = shalt.err (!%p5777_p5)
}
0x13b6   :  { %4137 = dma.vmem_to_hbm [thread:$0]  %s4135_s14, 16, %s6128_s5, [#allocation33]  }
0x13b7   :  { %s5781_s17 = scalar_lea.vmem %s6829_s26, 16  ;;  %s5785_s20 = scalar_lea.vmem %s6829_s26, 32 }
0x13b8   :  { %p5782_p6 = scmp.ne.s32.totalorder %s6829_s26, %s5781_s17  ;;  %p5786_p7 = scmp.lt.s32.totalorder %s6829_s26, %s6829_s26 }
0x13b9   :  { %p5787_p8 = scmp.lt.s32.totalorder %s5785_s20, %s5781_s17 }
0x13bb   :  { %p5788_p9 = por %p5787_p8, %p5786_p7 }
0x13bd   :  { %p5789_p10 = pnand %p5788_p9, %p5782_p6 }
0x13bf   :  { %5792 = shalt.err (!%p5789_p10)
}
0x13c0   :  { %s5793_s1 = scalar_lea.hbm %s6133_s27, 16 }
0x13c1   :  { %p5794_p11 = scmp.ne.s32.totalorder %s6133_s27, %s5793_s1  ;;  %p5797_p12 = scmp.lt.u32.totalorder %s5793_s1, %s6133_s27 }
0x13c3   :  { %p5799_p13 = pnand %p5797_p12, %p5794_p11 }
0x13c5   :  { %5802 = shalt.err (!%p5799_p13)
}
0x13c6   :  { %4147 = dma.vmem_to_hbm [thread:$0]  %s6829_s26, 16, %s6133_s27, [#allocation33]  }
0x13c7   :  { %5823 = dma.done.wait [#allocation4], 16  }
0x13c8   :  { %5824 = vsyncadd [#allocation4], 4294967280 }
0x13c9   :  { %5825 = dma.done.wait [#allocation33], 32  }
0x13ca   :  { %5826 = vsyncadd [#allocation33], 4294967264 }
0x13cb   :  { %4157 = vsyncpa [#allocation3], 1 }
0x13cc   :  { %4158 = vsyncpa [#allocation6], 1 }
0x13cd   :  { %4159 = vsyncpa [#allocation9], 1 }
0x13ce   :  { %4160 = vsyncpa [#allocation12], 1 }
0x13cf   :  { %4161 = vsyncpa [#allocation15], 1 }
0x13d0   :  { %4162 = vsyncpa [#allocation18], 1 }
0x13d1   :  { %4163 = vsyncpa [#allocation21], 1 }
0x13d2   :  { %4164 = vsyncpa [#allocation24], 1 }
0x13d3   :  { %4165 = vsyncpa [#allocation27], 1 }
0x13d4   :  { %4166 = vsyncpa [#allocation30], 1 }
0x13d5   :  { %4167 = vsyncpa [#allocation4], 1 }
0x13d6   :  { %4168 = vsyncpa [#allocation33], 1 }

</bundles_post_ra>
